<compile_context>
chip_gen: v6e
topology: v6e:2x2x1
jax: 0.10.0
libtpu: 0.0.40
codegen_flags: <defaults>
</compile_context>

<pallas_src>
import functools

import jax
import jax.numpy as jnp
from jax import lax
from jax.experimental import pallas as pl
from jax.experimental.pallas import tpu as pltpu


# ----------------------------------------------------------------------------
# helpers
# ----------------------------------------------------------------------------
def _pick_tile(L, pref=128):
    """Largest tile <= pref that divides L (multiple of 8 if possible)."""
    if L <= pref:
        return L
    if L % pref == 0:
        return pref
    for t in range(pref, 7, -8):
        if L % t == 0:
            return t
    return L


def _round_up(x, m):
    return -(-x // m) * m


# ----------------------------------------------------------------------------
# Pallas kernel 1: fused 3x3 / stride-2 / pad-1 conv (+bias, optional ReLU)
#   input is a 2x2-phase decomposition of the padded image; each of the 9 taps is a
#   contiguous row-slice of one phase matrix -> pure 2D matmuls, no im2col in HBM.
# ----------------------------------------------------------------------------
def _conv_kernel(ph_ref, w_ref, b_ref, o_ref, *, taps, act):
    # ph_ref: (1, 4, Lp, Cin)  w_ref: (9, Cin, Cout)  b_ref: (1, Cout)
    # o_ref : (1, M2, Cout)    with M2 = Ho*(Wo+1)-1 (junk columns sliced off in JAX)
    M2 = o_ref.shape[1]
    Cin = ph_ref.shape[3]
    Cout = o_ref.shape[2]
    acc = jnp.zeros((M2, Cout), jnp.float32)
    for t, (p, off) in enumerate(taps):
        xs = ph_ref[0, p, pl.ds(off, M2), :]          # (M2, Cin), contiguous slice
        wt = w_ref[t]                                 # (Cin, Cout)
        if Cin == 1:
            # K=1 "matmul" == broadcast outer product; keep it on the VPU.
            acc = acc + xs * wt
        else:
            acc = acc + jnp.dot(xs.astype(jnp.bfloat16), wt.astype(jnp.bfloat16),
                                preferred_element_type=jnp.float32)
    acc = acc + b_ref[...]
    if act:
        acc = jnp.maximum(acc, 0.0)
    o_ref[0] = acc.astype(o_ref.dtype)


def _make_phases(x):
    """x: (N, H, W, C) -> (N, 4, (Ho+1)*(Wo+1), C) stride-2 phase decomposition."""
    N, H, W, C = x.shape
    Ho, Wo = H // 2, W // 2
    xp = jnp.pad(x, ((0, 0), (1, 1), (1, 1), (0, 0)))
    phases = []
    for p in range(2):
        for q in range(2):
            ph = xp[:, p:p + 2 * Ho + 1:2, q:q + 2 * Wo + 1:2, :]   # (N, Ho+1, Wo+1, C)
            phases.append(ph.reshape(N, (Ho + 1) * (Wo + 1), C))
    return jnp.stack(phases, axis=1)


def conv3x3_s2(x, w_flat, b, act=True):
    """x: (N,H,W,Cin); w_flat: (9*Cin, Cout) tap-major; returns (N,H/2,W/2,Cout)."""
    N, H, W, Cin = x.shape
    Ho, Wo = H // 2, W // 2
    Cout = w_flat.shape[1]
    Lp = (Ho + 1) * (Wo + 1)
    M2 = Ho * (Wo + 1) - 1
    phases = _make_phases(x)                              # (N, 4, Lp, Cin)
    w = w_flat.reshape(9, Cin, Cout)
    taps = tuple(((di % 2) * 2 + (dj % 2), (di // 2) * (Wo + 1) + (dj // 2))
                 for di in range(3) for dj in range(3))
    # TODO(synk): at very large resolutions also tile over output rows (overlapping
    #             phase-row windows) instead of one whole image per grid step.
    y = pl.pallas_call(
        functools.partial(_conv_kernel, taps=taps, act=act),
        out_shape=jax.ShapeDtypeStruct((N, M2, Cout), jnp.float32),
        grid_spec=pltpu.PrefetchScalarGridSpec(
            num_scalar_prefetch=0,
            grid=(N,),
            in_specs=[
                pl.BlockSpec((1, 4, Lp, Cin), lambda n: (n, 0, 0, 0)),
                pl.BlockSpec((9, Cin, Cout), lambda n: (0, 0, 0)),
                pl.BlockSpec((1, Cout), lambda n: (0, 0)),
            ],
            out_specs=pl.BlockSpec((1, M2, Cout), lambda n: (n, 0, 0)),
        ),
        compiler_params=pltpu.CompilerParams(
            dimension_semantics=("parallel",),
            vmem_limit_bytes=64 * 1024 * 1024),
    )(phases, w, b.reshape(1, -1))
    # drop the interleaved wrap rows: (N, M2, Cout) -> (N, Ho, Wo, Cout)
    y = jnp.pad(y, ((0, 0), (0, 1), (0, 0)))
    return y.reshape(N, Ho, Wo + 1, Cout)[:, :, :Wo, :]


# ----------------------------------------------------------------------------
# Pallas kernel 2: softmax attention (self / cross), query-tiled, returns attn maps
# ----------------------------------------------------------------------------
def _attn_kernel(x_ref, y_ref, wqkv_ref, wo_ref, o_ref, a_ref, *, C):
    x = x_ref[0]                                   # (tq, C) query rows (+ residual)
    y = y_ref[0]                                   # (L, C)  key/value rows
    scale = 1.0 / (C ** 0.5)
    wqkv = wqkv_ref[...].astype(jnp.bfloat16)      # (C, 3C) fused projection weight
    xb = (x * scale).astype(jnp.bfloat16)          # fold 1/sqrt(C) into queries
    yb = y.astype(jnp.bfloat16)
    q = jnp.dot(xb, wqkv[:, :C], preferred_element_type=jnp.float32)       # (tq, C)
    kv = jnp.dot(yb, wqkv[:, C:], preferred_element_type=jnp.float32)      # (L, 2C)
    k = kv[:, :C]
    v = kv[:, C:]
    # contract last dims of q and k directly (no explicit transpose).
    s = lax.dot_general(q.astype(jnp.bfloat16), k.astype(jnp.bfloat16),
                        (((1,), (1,)), ((), ())),
                        preferred_element_type=jnp.float32)                # (tq, L)
    s = s - jnp.max(s, axis=-1, keepdims=True)
    e = jnp.exp(s)
    p = e * pl.reciprocal(jnp.sum(e, axis=-1, keepdims=True), approx=True)  # (tq, L)
    msg = jnp.dot(p.astype(jnp.bfloat16), v.astype(jnp.bfloat16),
                  preferred_element_type=jnp.float32)                      # (tq, C)
    msg = jnp.dot(msg.astype(jnp.bfloat16), wo_ref[...].astype(jnp.bfloat16),
                  preferred_element_type=jnp.float32)
    # TODO(synk): exact LGFCTR transformer block (layer-norms / FFN / merge-MLP) is
    #             not publicly specified here; residual attention update is used.
    o_ref[0] = (x + msg).astype(o_ref.dtype)
    a_ref[0] = p.astype(a_ref.dtype)


def attention(x, y, wqkv, wo):
    N, L, C = x.shape
    tq = _pick_tile(L, 128)
    nq = L // tq
    return pl.pallas_call(
        functools.partial(_attn_kernel, C=C),
        out_shape=(jax.ShapeDtypeStruct((N, L, C), jnp.float32),
                   jax.ShapeDtypeStruct((N, L, L), jnp.float32)),
        grid_spec=pltpu.PrefetchScalarGridSpec(
            num_scalar_prefetch=0,
            grid=(N, nq),
            in_specs=[
                pl.BlockSpec((1, tq, C), lambda n, qi: (n, qi, 0)),
                pl.BlockSpec((1, L, C), lambda n, qi: (n, 0, 0)),
                pl.BlockSpec((C, 3 * C), lambda n, qi: (0, 0)),
                pl.BlockSpec((C, C), lambda n, qi: (0, 0)),
            ],
            out_specs=(
                pl.BlockSpec((1, tq, C), lambda n, qi: (n, qi, 0)),
                pl.BlockSpec((1, tq, L), lambda n, qi: (n, qi, 0)),
            ),
        ),
        compiler_params=pltpu.CompilerParams(
            dimension_semantics=("parallel", "parallel"),
            vmem_limit_bytes=48 * 1024 * 1024),
    )(x, y, wqkv, wo)


# ----------------------------------------------------------------------------
# Pallas kernel 3: coarse matching (similarity + dual softmax confidence)
# ----------------------------------------------------------------------------
def _coarse_match_kernel(f0_ref, f1_ref, conf_ref, *, inv_scale):
    f0 = f0_ref[0]                                 # (L, C)
    f1 = f1_ref[0]
    # fold 1/(C*temperature) into f0 only; no transpose (contract last dims).
    sim = lax.dot_general((f0 * inv_scale).astype(jnp.bfloat16),
                          f1.astype(jnp.bfloat16),
                          (((1,), (1,)), ((), ())),
                          preferred_element_type=jnp.float32)              # (L, L)

    def _sm(v, axis):
        m = jnp.max(v, axis=axis, keepdims=True)
        e = jnp.exp(v - m)
        return e * pl.reciprocal(jnp.sum(e, axis=axis, keepdims=True), approx=True)

    conf_ref[0] = (_sm(sim, 0) * _sm(sim, 1)).astype(conf_ref.dtype)


def coarse_matching(f0, f1, temperature):
    N, L, C = f0.shape
    inv_scale = 1.0 / (float(C) * temperature)
    # TODO(synk): for large L, tile over queries with a two-pass (global column
    #             max/sum) dual softmax so VMEM stays bounded on v7x.
    return pl.pallas_call(
        functools.partial(_coarse_match_kernel, inv_scale=inv_scale),
        out_shape=jax.ShapeDtypeStruct((N, L, L), jnp.float32),
        grid_spec=pltpu.PrefetchScalarGridSpec(
            num_scalar_prefetch=0,
            grid=(N,),
            in_specs=[
                pl.BlockSpec((1, L, C), lambda n: (n, 0, 0)),
                pl.BlockSpec((1, L, C), lambda n: (n, 0, 0)),
            ],
            out_specs=pl.BlockSpec((1, L, L), lambda n: (n, 0, 0)),
        ),
        compiler_params=pltpu.CompilerParams(
            dimension_semantics=("parallel",),
            vmem_limit_bytes=48 * 1024 * 1024),
    )(f0, f1)


# ----------------------------------------------------------------------------
# Pallas kernel 4: fine matching (center correlation + soft-argmax), tiled over M
# ----------------------------------------------------------------------------
def _fine_match_kernel(f0_ref, f1_ref, coords_ref, out_ref, *, inv_sqrt_c):
    f0 = f0_ref[...]                               # (tM, WW, C)
    f1 = f1_ref[...]
    WW = f0.shape[1]
    center = WW // 2
    f0c = f0[:, center, :] * inv_sqrt_c            # (tM, C), scale folded in
    sim = jnp.sum(f0c[:, None, :] * f1, axis=-1)   # (tM, WW)
    sim = sim - jnp.max(sim, axis=-1, keepdims=True)
    e = jnp.exp(sim)
    heat = e * pl.reciprocal(jnp.sum(e, axis=-1, keepdims=True), approx=True)
    coords = coords_ref[...]                       # (WW, 2) in [-1, 1]
    mu = jnp.dot(heat, coords, preferred_element_type=jnp.float32)          # (tM, 2)
    ex2 = jnp.dot(heat, coords * coords, preferred_element_type=jnp.float32)
    var = jnp.maximum(ex2 - mu * mu, 0.0)
    std = jnp.sqrt(jnp.sum(var, axis=-1, keepdims=True))                    # (tM, 1)
    out_ref[...] = jnp.concatenate([mu, std], axis=-1).astype(out_ref.dtype)


def fine_matching(f0u, f1u, coords):
    M, WW, C = f0u.shape
    tM = 256 if M >= 256 else _round_up(M, 8)
    Mp = _round_up(M, tM)
    if Mp != M:
        pad = ((0, Mp - M), (0, 0), (0, 0))
        f0u = jnp.pad(f0u, pad)
        f1u = jnp.pad(f1u, pad)
    out = pl.pallas_call(
        functools.partial(_fine_match_kernel, inv_sqrt_c=1.0 / (C ** 0.5)),
        out_shape=jax.ShapeDtypeStruct((Mp, 3), jnp.float32),
        grid_spec=pltpu.PrefetchScalarGridSpec(
            num_scalar_prefetch=0,
            grid=(Mp // tM,),
            in_specs=[
                pl.BlockSpec((tM, WW, C), lambda i: (i, 0, 0)),
                pl.BlockSpec((tM, WW, C), lambda i: (i, 0, 0)),
                pl.BlockSpec((WW, 2), lambda i: (0, 0)),
            ],
            out_specs=pl.BlockSpec((tM, 3), lambda i: (i, 0)),
        ),
        compiler_params=pltpu.CompilerParams(
            dimension_semantics=("parallel",),
            vmem_limit_bytes=48 * 1024 * 1024),
    )(f0u, f1u, coords)
    return out[:M]


# ----------------------------------------------------------------------------
# backbone + fine-window unfold (JAX glue around the kernels)
# ----------------------------------------------------------------------------
def backbone(img0, img1, params):
    feats_f, feats_c = [], []
    for img in (img0, img1):
        f1 = conv3x3_s2(img, params['w1'], params['b1'], act=True)    # 1/2, Cf
        f2 = conv3x3_s2(f1, params['w2'], params['b2'], act=True)     # 1/4
        f3 = conv3x3_s2(f2, params['w3'], params['b3'], act=False)    # 1/8, Cc
        feats_f.append(f1)
        feats_c.append(f3)
    feat_f0, feat_f1 = feats_f
    fc0, fc1 = feats_c
    N, Hc, Wc, Cc = fc0.shape
    L = Hc * Wc
    x0 = fc0.reshape(N, L, Cc)
    x1 = fc1.reshape(N, L, Cc)

    attention_vis_lists = []
    for layer in params['layers']:
        wqkv = jnp.concatenate([layer['wq'], layer['wk'], layer['wv']], axis=1)
        wo = layer['wo']
        if layer['name'] == 'self':
            x0n, a0 = attention(x0, x0, wqkv, wo)
            x1n, a1 = attention(x1, x1, wqkv, wo)
        else:  # cross
            x0n, a0 = attention(x0, x1, wqkv, wo)
            x1n, a1 = attention(x1, x0, wqkv, wo)
        x0, x1 = x0n, x1n
        attention_vis_lists.append((a0, a1))

    feat_c0 = x0.reshape(N, Hc, Wc, Cc)
    feat_c1 = x1.reshape(N, Hc, Wc, Cc)
    return feat_c0, feat_f0, feat_c1, feat_f1, attention_vis_lists


def unfold_windows(feat, win, stride):
    # feat: (N, Hf, Wf, C) -> (N, Hc*Wc, win*win, C), one window per coarse cell
    N, Hf, Wf, C = feat.shape
    pad = win // 2
    xp = jnp.pad(feat, ((0, 0), (pad, pad), (pad, pad), (0, 0)))
    Hc, Wc = Hf // stride, Wf // stride
    pieces = []
    for di in range(win):
        for dj in range(win):
            pieces.append(xp[:, di:di + (Hc - 1) * stride + 1:stride,
                             dj:dj + (Wc - 1) * stride + 1:stride, :])
    w = jnp.stack(pieces, axis=3)                       # (N, Hc, Wc, WW, C)
    return w.reshape(N, Hc * Wc, win * win, C)


# ----------------------------------------------------------------------------
# Full LGFCTR_vis forward
# ----------------------------------------------------------------------------
def lgfctr_vis_forward(data, params, coarse_temperature=0.1, fine_window=5,
                       conf_thr=0.2):
    img0 = jnp.transpose(data['image0'], (0, 2, 3, 1))   # NCHW -> NHWC
    img1 = jnp.transpose(data['image1'], (0, 2, 3, 1))
    N, H, W, _ = img0.shape
    data.update({'bs': N, 'hw0_i': (H, W), 'hw1_i': (H, W)})

    feat_c0, feat_f0, feat_c1, feat_f1, attn_vis = backbone(img0, img1, params)
    data.update({'hw0_c': feat_c0.shape[1:3], 'hw1_c': feat_c1.shape[1:3],
                 'hw0_f': feat_f0.shape[1:3], 'hw1_f': feat_f1.shape[1:3],
                 'attention': attn_vis})

    Hc, Wc = feat_c0.shape[1:3]
    L = Hc * Wc
    Cc = feat_c0.shape[-1]
    fc0 = feat_c0.reshape(N, L, Cc)     # 'n c h w -> n (h w) c' (channels-last)
    fc1 = feat_c1.reshape(N, L, Cc)

    # --- coarse matching (Pallas dual-softmax) ---
    conf = coarse_matching(fc0, fc1, coarse_temperature)     # (N, L, L)
    data['conf_matrix'] = conf

    # mutual-NN selection, dense / static-shape (validity mask, no boolean compaction)
    max1 = jnp.argmax(conf, axis=2)                 # best j for each i
    max2 = jnp.argmax(conf, axis=1)                 # best i for each j
    mutual = jnp.take_along_axis(max2, max1, axis=1) == jnp.arange(L)[None, :]
    mconf = jnp.take_along_axis(conf, max1[..., None], axis=2)[..., 0]
    valid = mutual & (mconf > conf_thr)

    b_ids = jnp.repeat(jnp.arange(N), L)
    i_ids = jnp.tile(jnp.arange(L), N)
    j_ids = max1.reshape(-1)
    data.update({'b_ids': b_ids, 'i_ids': i_ids, 'j_ids': j_ids,
                 'mconf': mconf.reshape(-1), 'm_valid': valid.reshape(-1)})

    scale_c = H // Hc
    mkpts0_c = jnp.stack([i_ids % Wc, i_ids // Wc], axis=1) * scale_c
    mkpts1_c = jnp.stack([j_ids % Wc, j_ids // Wc], axis=1) * scale_c
    data.update({'mkpts0_c': mkpts0_c, 'mkpts1_c': mkpts1_c})

    # --- fine preprocess: unfold window around every coarse match ---
    Hf, Wf = feat_f0.shape[1:3]
    stride = Hf // Hc
    win0 = unfold_windows(feat_f0, fine_window, stride)      # (N, L, WW, Cf)
    win1 = unfold_windows(feat_f1, fine_window, stride)
    f0u = win0[b_ids, i_ids]                                 # (M, WW, Cf)
    f1u = win1[b_ids, j_ids]
    # TODO(synk): FinePreprocess coarse->fine feature fusion (cat_c_feat MLP) not reproduced.

    half = fine_window // 2
    ar = (jnp.arange(fine_window, dtype=jnp.float32) - half) / half
    gy, gx = jnp.meshgrid(ar, ar, indexing='ij')
    coords = jnp.stack([gx.reshape(-1), gy.reshape(-1)], axis=-1)   # (WW, 2)

    # --- fine matching (Pallas correlation + soft-argmax expectation) ---
    expec_f = fine_matching(f0u, f1u, coords)                # (M, 3): x, y, std
    data['expec_f'] = expec_f

    scale_f = H // Hf
    mkpts0_f = mkpts0_c.astype(jnp.float32)
    mkpts1_f = mkpts1_c.astype(jnp.float32) + expec_f[:, :2] * half * scale_f
    data.update({'mkpts0_f': mkpts0_f, 'mkpts1_f': mkpts1_f})
    return data


# ----------------------------------------------------------------------------
# Deterministic parameter init (synthetic weights)
# ----------------------------------------------------------------------------
def init_params(key, Cf=16, Cc=32):
    keys = jax.random.split(key, 16)

    def w(k, shape, scale):
        return jax.random.normal(k, shape, jnp.float32) * scale

    params = {
        'w1': w(keys[0], (9 * 1, Cf), 0.3), 'b1': jnp.zeros((Cf,), jnp.float32),
        'w2': w(keys[1], (9 * Cf, Cc), 0.1), 'b2': jnp.zeros((Cc,), jnp.float32),
        'w3': w(keys[2], (9 * Cc, Cc), 0.1), 'b3': jnp.zeros((Cc,), jnp.float32),
        'layers': [],
    }
    for i, name in enumerate(['self', 'cross']):
        base = 3 + 4 * i
        params['layers'].append({
            'name': name,
            'wq': w(keys[base + 0], (Cc, Cc), 0.15),
            'wk': w(keys[base + 1], (Cc, Cc), 0.15),
            'wv': w(keys[base + 2], (Cc, Cc), 0.15),
            'wo': w(keys[base + 3], (Cc, Cc), 0.15),
        })
    return params


if __name__ == "__main__":
    key = jax.random.PRNGKey(0)
    k0, k1, kp = jax.random.split(key, 3)

    N, H, W = 2, 32, 32
    image0 = jax.random.uniform(k0, (N, 1, H, W), jnp.float32)   # torch-style NCHW
    image1 = jax.random.uniform(k1, (N, 1, H, W), jnp.float32)
    params = init_params(kp)

    data = {'image0': image0, 'image1': image1}
    out = lgfctr_vis_forward(data, params)

    jax.block_until_ready(out['conf_matrix'])
    jax.block_until_ready(out['expec_f'])
    jax.block_until_ready(out['mkpts1_f'])
    jax.block_until_ready(out['attention'][0][0])
    print("KERNEL_OK")
</pallas_src>

<mosaic_0001>
module attributes {stable_mosaic.version = 11 : i64} {
  func.func @_conv_kernel(%arg0: i32, %arg1: memref<1x4x289x1xf32, #tpu.memory_space<vmem>>, %arg2: memref<9x1x16xf32, #tpu.memory_space<vmem>>, %arg3: memref<1x16xf32, #tpu.memory_space<vmem>>, %arg4: memref<1x271x16xf32, #tpu.memory_space<vmem>>) attributes {dimension_semantics = [#tpu.dimension_semantics<parallel>], iteration_bounds = array<i64: 2>, scalar_prefetch = 0 : i64, scratch_operands = 0 : i64, tpu.core_type = #tpu.core_type<tc>, window_params = [{transform_indices = @transform_0, window_bounds = array<i64: 1, 4, 289, 1>}, {pipeline_mode = #tpu.pipeline_mode<synchronous>, transform_indices = @transform_1, window_bounds = array<i64: 9, 1, 16>}, {pipeline_mode = #tpu.pipeline_mode<synchronous>, transform_indices = @transform_2, window_bounds = array<i64: 1, 16>}, {transform_indices = @transform_3, window_bounds = array<i64: 1, 271, 16>}]} {
    %cst = arith.constant 0.000000e+00 : f32
    %0 = vector.broadcast %cst : f32 to vector<271x16xf32>
    %c0 = arith.constant 0 : index
    %c0_0 = arith.constant 0 : index
    %c0_1 = arith.constant 0 : index
    %c0_2 = arith.constant 0 : index
    %1 = vector.load %arg1[%c0, %c0_0, %c0_1, %c0_2] : memref<1x4x289x1xf32, #tpu.memory_space<vmem>>, vector<1x1x271x1xf32>
    %2 = vector.shape_cast %1 : vector<1x1x271x1xf32> to vector<271x1xf32>
    %c0_3 = arith.constant 0 : index
    %c0_4 = arith.constant 0 : index
    %c0_5 = arith.constant 0 : index
    %3 = vector.load %arg2[%c0_3, %c0_4, %c0_5] : memref<9x1x16xf32, #tpu.memory_space<vmem>>, vector<1x1x16xf32>
    %4 = vector.shape_cast %3 : vector<1x1x16xf32> to vector<1x16xf32>
    %5 = vector.broadcast %2 : vector<271x1xf32> to vector<271x16xf32>
    %6 = vector.broadcast %4 : vector<1x16xf32> to vector<271x16xf32>
    %7 = arith.mulf %5, %6 : vector<271x16xf32>
    %8 = arith.addf %0, %7 : vector<271x16xf32>
    %c0_6 = arith.constant 0 : index
    %c1 = arith.constant 1 : index
    %c0_7 = arith.constant 0 : index
    %c0_8 = arith.constant 0 : index
    %9 = vector.load %arg1[%c0_6, %c1, %c0_7, %c0_8] : memref<1x4x289x1xf32, #tpu.memory_space<vmem>>, vector<1x1x271x1xf32>
    %10 = vector.shape_cast %9 : vector<1x1x271x1xf32> to vector<271x1xf32>
    %c1_9 = arith.constant 1 : index
    %c0_10 = arith.constant 0 : index
    %c0_11 = arith.constant 0 : index
    %11 = vector.load %arg2[%c1_9, %c0_10, %c0_11] : memref<9x1x16xf32, #tpu.memory_space<vmem>>, vector<1x1x16xf32>
    %12 = vector.shape_cast %11 : vector<1x1x16xf32> to vector<1x16xf32>
    %13 = vector.broadcast %10 : vector<271x1xf32> to vector<271x16xf32>
    %14 = vector.broadcast %12 : vector<1x16xf32> to vector<271x16xf32>
    %15 = arith.mulf %13, %14 : vector<271x16xf32>
    %16 = arith.addf %8, %15 : vector<271x16xf32>
    %c0_12 = arith.constant 0 : index
    %c0_13 = arith.constant 0 : index
    %c1_14 = arith.constant 1 : index
    %c0_15 = arith.constant 0 : index
    %17 = vector.load %arg1[%c0_12, %c0_13, %c1_14, %c0_15] : memref<1x4x289x1xf32, #tpu.memory_space<vmem>>, vector<1x1x271x1xf32>
    %18 = vector.shape_cast %17 : vector<1x1x271x1xf32> to vector<271x1xf32>
    %c2 = arith.constant 2 : index
    %c0_16 = arith.constant 0 : index
    %c0_17 = arith.constant 0 : index
    %19 = vector.load %arg2[%c2, %c0_16, %c0_17] : memref<9x1x16xf32, #tpu.memory_space<vmem>>, vector<1x1x16xf32>
    %20 = vector.shape_cast %19 : vector<1x1x16xf32> to vector<1x16xf32>
    %21 = vector.broadcast %18 : vector<271x1xf32> to vector<271x16xf32>
    %22 = vector.broadcast %20 : vector<1x16xf32> to vector<271x16xf32>
    %23 = arith.mulf %21, %22 : vector<271x16xf32>
    %24 = arith.addf %16, %23 : vector<271x16xf32>
    %c0_18 = arith.constant 0 : index
    %c2_19 = arith.constant 2 : index
    %c0_20 = arith.constant 0 : index
    %c0_21 = arith.constant 0 : index
    %25 = vector.load %arg1[%c0_18, %c2_19, %c0_20, %c0_21] : memref<1x4x289x1xf32, #tpu.memory_space<vmem>>, vector<1x1x271x1xf32>
    %26 = vector.shape_cast %25 : vector<1x1x271x1xf32> to vector<271x1xf32>
    %c3 = arith.constant 3 : index
    %c0_22 = arith.constant 0 : index
    %c0_23 = arith.constant 0 : index
    %27 = vector.load %arg2[%c3, %c0_22, %c0_23] : memref<9x1x16xf32, #tpu.memory_space<vmem>>, vector<1x1x16xf32>
    %28 = vector.shape_cast %27 : vector<1x1x16xf32> to vector<1x16xf32>
    %29 = vector.broadcast %26 : vector<271x1xf32> to vector<271x16xf32>
    %30 = vector.broadcast %28 : vector<1x16xf32> to vector<271x16xf32>
    %31 = arith.mulf %29, %30 : vector<271x16xf32>
    %32 = arith.addf %24, %31 : vector<271x16xf32>
    %c0_24 = arith.constant 0 : index
    %c3_25 = arith.constant 3 : index
    %c0_26 = arith.constant 0 : index
    %c0_27 = arith.constant 0 : index
    %33 = vector.load %arg1[%c0_24, %c3_25, %c0_26, %c0_27] : memref<1x4x289x1xf32, #tpu.memory_space<vmem>>, vector<1x1x271x1xf32>
    %34 = vector.shape_cast %33 : vector<1x1x271x1xf32> to vector<271x1xf32>
    %c4 = arith.constant 4 : index
    %c0_28 = arith.constant 0 : index
    %c0_29 = arith.constant 0 : index
    %35 = vector.load %arg2[%c4, %c0_28, %c0_29] : memref<9x1x16xf32, #tpu.memory_space<vmem>>, vector<1x1x16xf32>
    %36 = vector.shape_cast %35 : vector<1x1x16xf32> to vector<1x16xf32>
    %37 = vector.broadcast %34 : vector<271x1xf32> to vector<271x16xf32>
    %38 = vector.broadcast %36 : vector<1x16xf32> to vector<271x16xf32>
    %39 = arith.mulf %37, %38 : vector<271x16xf32>
    %40 = arith.addf %32, %39 : vector<271x16xf32>
    %c0_30 = arith.constant 0 : index
    %c2_31 = arith.constant 2 : index
    %c1_32 = arith.constant 1 : index
    %c0_33 = arith.constant 0 : index
    %41 = vector.load %arg1[%c0_30, %c2_31, %c1_32, %c0_33] : memref<1x4x289x1xf32, #tpu.memory_space<vmem>>, vector<1x1x271x1xf32>
    %42 = vector.shape_cast %41 : vector<1x1x271x1xf32> to vector<271x1xf32>
    %c5 = arith.constant 5 : index
    %c0_34 = arith.constant 0 : index
    %c0_35 = arith.constant 0 : index
    %43 = vector.load %arg2[%c5, %c0_34, %c0_35] : memref<9x1x16xf32, #tpu.memory_space<vmem>>, vector<1x1x16xf32>
    %44 = vector.shape_cast %43 : vector<1x1x16xf32> to vector<1x16xf32>
    %45 = vector.broadcast %42 : vector<271x1xf32> to vector<271x16xf32>
    %46 = vector.broadcast %44 : vector<1x16xf32> to vector<271x16xf32>
    %47 = arith.mulf %45, %46 : vector<271x16xf32>
    %48 = arith.addf %40, %47 : vector<271x16xf32>
    %c0_36 = arith.constant 0 : index
    %c0_37 = arith.constant 0 : index
    %c17 = arith.constant 17 : index
    %c0_38 = arith.constant 0 : index
    %49 = vector.load %arg1[%c0_36, %c0_37, %c17, %c0_38] : memref<1x4x289x1xf32, #tpu.memory_space<vmem>>, vector<1x1x271x1xf32>
    %50 = vector.shape_cast %49 : vector<1x1x271x1xf32> to vector<271x1xf32>
    %c6 = arith.constant 6 : index
    %c0_39 = arith.constant 0 : index
    %c0_40 = arith.constant 0 : index
    %51 = vector.load %arg2[%c6, %c0_39, %c0_40] : memref<9x1x16xf32, #tpu.memory_space<vmem>>, vector<1x1x16xf32>
    %52 = vector.shape_cast %51 : vector<1x1x16xf32> to vector<1x16xf32>
    %53 = vector.broadcast %50 : vector<271x1xf32> to vector<271x16xf32>
    %54 = vector.broadcast %52 : vector<1x16xf32> to vector<271x16xf32>
    %55 = arith.mulf %53, %54 : vector<271x16xf32>
    %56 = arith.addf %48, %55 : vector<271x16xf32>
    %c0_41 = arith.constant 0 : index
    %c1_42 = arith.constant 1 : index
    %c17_43 = arith.constant 17 : index
    %c0_44 = arith.constant 0 : index
    %57 = vector.load %arg1[%c0_41, %c1_42, %c17_43, %c0_44] : memref<1x4x289x1xf32, #tpu.memory_space<vmem>>, vector<1x1x271x1xf32>
    %58 = vector.shape_cast %57 : vector<1x1x271x1xf32> to vector<271x1xf32>
    %c7 = arith.constant 7 : index
    %c0_45 = arith.constant 0 : index
    %c0_46 = arith.constant 0 : index
    %59 = vector.load %arg2[%c7, %c0_45, %c0_46] : memref<9x1x16xf32, #tpu.memory_space<vmem>>, vector<1x1x16xf32>
    %60 = vector.shape_cast %59 : vector<1x1x16xf32> to vector<1x16xf32>
    %61 = vector.broadcast %58 : vector<271x1xf32> to vector<271x16xf32>
    %62 = vector.broadcast %60 : vector<1x16xf32> to vector<271x16xf32>
    %63 = arith.mulf %61, %62 : vector<271x16xf32>
    %64 = arith.addf %56, %63 : vector<271x16xf32>
    %c0_47 = arith.constant 0 : index
    %c0_48 = arith.constant 0 : index
    %c18 = arith.constant 18 : index
    %c0_49 = arith.constant 0 : index
    %65 = vector.load %arg1[%c0_47, %c0_48, %c18, %c0_49] : memref<1x4x289x1xf32, #tpu.memory_space<vmem>>, vector<1x1x271x1xf32>
    %66 = vector.shape_cast %65 : vector<1x1x271x1xf32> to vector<271x1xf32>
    %c8 = arith.constant 8 : index
    %c0_50 = arith.constant 0 : index
    %c0_51 = arith.constant 0 : index
    %67 = vector.load %arg2[%c8, %c0_50, %c0_51] : memref<9x1x16xf32, #tpu.memory_space<vmem>>, vector<1x1x16xf32>
    %68 = vector.shape_cast %67 : vector<1x1x16xf32> to vector<1x16xf32>
    %69 = vector.broadcast %66 : vector<271x1xf32> to vector<271x16xf32>
    %70 = vector.broadcast %68 : vector<1x16xf32> to vector<271x16xf32>
    %71 = arith.mulf %69, %70 : vector<271x16xf32>
    %72 = arith.addf %64, %71 : vector<271x16xf32>
    %c0_52 = arith.constant 0 : index
    %c0_53 = arith.constant 0 : index
    %73 = vector.load %arg3[%c0_52, %c0_53] : memref<1x16xf32, #tpu.memory_space<vmem>>, vector<1x16xf32>
    %74 = vector.broadcast %73 : vector<1x16xf32> to vector<271x16xf32>
    %75 = arith.addf %72, %74 : vector<271x16xf32>
    %cst_54 = arith.constant 0.000000e+00 : f32
    %76 = vector.broadcast %cst_54 : f32 to vector<271x16xf32>
    %77 = arith.maximumf %75, %76 : vector<271x16xf32>
    %c0_55 = arith.constant 0 : index
    %c0_56 = arith.constant 0 : index
    %c0_57 = arith.constant 0 : index
    %78 = vector.load %arg4[%c0_55, %c0_56, %c0_57] : memref<1x271x16xf32, #tpu.memory_space<vmem>>, vector<1x271x16xf32>
    %79 = vector.shape_cast %78 : vector<1x271x16xf32> to vector<271x16xf32>
    %80 = vector.shape_cast %77 : vector<271x16xf32> to vector<1x271x16xf32>
    tpu.vector_store %arg4[%c0_55, %c0_56, %c0_57], %80 {strides = array<i32>} : memref<1x271x16xf32, #tpu.memory_space<vmem>>, vector<1x271x16xf32>,
    return
  }
  func.func @transform_0(%arg0: i32) -> (i32, i32, i32, i32) {
    %c0_i32 = arith.constant 0 : i32
    %c0_i32_0 = arith.constant 0 : i32
    %c0_i32_1 = arith.constant 0 : i32
    %c0_i32_2 = arith.constant 0 : i32
    return %arg0, %c0_i32, %c0_i32_0, %c0_i32_1 : i32, i32, i32, i32
  }
  func.func @transform_1(%arg0: i32) -> (i32, i32, i32) {
    %c0_i32 = arith.constant 0 : i32
    %c0_i32_0 = arith.constant 0 : i32
    %c0_i32_1 = arith.constant 0 : i32
    %c0_i32_2 = arith.constant 0 : i32
    return %c0_i32, %c0_i32_0, %c0_i32_1 : i32, i32, i32
  }
  func.func @transform_2(%arg0: i32) -> (i32, i32) {
    %c0_i32 = arith.constant 0 : i32
    %c0_i32_0 = arith.constant 0 : i32
    %c0_i32_1 = arith.constant 0 : i32
    return %c0_i32, %c0_i32_0 : i32, i32
  }
  func.func @transform_3(%arg0: i32) -> (i32, i32, i32) {
    %c0_i32 = arith.constant 0 : i32
    %c0_i32_0 = arith.constant 0 : i32
    %c0_i32_1 = arith.constant 0 : i32
    return %arg0, %c0_i32, %c0_i32_0 : i32, i32, i32
  }
}

</mosaic_0001>

<bundles_post_ra>
// kernel: tpu_custom_call.1
= control target key start
LH: loop header
LB: loop body
LE: loop exit
PB: predicated region body
PF: predicated region fallthrough
CT: control target
= control target key end

     0   :  { %s3103_s12 = smov 0   ;;  %s5072_s0 = inlined_call_operand.vmem [shape: f32[2,4,289,1], index: 0, kind: input, shape index: {}]   ;;  %s5073_s1 = inlined_call_operand.vmem [shape: f32[9,1,16], index: 1, kind: input, shape index: {}]   ;;  %s5074_s2 = inlined_call_operand.vmem [shape: f32[1,16], index: 2, kind: input, shape index: {}]   ;;  %s5075_s3 = inlined_call_operand.vmem [shape: f32[2,271,16], index: 3, kind: output, shape index: {}]  }
   0x1 LB: > { %s2859_s13 = sadd.s32 4294967295, %s3080_s12   ;;  %p2863_p0 = scmp.ge.s32.totalorder %s3080_s12, 1  ;;  %s3080_s12 = sphi %s3103_s12, %s13_s12  }
   0x2   : > { %p137_p1 = scmp.lt.s32.totalorder %s3080_s12, 3 }
   0x4   : > { %p138_p2 = pnand %p2863_p0, %p137_p1 }
   0x6   : > { %141 = sbr.rel (%p138_p2) target bundleno = 760 (0x2f8), region = 32 }
   0xb   : > { %p161_p3 = scmp.lt.s32.totalorder %s2859_s13, 1  ;;  %v3082_v0 = vmov 0   ;;  %vm2768_vm0 = vcmask 130048   ;;  %vm2802_vm1 = vcmask 129024  }
   0xc   : > { %3068 = vset.pattern.permute.xlu1 %v3082_v0  ;;  %3067 = vset.pattern.permute.xlu0 %v3082_v0 }
   0xd   : > { %s5453_s13 = smov (!%p161_p3, %s2859_s13), 1 }
   0xe   : > { %s3056_s14 = smul.u32 1184, %s5453_s13 }
   0xf   : > { %s3057_s21 = smul.u32 272, %s5453_s13 }
  0x10   : > { %s3117_s17 = scalar_lea.vmem %s5072_s0, %s3056_s14 }
  0x11   : > { %v173_v1 = vld [vmem:[%s3117_s17 + $0x10] sm:$0xff]  ;;  %v171_v2 = vld [vmem:[%s3117_s17] sm:$0xff]  ;;  %v174_v3 = vld [vmem:[%s3117_s17 + $0x18] sm:$0xff]  ;;  %s4908_s25 = scalar_lea.vmem %s5075_s3, %s3057_s21 }
  0x12   : > { %218 = vperm.xlu1 %3068, %v173_v1   ;;  %208 = vperm.xlu0 %3067, %v171_v2   ;;  %v172_v4 = vld [vmem:[%s3117_s17 + $0x8] sm:$0xff]  ;;  %v175_v6 = vld [vmem:[%s3117_s17 + $0x20] sm:$0xff]  ;;  %v178_v7 = vld [vmem:[%s3117_s17 + $0x38] sm:$0xff] }
  0x13   : > { %v176_v5 = vld [vmem:[%s3117_s17 + $0x28] sm:$0xff]  ;;  %v177_v8 = vld [vmem:[%s3117_s17 + $0x30] sm:$0xff]  ;;  %v179_v10 = vld [vmem:[%s3117_s17 + $0x40] sm:$0xff] }
  0x14   : > { %v180_v9 = vld [vmem:[%s3117_s17 + $0x48] sm:$0xff]  ;;  %v182_v11 = vld [vmem:[%s3117_s17 + $0x58] sm:$0xff]  ;;  %v181_v12 = vld [vmem:[%s3117_s17 + $0x50] sm:$0xff] }
  0x15   : > { %v184_v13 = vld [vmem:[%s3117_s17 + $0x68] sm:$0xff]  ;;  %v183_v14 = vld [vmem:[%s3117_s17 + $0x60] sm:$0xff]  ;;  %v186_v15 = vld [vmem:[%s3117_s17 + $0x78] sm:$0xff] }
  0x16   : > { %223 = vperm.xlu1 %3068, %v174_v3   ;;  %213 = vperm.xlu0 %3067, %v172_v4   ;;  %v185_v16 = vld [vmem:[%s3117_s17 + $0x70] sm:$0xff]  ;;  %v188_v17 = vld [vmem:[%s3117_s17 + $0x88] sm:$0xff]  ;;  %v187_v18 = vld [vmem:[%s3117_s17 + $0x80] sm:$0xff] }
  0x17   : > { %v190_v19 = vld [vmem:[%s3117_s17 + $0x98] sm:$0xff]  ;;  %v189_v20 = vld [vmem:[%s3117_s17 + $0x90] sm:$0xff]  ;;  %v192_v21 = vld [vmem:[%s3117_s17 + $0xa8] sm:$0xff] }
  0x18   : > { %v191_v22 = vld [vmem:[%s3117_s17 + $0xa0] sm:$0xff]  ;;  %v194_v23 = vld [vmem:[%s3117_s17 + $0xb8] sm:$0xff]  ;;  %v193_v24 = vld [vmem:[%s3117_s17 + $0xb0] sm:$0xff] }
  0x19   : > { %v196_v25 = vld [vmem:[%s3117_s17 + $0xc8] sm:$0xff]  ;;  %v195_v26 = vld [vmem:[%s3117_s17 + $0xc0] sm:$0xff]  ;;  %v198_v27 = vld [vmem:[%s3117_s17 + $0xd8] sm:$0xff] }
  0x1a   : > { %233 = vperm.xlu1 %3068, %v176_v5   ;;  %228 = vperm.xlu0 %3067, %v175_v6   ;;  %v197_v28 = vld [vmem:[%s3117_s17 + $0xd0] sm:$0xff]  ;;  %v200_v29 = vld [vmem:[%s3117_s17 + $0xe8] sm:$0xff]  ;;  %v199_v30 = vld [vmem:[%s3117_s17 + $0xe0] sm:$0xff] }
  0x1b   : > { %v202_v31 = vld [vmem:[%s3117_s17 + $0xf8] sm:$0xff]  ;;  %v201_v32 = vld [vmem:[%s3117_s17 + $0xf0] sm:$0xff]  ;;  %v204_v33 = vld [vmem:[%s3117_s17 + $0x108] sm:$0x7f] }
  0x1c   : > { %v203_v34 = vld [vmem:[%s3117_s17 + $0x100] sm:$0xff]  ;;  %v2868_v35 = vld [vmem:[%s3117_s17 + $0x130] sm:$0xff]  ;;  %v2867_v36 = vld [vmem:[%s3117_s17 + $0x128] sm:$0xff] }
  0x1d   : > { %v2870_v37 = vld [vmem:[%s3117_s17 + $0x140] sm:$0xff]  ;;  %v2869_v38 = vld [vmem:[%s3117_s17 + $0x138] sm:$0xff]  ;;  %v2872_v39 = vld [vmem:[%s3117_s17 + $0x150] sm:$0xff] }
  0x1e   : > { %243 = vperm.xlu1 %3068, %v178_v7   ;;  %238 = vperm.xlu0 %3067, %v177_v8   ;;  %v2871_v40 = vld [vmem:[%s3117_s17 + $0x148] sm:$0xff]  ;;  %v2874_v41 = vld [vmem:[%s3117_s17 + $0x160] sm:$0xff]  ;;  %v2873_v42 = vld [vmem:[%s3117_s17 + $0x158] sm:$0xff] }
  0x1f   : > { %v2876_v43 = vld [vmem:[%s3117_s17 + $0x170] sm:$0xff]  ;;  %v2875_v44 = vld [vmem:[%s3117_s17 + $0x168] sm:$0xff]  ;;  %v2878_v45 = vld [vmem:[%s3117_s17 + $0x180] sm:$0xff] }
  0x20   : > { %v2877_v46 = vld [vmem:[%s3117_s17 + $0x178] sm:$0xff]  ;;  %v2880_v47 = vld [vmem:[%s3117_s17 + $0x190] sm:$0xff]  ;;  %v2879_v48 = vld [vmem:[%s3117_s17 + $0x188] sm:$0xff] }
  0x21   : > { %v2882_v49 = vld [vmem:[%s3117_s17 + $0x1a0] sm:$0xff]  ;;  %v2881_v50 = vld [vmem:[%s3117_s17 + $0x198] sm:$0xff]  ;;  %v2884_v51 = vld [vmem:[%s3117_s17 + $0x1b0] sm:$0xff] }
  0x22   : > { %253 = vperm.xlu1 %3068, %v180_v9   ;;  %248 = vperm.xlu0 %3067, %v179_v10   ;;  %v2883_v52 = vld [vmem:[%s3117_s17 + $0x1a8] sm:$0xff]  ;;  %v2886_v53 = vld [vmem:[%s3117_s17 + $0x1c0] sm:$0xff]  ;;  %v2885_v54 = vld [vmem:[%s3117_s17 + $0x1b8] sm:$0xff] }
  0x23   : > { %v2888_v55 = vld [vmem:[%s3117_s17 + $0x1d0] sm:$0xff]  ;;  %v2887_v56 = vld [vmem:[%s3117_s17 + $0x1c8] sm:$0xff]  ;;  %v2890_v57 = vld [vmem:[%s3117_s17 + $0x1e0] sm:$0xff] }
  0x24   : > { %v2889_v58 = vld [vmem:[%s3117_s17 + $0x1d8] sm:$0xff]  ;;  %v2892_v59 = vld [vmem:[%s3117_s17 + $0x1f0] sm:$0xff]  ;;  %v2891_v60 = vld [vmem:[%s3117_s17 + $0x1e8] sm:$0xff] }
  0x25   : > { %v2894_v61 = vld [vmem:[%s3117_s17 + $0x200] sm:$0xff]  ;;  %v2893_v62 = vld [vmem:[%s3117_s17 + $0x1f8] sm:$0xff]  ;;  %v2896_v63 = vld [vmem:[%s3117_s17 + $0x210] sm:$0xff] }
  0x26   : > { %263 = vperm.xlu1 %3068, %v182_v11   ;;  %258 = vperm.xlu0 %3067, %v181_v12   ;;  %v2895_v0 = vld [vmem:[%s3117_s17 + $0x208] sm:$0xff]  ;;  %v2898_v3 = vld [vmem:[%s3117_s17 + $0x220] sm:$0xff]  ;;  %v2897_v4 = vld [vmem:[%s3117_s17 + $0x218] sm:$0xff] }
  0x27   : > { %v2900_v7 = vld [vmem:[%s3117_s17 + $0x230] sm:$0x7f]  ;;  %v2899_v8 = vld [vmem:[%s3117_s17 + $0x228] sm:$0xff] }
  0x28   : > { %v732_v11 = vld [vmem:[%s3117_s17 + $0x9] sm:$0xff]  ;;  %v731_v12 = vld [vmem:[%s3117_s17 + $0x1] sm:$0xff] }
  0x2a   : > { %273 = vperm.xlu1 %3068, %v184_v13   ;;  %268 = vperm.xlu0 %3067, %v183_v14  }
  0x2e   : > { %283 = vperm.xlu1 %3068, %v186_v15   ;;  %278 = vperm.xlu0 %3067, %v185_v16   ;;  %v734_v15 = vld [vmem:[%s3117_s17 + $0x19] sm:$0xff]  ;;  %v733_v16 = vld [vmem:[%s3117_s17 + $0x11] sm:$0xff] }
  0x32   : > { %293 = vperm.xlu1 %3068, %v188_v17   ;;  %288 = vperm.xlu0 %3067, %v187_v18  }
  0x36   : > { %303 = vperm.xlu1 %3068, %v190_v19   ;;  %298 = vperm.xlu0 %3067, %v189_v20   ;;  %v736_v19 = vld [vmem:[%s3117_s17 + $0x29] sm:$0xff]  ;;  %v735_v20 = vld [vmem:[%s3117_s17 + $0x21] sm:$0xff] }
  0x3a   : > { %313 = vperm.xlu1 %3068, %v192_v21   ;;  %308 = vperm.xlu0 %3067, %v191_v22  }
  0x3e   : > { %323 = vperm.xlu1 %3068, %v194_v23   ;;  %318 = vperm.xlu0 %3067, %v193_v24   ;;  %v738_v23 = vld [vmem:[%s3117_s17 + $0x39] sm:$0xff]  ;;  %v737_v24 = vld [vmem:[%s3117_s17 + $0x31] sm:$0xff] }
  0x42   : > { %333 = vperm.xlu1 %3068, %v196_v25   ;;  %328 = vperm.xlu0 %3067, %v195_v26  }
  0x46   : > { %343 = vperm.xlu1 %3068, %v198_v27   ;;  %338 = vperm.xlu0 %3067, %v197_v28   ;;  %v740_v27 = vld [vmem:[%s3117_s17 + $0x49] sm:$0xff]  ;;  %v739_v28 = vld [vmem:[%s3117_s17 + $0x41] sm:$0xff] }
  0x4a   : > { %353 = vperm.xlu1 %3068, %v200_v29   ;;  %348 = vperm.xlu0 %3067, %v199_v30  }
  0x4e   : > { %363 = vperm.xlu1 %3068, %v202_v31   ;;  %358 = vperm.xlu0 %3067, %v201_v32   ;;  %v742_v31 = vld [vmem:[%s3117_s17 + $0x59] sm:$0xff]  ;;  %v741_v32 = vld [vmem:[%s3117_s17 + $0x51] sm:$0xff] }
  0x52   : > { %373 = vperm.xlu1 %3068, %v204_v33   ;;  %368 = vperm.xlu0 %3067, %v203_v34  }
  0x56   : > { %494 = vperm.xlu1 %3068, %v2868_v35   ;;  %489 = vperm.xlu0 %3067, %v2867_v36   ;;  %v744_v35 = vld [vmem:[%s3117_s17 + $0x69] sm:$0xff]  ;;  %v743_v36 = vld [vmem:[%s3117_s17 + $0x61] sm:$0xff] }
  0x5a   : > { %504 = vperm.xlu1 %3068, %v2870_v37   ;;  %499 = vperm.xlu0 %3067, %v2869_v38  }
  0x5e   : > { %514 = vperm.xlu1 %3068, %v2872_v39   ;;  %509 = vperm.xlu0 %3067, %v2871_v40   ;;  %v746_v39 = vld [vmem:[%s3117_s17 + $0x79] sm:$0xff]  ;;  %v745_v40 = vld [vmem:[%s3117_s17 + $0x71] sm:$0xff] }
  0x62   : > { %524 = vperm.xlu1 %3068, %v2874_v41   ;;  %519 = vperm.xlu0 %3067, %v2873_v42  }
  0x66   : > { %534 = vperm.xlu1 %3068, %v2876_v43   ;;  %529 = vperm.xlu0 %3067, %v2875_v44   ;;  %v748_v43 = vld [vmem:[%s3117_s17 + $0x89] sm:$0xff]  ;;  %v747_v44 = vld [vmem:[%s3117_s17 + $0x81] sm:$0xff] }
  0x6a   : > { %544 = vperm.xlu1 %3068, %v2878_v45   ;;  %539 = vperm.xlu0 %3067, %v2877_v46  }
  0x6e   : > { %554 = vperm.xlu1 %3068, %v2880_v47   ;;  %549 = vperm.xlu0 %3067, %v2879_v48   ;;  %v750_v47 = vld [vmem:[%s3117_s17 + $0x99] sm:$0xff]  ;;  %v749_v48 = vld [vmem:[%s3117_s17 + $0x91] sm:$0xff] }
  0x72   : > { %564 = vperm.xlu1 %3068, %v2882_v49   ;;  %559 = vperm.xlu0 %3067, %v2881_v50  }
  0x76   : > { %574 = vperm.xlu1 %3068, %v2884_v51   ;;  %569 = vperm.xlu0 %3067, %v2883_v52   ;;  %v752_v51 = vld [vmem:[%s3117_s17 + $0xa9] sm:$0xff]  ;;  %v751_v52 = vld [vmem:[%s3117_s17 + $0xa1] sm:$0xff] }
  0x7a   : > { %584 = vperm.xlu1 %3068, %v2886_v53   ;;  %579 = vperm.xlu0 %3067, %v2885_v54  }
  0x7e   : > { %594 = vperm.xlu1 %3068, %v2888_v55   ;;  %589 = vperm.xlu0 %3067, %v2887_v56   ;;  %v754_v55 = vld [vmem:[%s3117_s17 + $0xb9] sm:$0xff]  ;;  %v753_v56 = vld [vmem:[%s3117_s17 + $0xb1] sm:$0xff] }
  0x82   : > { %604 = vperm.xlu1 %3068, %v2890_v57   ;;  %599 = vperm.xlu0 %3067, %v2889_v58  }
  0x86   : > { %614 = vperm.xlu1 %3068, %v2892_v59   ;;  %609 = vperm.xlu0 %3067, %v2891_v60   ;;  %v756_v59 = vld [vmem:[%s3117_s17 + $0xc9] sm:$0xff]  ;;  %v755_v60 = vld [vmem:[%s3117_s17 + $0xc1] sm:$0xff] }
  0x8a   : > { %624 = vperm.xlu1 %3068, %v2894_v61   ;;  %619 = vperm.xlu0 %3067, %v2893_v62  }
  0x8d   : > { %v3183_v1 = vpop.permute.xlu1 %218  ;;  %v3185_v2 = vpop.permute.xlu0 %208 }
  0x8e   : > { %634 = vperm.xlu1 %3068, %v2896_v63   ;;  %629 = vperm.xlu0 %3067, %v2895_v0   ;;  %v758_v63 = vld [vmem:[%s3117_s17 + $0xd9] sm:$0xff]  ;;  %v757_v0 = vld [vmem:[%s3117_s17 + $0xd1] sm:$0xff] }
  0x91   : > { %v3189_v5 = vpop.permute.xlu1 %223  ;;  %v3191_v6 = vpop.permute.xlu0 %213 }
  0x92   : > { %644 = vperm.xlu1 %3068, %v2898_v3   ;;  %639 = vperm.xlu0 %3067, %v2897_v4  }
  0x95   : > { %v3195_v9 = vpop.permute.xlu1 %233  ;;  %v3197_v10 = vpop.permute.xlu0 %228 }
  0x96   : > { %654 = vperm.xlu1 %3068, %v2900_v7   ;;  %649 = vperm.xlu0 %3067, %v2899_v8   ;;  %v760_v7 = vld [vmem:[%s3117_s17 + $0xe9] sm:$0xff]  ;;  %v759_v8 = vld [vmem:[%s3117_s17 + $0xe1] sm:$0xff] }
  0x99   : > { %v3201_v13 = vpop.permute.xlu1 %243  ;;  %v3203_v14 = vpop.permute.xlu0 %238 }
  0x9a   : > { %774 = vperm.xlu1 %3068, %v732_v11   ;;  %769 = vperm.xlu0 %3067, %v731_v12  }
  0x9d   : > { %v3207_v17 = vpop.permute.xlu1 %253  ;;  %v3209_v18 = vpop.permute.xlu0 %248 }
  0x9e   : > { %784 = vperm.xlu1 %3068, %v734_v15   ;;  %779 = vperm.xlu0 %3067, %v733_v16   ;;  %v762_v15 = vld [vmem:[%s3117_s17 + $0xf9] sm:$0xff]  ;;  %v761_v16 = vld [vmem:[%s3117_s17 + $0xf1] sm:$0xff] }
  0xa1   : > { %v3213_v21 = vpop.permute.xlu1 %263  ;;  %v3215_v22 = vpop.permute.xlu0 %258 }
  0xa2   : > { %794 = vperm.xlu1 %3068, %v736_v19   ;;  %789 = vperm.xlu0 %3067, %v735_v20  }
  0xa5   : > { %v3219_v25 = vpop.permute.xlu1 %273  ;;  %v3221_v26 = vpop.permute.xlu0 %268 }
  0xa6   : > { %804 = vperm.xlu1 %3068, %v738_v23   ;;  %799 = vperm.xlu0 %3067, %v737_v24   ;;  %v764_v23 = vld [vmem:[%s3117_s17 + $0x109] sm:$0x7f]  ;;  %v763_v24 = vld [vmem:[%s3117_s17 + $0x101] sm:$0xff] }
  0xa9   : > { %v3225_v29 = vpop.permute.xlu1 %283  ;;  %v3227_v30 = vpop.permute.xlu0 %278 }
  0xaa   : > { %814 = vperm.xlu1 %3068, %v740_v27   ;;  %809 = vperm.xlu0 %3067, %v739_v28  }
  0xad   : > { %v3231_v33 = vpop.permute.xlu1 %293  ;;  %v3233_v34 = vpop.permute.xlu0 %288 }
  0xae   : > { %824 = vperm.xlu1 %3068, %v742_v31   ;;  %819 = vperm.xlu0 %3067, %v741_v32   ;;  %v2906_v31 = vld [vmem:[%s3117_s17 + $0x258] sm:$0xff]  ;;  %v2905_v32 = vld [vmem:[%s3117_s17 + $0x250] sm:$0xff] }
  0xb1   : > { %v3237_v37 = vpop.permute.xlu1 %303  ;;  %v3239_v38 = vpop.permute.xlu0 %298 }
  0xb2   : > { %834 = vperm.xlu1 %3068, %v744_v35   ;;  %829 = vperm.xlu0 %3067, %v743_v36  }
  0xb5   : > { %v3243_v41 = vpop.permute.xlu1 %313  ;;  %v3245_v42 = vpop.permute.xlu0 %308 }
  0xb6   : > { %844 = vperm.xlu1 %3068, %v746_v39   ;;  %839 = vperm.xlu0 %3067, %v745_v40   ;;  %v2908_v39 = vld [vmem:[%s3117_s17 + $0x268] sm:$0xff]  ;;  %v2907_v40 = vld [vmem:[%s3117_s17 + $0x260] sm:$0xff] }
  0xb9   : > { %v3249_v45 = vpop.permute.xlu1 %323  ;;  %v3251_v46 = vpop.permute.xlu0 %318 }
  0xba   : > { %854 = vperm.xlu1 %3068, %v748_v43   ;;  %849 = vperm.xlu0 %3067, %v747_v44  }
  0xbd   : > { %v3255_v49 = vpop.permute.xlu1 %333  ;;  %v3257_v50 = vpop.permute.xlu0 %328 }
  0xbe   : > { %864 = vperm.xlu1 %3068, %v750_v47   ;;  %859 = vperm.xlu0 %3067, %v749_v48   ;;  %v2910_v47 = vld [vmem:[%s3117_s17 + $0x278] sm:$0xff]  ;;  %v2909_v48 = vld [vmem:[%s3117_s17 + $0x270] sm:$0xff] }
  0xc1   : > { %v3261_v53 = vpop.permute.xlu1 %343  ;;  %v3263_v54 = vpop.permute.xlu0 %338 }
  0xc2   : > { %874 = vperm.xlu1 %3068, %v752_v51   ;;  %869 = vperm.xlu0 %3067, %v751_v52  }
  0xc5   : > { %v3267_v57 = vpop.permute.xlu1 %353  ;;  %v3269_v58 = vpop.permute.xlu0 %348 }
  0xc6   : > { %884 = vperm.xlu1 %3068, %v754_v55   ;;  %879 = vperm.xlu0 %3067, %v753_v56   ;;  %v2912_v55 = vld [vmem:[%s3117_s17 + $0x288] sm:$0xff]  ;;  %v2911_v56 = vld [vmem:[%s3117_s17 + $0x280] sm:$0xff] }
  0xc9   : > { %v3273_v61 = vpop.permute.xlu1 %363  ;;  %v3275_v62 = vpop.permute.xlu0 %358 }
  0xca   : > { %894 = vperm.xlu1 %3068, %v756_v59   ;;  %889 = vperm.xlu0 %3067, %v755_v60  }
  0xcd   : > { %v3279_v3 = vpop.permute.xlu1 %373  ;;  %v3281_v4 = vpop.permute.xlu0 %368 }
  0xce   : > { %904 = vperm.xlu1 %3068, %v758_v63   ;;  %899 = vperm.xlu0 %3067, %v757_v0   ;;  %v2914_v63 = vld [vmem:[%s3117_s17 + $0x298] sm:$0xff]  ;;  %v2913_v0 = vld [vmem:[%s3117_s17 + $0x290] sm:$0xff] }
  0xd1   : > { %v3285_v11 = vpop.permute.xlu1 %494  ;;  %v3287_v12 = vpop.permute.xlu0 %489 }
  0xd2   : > { %914 = vperm.xlu1 %3068, %v760_v7   ;;  %909 = vperm.xlu0 %3067, %v759_v8  }
  0xd5   : > { %v3291_v19 = vpop.permute.xlu1 %504  ;;  %v3293_v20 = vpop.permute.xlu0 %499 }
  0xd6   : > { %924 = vperm.xlu1 %3068, %v762_v15   ;;  %919 = vperm.xlu0 %3067, %v761_v16   ;;  %v2916_v15 = vld [vmem:[%s3117_s17 + $0x2a8] sm:$0xff]  ;;  %v2915_v16 = vld [vmem:[%s3117_s17 + $0x2a0] sm:$0xff] }
  0xd9   : > { %v3297_v27 = vpop.permute.xlu1 %514  ;;  %v3299_v28 = vpop.permute.xlu0 %509 }
  0xda   : > { %934 = vperm.xlu1 %3068, %v764_v23   ;;  %929 = vperm.xlu0 %3067, %v763_v24  }
  0xdd   : > { %v3303_v35 = vpop.permute.xlu1 %524  ;;  %v3305_v36 = vpop.permute.xlu0 %519 }
  0xde   : > { %1055 = vperm.xlu1 %3068, %v2906_v31   ;;  %1050 = vperm.xlu0 %3067, %v2905_v32   ;;  %v2918_v31 = vld [vmem:[%s3117_s17 + $0x2b8] sm:$0xff]  ;;  %v2917_v32 = vld [vmem:[%s3117_s17 + $0x2b0] sm:$0xff] }
  0xe1   : > { %v3309_v43 = vpop.permute.xlu1 %534  ;;  %v3311_v44 = vpop.permute.xlu0 %529 }
  0xe2   : > { %1065 = vperm.xlu1 %3068, %v2908_v39   ;;  %1060 = vperm.xlu0 %3067, %v2907_v40  }
  0xe5   : > { %v3315_v51 = vpop.permute.xlu1 %544  ;;  %v3317_v52 = vpop.permute.xlu0 %539 }
  0xe6   : > { %1075 = vperm.xlu1 %3068, %v2910_v47   ;;  %1070 = vperm.xlu0 %3067, %v2909_v48   ;;  %v2920_v47 = vld [vmem:[%s3117_s17 + $0x2c8] sm:$0xff]  ;;  %v2919_v48 = vld [vmem:[%s3117_s17 + $0x2c0] sm:$0xff] }
  0xe9   : > { %v3321_v59 = vpop.permute.xlu1 %554  ;;  %v3323_v60 = vpop.permute.xlu0 %549 }
  0xea   : > { %1085 = vperm.xlu1 %3068, %v2912_v55   ;;  %1080 = vperm.xlu0 %3067, %v2911_v56  }
  0xed   : > { %v3327_v7 = vpop.permute.xlu1 %564  ;;  %v3329_v8 = vpop.permute.xlu0 %559 }
  0xee   : > { %5082 = vst [vmem:[#allocation2_spill] sm:$0xff] %v3329_v8  ;;  %1095 = vperm.xlu1 %3068, %v2914_v63   ;;  %1090 = vperm.xlu0 %3067, %v2913_v0   ;;  %v2922_v63 = vld [vmem:[%s3117_s17 + $0x2d8] sm:$0xff]  ;;  %v2921_v0 = vld [vmem:[%s3117_s17 + $0x2d0] sm:$0xff] }
  0xf1   : > { %v3333_v23 = vpop.permute.xlu1 %574  ;;  %v3335_v24 = vpop.permute.xlu0 %569 }
  0xf2   : > { %5083 = vst [vmem:[#allocation3_spill] sm:$0xff] %v3333_v23  ;;  %5084 = vst [vmem:[#allocation4_spill] sm:$0xff] %v3335_v24  ;;  %1105 = vperm.xlu1 %3068, %v2916_v15   ;;  %1100 = vperm.xlu0 %3067, %v2915_v16  }
  0xf5   : > { %v3339_v39 = vpop.permute.xlu1 %584  ;;  %v3341_v40 = vpop.permute.xlu0 %579 }
  0xf6   : > { %5085 = vst [vmem:[#allocation5_spill] sm:$0xff] %v3339_v39  ;;  %5086 = vst [vmem:[#allocation6_spill] sm:$0xff] %v3341_v40  ;;  %1115 = vperm.xlu1 %3068, %v2918_v31   ;;  %1110 = vperm.xlu0 %3067, %v2917_v32   ;;  %v2924_v31 = vld [vmem:[%s3117_s17 + $0x2e8] sm:$0xff]  ;;  %v2923_v32 = vld [vmem:[%s3117_s17 + $0x2e0] sm:$0xff] }
  0xf9   : > { %v3345_v55 = vpop.permute.xlu1 %594  ;;  %v3347_v56 = vpop.permute.xlu0 %589 }
  0xfa   : > { %5087 = vst [vmem:[#allocation7_spill] sm:$0xff] %v3345_v55  ;;  %5088 = vst [vmem:[#allocation8_spill] sm:$0xff] %v3347_v56  ;;  %1125 = vperm.xlu1 %3068, %v2920_v47   ;;  %1120 = vperm.xlu0 %3067, %v2919_v48   ;;  %v2926_v47 = vld [vmem:[%s3117_s17 + $0x2f8] sm:$0xff]  ;;  %v2925_v48 = vld [vmem:[%s3117_s17 + $0x2f0] sm:$0xff] }
  0xfd   : > { %v3351_v15 = vpop.permute.xlu1 %604  ;;  %v3353_v16 = vpop.permute.xlu0 %599 }
  0xfe   : > { %5089 = vst [vmem:[#allocation9_spill] sm:$0xff] %v3351_v15  ;;  %5090 = vst [vmem:[#allocation10_spill] sm:$0xff] %v3353_v16  ;;  %1135 = vperm.xlu1 %3068, %v2922_v63   ;;  %1130 = vperm.xlu0 %3067, %v2921_v0   ;;  %v2928_v63 = vld [vmem:[%s3117_s17 + $0x308] sm:$0xff]  ;;  %v2927_v0 = vld [vmem:[%s3117_s17 + $0x300] sm:$0xff] }
 0x101   : > { %v3357_v40 = vpop.permute.xlu1 %614  ;;  %v3359_v55 = vpop.permute.xlu0 %609 }
 0x102   : > { %5091 = vst [vmem:[#allocation11_spill] sm:$0xff] %v3357_v40  ;;  %5092 = vst [vmem:[#allocation12_spill] sm:$0xff] %v3359_v55  ;;  %1145 = vperm.xlu1 %3068, %v2924_v31   ;;  %1140 = vperm.xlu0 %3067, %v2923_v32   ;;  %v2930_v31 = vld [vmem:[%s3117_s17 + $0x318] sm:$0xff]  ;;  %v2929_v32 = vld [vmem:[%s3117_s17 + $0x310] sm:$0xff] }
 0x105   : > { %v3363_v56 = vpop.permute.xlu1 %624  ;;  %v3365_v15 = vpop.permute.xlu0 %619 }
 0x106   : > { %5093 = vst [vmem:[#allocation13_spill] sm:$0xff] %v3363_v56  ;;  %5094 = vst [vmem:[#allocation14_spill] sm:$0xff] %v3365_v15  ;;  %1155 = vperm.xlu1 %3068, %v2926_v47   ;;  %1150 = vperm.xlu0 %3067, %v2925_v48   ;;  %v2932_v47 = vld [vmem:[%s3117_s17 + $0x328] sm:$0xff]  ;;  %v2931_v48 = vld [vmem:[%s3117_s17 + $0x320] sm:$0xff] }
 0x107   : > { %v2933_v15 = vld [vmem:[%s3117_s17 + $0x330] sm:$0xff] }
 0x109   : > { %v3369_v16 = vpop.permute.xlu1 %634  ;;  %v3371_v40 = vpop.permute.xlu0 %629 }
 0x10a   : > { %5095 = vst [vmem:[#allocation15_spill] sm:$0xff] %v3369_v16  ;;  %5096 = vst [vmem:[#allocation16_spill] sm:$0xff] %v3371_v40  ;;  %1165 = vperm.xlu1 %3068, %v2928_v63   ;;  %1160 = vperm.xlu0 %3067, %v2927_v0   ;;  %v3384_v16 = vld [vmem:[%s5073_s1] ss:$0 sm:$0xff]  ;;  %v3391_v0 = vld [vmem:[%s5073_s1 + $0x1] ss:$0 sm:$0xff] }
 0x10b   : > { %v415_v63 = vmul.f32 %v3384_v16, %v3279_v3  ;;  %v2934_v3 = vld [vmem:[%s3117_s17 + $0x338] sm:$0xff] }
 0x10d   : > { %v3375_v55 = vpop.permute.xlu1 %644  ;;  %v3377_v56 = vpop.permute.xlu0 %639 }
 0x10e   : > { %5097 = vst [vmem:[#allocation17_spill] sm:$0xff] %v3375_v55  ;;  %5098 = vst [vmem:[#allocation18_spill] sm:$0xff] %v3377_v56  ;;  %1175 = vperm.xlu1 %3068, %v2930_v31   ;;  %1170 = vperm.xlu0 %3067, %v2929_v32   ;;  %v414_v32 = vmul.f32 %v3384_v16, %v3281_v4  ;;  %v2936_v4 = vld [vmem:[%s3117_s17 + $0x348] sm:$0xff] }
 0x111   : > { %v655_v56 = vpop.permute.xlu1 %654  ;;  %v650_v31 = vpop.permute.xlu0 %649 }
 0x112   : > { %v696_v55 = vmul.f32 %v3391_v0, %v655_v56  ;;  %v695_v40 = vmul.f32 %v3391_v0, %v650_v31  ;;  %1185 = vperm.xlu1 %3068, %v2932_v47   ;;  %1180 = vperm.xlu0 %3067, %v2931_v48   ;;  %v2935_v56 = vld [vmem:[%s3117_s17 + $0x340] sm:$0xff] }
 0x114   : > { %v3399_v39 = vadd.f32 %v696_v55, %v415_v63  ;;  %v3401_v24 = vadd.f32 %v695_v40, %v414_v32  ;;  %v2938_v40 = vld [vmem:[%s3117_s17 + $0x358] sm:$0x7f]  ;;  %v2937_v55 = vld [vmem:[%s3117_s17 + $0x350] sm:$0xff] }
 0x115   : > { %v3403_v23 = vpop.permute.xlu1 %774  ;;  %v3405_v8 = vpop.permute.xlu0 %769  ;;  %v2941_v32 = vld [vmem:[%s3117_s17 + $0x378] sm:$0xff] }
 0x116   : > { %5099 = vst [vmem:[#allocation19_spill] sm:$0xff] %v3403_v23  ;;  %5100 = vst [vmem:[#allocation20_spill] sm:$0xff] %v3405_v8  ;;  %1195 = vperm.xlu1 %3068, %v2934_v3   ;;  %1190 = vperm.xlu0 %3067, %v2933_v15   ;;  %v2942_v15 = vld [vmem:[%s3117_s17 + $0x380] sm:$0xff] }
 0x119   : > { %v3409_v47 = vpop.permute.xlu1 %784  ;;  %v3411_v48 = vpop.permute.xlu0 %779 }
 0x11a   : > { %5101 = vst [vmem:[#allocation21_spill] sm:$0xff] %v3409_v47  ;;  %5102 = vst [vmem:[#allocation22_spill] sm:$0xff] %v3411_v48  ;;  %1205 = vperm.xlu1 %3068, %v2936_v4   ;;  %1200 = vperm.xlu0 %3067, %v2935_v56   ;;  %v2944_v4 = vld [vmem:[%s3117_s17 + $0x390] sm:$0xff]  ;;  %v2943_v56 = vld [vmem:[%s3117_s17 + $0x388] sm:$0xff] }
 0x11d   : > { %v3415_v63 = vpop.permute.xlu1 %794  ;;  %v3417_v31 = vpop.permute.xlu0 %789 }
 0x11e   : > { %5103 = vst [vmem:[#allocation23_spill] sm:$0xff] %v3415_v63  ;;  %5104 = vst [vmem:[#allocation24_spill] sm:$0xff] %v3417_v31  ;;  %1215 = vperm.xlu1 %3068, %v2938_v40   ;;  %1210 = vperm.xlu0 %3067, %v2937_v55   ;;  %v2946_v40 = vld [vmem:[%s3117_s17 + $0x3a0] sm:$0xff]  ;;  %v2945_v55 = vld [vmem:[%s3117_s17 + $0x398] sm:$0xff] }
 0x121   : > { %v3421_v3 = vpop.permute.xlu1 %804  ;;  %v3423_v47 = vpop.permute.xlu0 %799 }
 0x122   : > { %5105 = vst [vmem:[#allocation25_spill] sm:$0xff] %v3421_v3  ;;  %5106 = vst [vmem:[#allocation26_spill] sm:$0xff] %v3423_v47  ;;  %1336 = vperm.xlu1 %3068, %v2942_v15   ;;  %1331 = vperm.xlu0 %3067, %v2941_v32   ;;  %v2948_v15 = vld [vmem:[%s3117_s17 + $0x3b0] sm:$0xff]  ;;  %v2947_v32 = vld [vmem:[%s3117_s17 + $0x3a8] sm:$0xff] }
 0x125   : > { %v3427_v48 = vpop.permute.xlu1 %814  ;;  %v3429_v63 = vpop.permute.xlu0 %809 }
 0x126   : > { %5107 = vst [vmem:[#allocation27_spill] sm:$0xff] %v3427_v48  ;;  %5108 = vst [vmem:[#allocation28_spill] sm:$0xff] %v3429_v63  ;;  %1346 = vperm.xlu1 %3068, %v2944_v4   ;;  %1341 = vperm.xlu0 %3067, %v2943_v56   ;;  %v2950_v4 = vld [vmem:[%s3117_s17 + $0x3c0] sm:$0xff]  ;;  %v2949_v56 = vld [vmem:[%s3117_s17 + $0x3b8] sm:$0xff] }
 0x129   : > { %v3433_v31 = vpop.permute.xlu1 %824  ;;  %v3435_v3 = vpop.permute.xlu0 %819 }
 0x12a   : > { %5109 = vst [vmem:[#allocation29_spill] sm:$0xff] %v3433_v31  ;;  %5110 = vst [vmem:[#allocation30_spill] sm:$0xff] %v3435_v3  ;;  %1356 = vperm.xlu1 %3068, %v2946_v40   ;;  %1351 = vperm.xlu0 %3067, %v2945_v55   ;;  %v2952_v40 = vld [vmem:[%s3117_s17 + $0x3d0] sm:$0xff]  ;;  %v2951_v55 = vld [vmem:[%s3117_s17 + $0x3c8] sm:$0xff] }
 0x12d   : > { %v3439_v47 = vpop.permute.xlu1 %834  ;;  %v3441_v48 = vpop.permute.xlu0 %829 }
 0x12e   : > { %5111 = vst [vmem:[#allocation31_spill] sm:$0xff] %v3439_v47  ;;  %5112 = vst [vmem:[#allocation32_spill] sm:$0xff] %v3441_v48  ;;  %1366 = vperm.xlu1 %3068, %v2948_v15   ;;  %1361 = vperm.xlu0 %3067, %v2947_v32   ;;  %v2954_v15 = vld [vmem:[%s3117_s17 + $0x3e0] sm:$0xff]  ;;  %v2953_v32 = vld [vmem:[%s3117_s17 + $0x3d8] sm:$0xff] }
 0x131   : > { %v3445_v63 = vpop.permute.xlu1 %844  ;;  %v3447_v31 = vpop.permute.xlu0 %839 }
 0x132   : > { %5113 = vst [vmem:[#allocation33_spill] sm:$0xff] %v3445_v63  ;;  %5114 = vst [vmem:[#allocation34_spill] sm:$0xff] %v3447_v31  ;;  %1376 = vperm.xlu1 %3068, %v2950_v4   ;;  %1371 = vperm.xlu0 %3067, %v2949_v56   ;;  %v2956_v4 = vld [vmem:[%s3117_s17 + $0x3f0] sm:$0xff]  ;;  %v2955_v56 = vld [vmem:[%s3117_s17 + $0x3e8] sm:$0xff] }
 0x135   : > { %v3451_v3 = vpop.permute.xlu1 %854  ;;  %v3453_v47 = vpop.permute.xlu0 %849 }
 0x136   : > { %5115 = vst [vmem:[#allocation35_spill] sm:$0xff] %v3451_v3  ;;  %5116 = vst [vmem:[#allocation36_spill] sm:$0xff] %v3453_v47  ;;  %1386 = vperm.xlu1 %3068, %v2952_v40   ;;  %1381 = vperm.xlu0 %3067, %v2951_v55   ;;  %v2958_v40 = vld [vmem:[%s3117_s17 + $0x400] sm:$0xff]  ;;  %v2957_v55 = vld [vmem:[%s3117_s17 + $0x3f8] sm:$0xff] }
 0x139   : > { %v3457_v48 = vpop.permute.xlu1 %864  ;;  %v3459_v63 = vpop.permute.xlu0 %859 }
 0x13a   : > { %5117 = vst [vmem:[#allocation37_spill] sm:$0xff] %v3457_v48  ;;  %5118 = vst [vmem:[#allocation38_spill] sm:$0xff] %v3459_v63  ;;  %1396 = vperm.xlu1 %3068, %v2954_v15   ;;  %1391 = vperm.xlu0 %3067, %v2953_v32   ;;  %v2960_v15 = vld [vmem:[%s3117_s17 + $0x410] sm:$0xff]  ;;  %v2959_v32 = vld [vmem:[%s3117_s17 + $0x408] sm:$0xff] }
 0x13d   : > { %v3463_v31 = vpop.permute.xlu1 %874  ;;  %v3465_v3 = vpop.permute.xlu0 %869 }
 0x13e   : > { %5119 = vst [vmem:[#allocation39_spill] sm:$0xff] %v3463_v31  ;;  %5120 = vst [vmem:[#allocation40_spill] sm:$0xff] %v3465_v3  ;;  %1406 = vperm.xlu1 %3068, %v2956_v4   ;;  %1401 = vperm.xlu0 %3067, %v2955_v56   ;;  %v2962_v4 = vld [vmem:[%s3117_s17 + $0x420] sm:$0xff]  ;;  %v2961_v56 = vld [vmem:[%s3117_s17 + $0x418] sm:$0xff] }
 0x141   : > { %v3469_v47 = vpop.permute.xlu1 %884  ;;  %v3471_v48 = vpop.permute.xlu0 %879 }
 0x142   : > { %5121 = vst [vmem:[#allocation41_spill] sm:$0xff] %v3469_v47  ;;  %5122 = vst [vmem:[#allocation42_spill] sm:$0xff] %v3471_v48  ;;  %1416 = vperm.xlu1 %3068, %v2958_v40   ;;  %1411 = vperm.xlu0 %3067, %v2957_v55   ;;  %v2964_v40 = vld [vmem:[%s3117_s17 + $0x430] sm:$0xff]  ;;  %v2963_v55 = vld [vmem:[%s3117_s17 + $0x428] sm:$0xff] }
 0x145   : > { %v3475_v63 = vpop.permute.xlu1 %894  ;;  %v3477_v31 = vpop.permute.xlu0 %889 }
 0x146   : > { %5123 = vst [vmem:[#allocation43_spill] sm:$0xff] %v3475_v63  ;;  %5124 = vst [vmem:[#allocation44_spill] sm:$0xff] %v3477_v31  ;;  %1426 = vperm.xlu1 %3068, %v2960_v15   ;;  %1421 = vperm.xlu0 %3067, %v2959_v32   ;;  %v2966_v15 = vld [vmem:[%s3117_s17 + $0x440] sm:$0xff]  ;;  %v2965_v32 = vld [vmem:[%s3117_s17 + $0x438] sm:$0xff] }
 0x149   : > { %v3481_v3 = vpop.permute.xlu1 %904  ;;  %v3483_v47 = vpop.permute.xlu0 %899 }
 0x14a   : > { %5125 = vst [vmem:[#allocation45_spill] sm:$0xff] %v3481_v3  ;;  %5126 = vst [vmem:[#allocation46_spill] sm:$0xff] %v3483_v47  ;;  %1436 = vperm.xlu1 %3068, %v2962_v4   ;;  %1431 = vperm.xlu0 %3067, %v2961_v56   ;;  %v2968_v4 = vld [vmem:[%s3117_s17 + $0x450] sm:$0xff]  ;;  %v2967_v56 = vld [vmem:[%s3117_s17 + $0x448] sm:$0xff] }
 0x14d   : > { %v3487_v48 = vpop.permute.xlu1 %914  ;;  %v3489_v63 = vpop.permute.xlu0 %909 }
 0x14e   : > { %5127 = vst [vmem:[#allocation47_spill] sm:$0xff] %v3487_v48  ;;  %5128 = vst [vmem:[#allocation48_spill] sm:$0xff] %v3489_v63  ;;  %1446 = vperm.xlu1 %3068, %v2964_v40   ;;  %1441 = vperm.xlu0 %3067, %v2963_v55   ;;  %v3502_v48 = vld [vmem:[%s5073_s1 + $0x2] ss:$0 sm:$0xff] }
 0x14f   : > { %5131 = vst [vmem:[#allocation51_spill] sm:$0xff] %v3502_v48 }
 0x151   : > { %v3493_v31 = vpop.permute.xlu1 %924  ;;  %v3495_v3 = vpop.permute.xlu0 %919 }
 0x152   : > { %5129 = vst [vmem:[#allocation49_spill] sm:$0xff] %v3493_v31  ;;  %5130 = vst [vmem:[#allocation50_spill] sm:$0xff] %v3495_v3  ;;  %1456 = vperm.xlu1 %3068, %v2966_v15   ;;  %1451 = vperm.xlu0 %3067, %v2965_v32   ;;  %v2970_v15 = vld [vmem:[%s3117_s17 + $0x460] sm:$0xff]  ;;  %v2969_v32 = vld [vmem:[%s3117_s17 + $0x458] sm:$0xff] }
 0x155   : > { %v935_v40 = vpop.permute.xlu1 %934  ;;  %v930_v55 = vpop.permute.xlu0 %929 }
 0x156   : > { %v976_v63 = vmul.f32 %v3502_v48, %v935_v40  ;;  %v975_v47 = vmul.f32 %v3502_v48, %v930_v55  ;;  %1466 = vperm.xlu1 %3068, %v2968_v4   ;;  %1461 = vperm.xlu0 %3067, %v2967_v56   ;;  %v2972_v4 = vld [vmem:[%s3117_s17 + $0x470] sm:$0xff]  ;;  %v2971_v40 = vld [vmem:[%s3117_s17 + $0x468] sm:$0xff] }
 0x158   : > { %v3509_v3 = vadd.f32 %v976_v63, %v3399_v39  ;;  %v3512_v31 = vadd.f32 %v975_v47, %v3401_v24  ;;  %v2974_v24 = vld [vmem:[%s3117_s17 + $0x480] sm:$0x7f]  ;;  %v2973_v39 = vld [vmem:[%s3117_s17 + $0x478] sm:$0xff] }
 0x159   : > { %v3514_v8 = vpop.permute.xlu1 %1055  ;;  %v3516_v23 = vpop.permute.xlu0 %1050 }
 0x15a   : > { %5132 = vst [vmem:[#allocation52_spill] sm:$0xff] %v3514_v8  ;;  %5133 = vst [vmem:[#allocation53_spill] sm:$0xff] %v3516_v23  ;;  %1476 = vperm.xlu1 %3068, %v2970_v15   ;;  %1471 = vperm.xlu0 %3067, %v2969_v32   ;;  %v2978_v15 = vld [vmem:[%s3117_s17 + $0x259] sm:$0xff]  ;;  %v2977_v32 = vld [vmem:[%s3117_s17 + $0x251] sm:$0xff] }
 0x15d   : > { %v3520_v56 = vpop.permute.xlu1 %1065  ;;  %v3522_v55 = vpop.permute.xlu0 %1060 }
 0x15e   : > { %5134 = vst [vmem:[#allocation54_spill] sm:$0xff] %v3520_v56  ;;  %5135 = vst [vmem:[#allocation55_spill] sm:$0xff] %v3522_v55  ;;  %1486 = vperm.xlu1 %3068, %v2972_v4   ;;  %1481 = vperm.xlu0 %3067, %v2971_v40   ;;  %v2980_v4 = vld [vmem:[%s3117_s17 + $0x269] sm:$0xff]  ;;  %v2979_v40 = vld [vmem:[%s3117_s17 + $0x261] sm:$0xff] }
 0x161   : > { %v3526_v47 = vpop.permute.xlu1 %1075  ;;  %v3528_v63 = vpop.permute.xlu0 %1070 }
 0x162   : > { %5136 = vst [vmem:[#allocation56_spill] sm:$0xff] %v3526_v47  ;;  %5137 = vst [vmem:[#allocation57_spill] sm:$0xff] %v3528_v63  ;;  %1496 = vperm.xlu1 %3068, %v2974_v24   ;;  %1491 = vperm.xlu0 %3067, %v2973_v39   ;;  %v2982_v24 = vld [vmem:[%s3117_s17 + $0x279] sm:$0xff]  ;;  %v2981_v39 = vld [vmem:[%s3117_s17 + $0x271] sm:$0xff] }
 0x165   : > { %v3532_v23 = vpop.permute.xlu1 %1085  ;;  %v3534_v56 = vpop.permute.xlu0 %1080 }
 0x166   : > { %5138 = vst [vmem:[#allocation58_spill] sm:$0xff] %v3532_v23  ;;  %5139 = vst [vmem:[#allocation59_spill] sm:$0xff] %v3534_v56  ;;  %1616 = vperm.xlu1 %3068, %v2978_v15   ;;  %1611 = vperm.xlu0 %3067, %v2977_v32   ;;  %v2984_v15 = vld [vmem:[%s3117_s17 + $0x289] sm:$0xff]  ;;  %v2983_v32 = vld [vmem:[%s3117_s17 + $0x281] sm:$0xff] }
 0x169   : > { %v3538_v55 = vpop.permute.xlu1 %1095  ;;  %v3540_v8 = vpop.permute.xlu0 %1090 }
 0x16a   : > { %5140 = vst [vmem:[#allocation60_spill] sm:$0xff] %v3538_v55  ;;  %5141 = vst [vmem:[#allocation61_spill] sm:$0xff] %v3540_v8  ;;  %1626 = vperm.xlu1 %3068, %v2980_v4   ;;  %1621 = vperm.xlu0 %3067, %v2979_v40   ;;  %v2986_v4 = vld [vmem:[%s3117_s17 + $0x299] sm:$0xff]  ;;  %v2985_v40 = vld [vmem:[%s3117_s17 + $0x291] sm:$0xff] }
 0x16d   : > { %v3544_v63 = vpop.permute.xlu1 %1105  ;;  %v3546_v23 = vpop.permute.xlu0 %1100 }
 0x16e   : > { %5142 = vst [vmem:[#allocation62_spill] sm:$0xff] %v3544_v63  ;;  %5143 = vst [vmem:[#allocation63_spill] sm:$0xff] %v3546_v23  ;;  %1636 = vperm.xlu1 %3068, %v2982_v24   ;;  %1631 = vperm.xlu0 %3067, %v2981_v39   ;;  %v2988_v24 = vld [vmem:[%s3117_s17 + $0x2a9] sm:$0xff]  ;;  %v2987_v39 = vld [vmem:[%s3117_s17 + $0x2a1] sm:$0xff] }
 0x171   : > { %v3550_v56 = vpop.permute.xlu1 %1115  ;;  %v3552_v55 = vpop.permute.xlu0 %1110 }
 0x172   : > { %5144 = vst [vmem:[#allocation64_spill] sm:$0xff] %v3550_v56  ;;  %5145 = vst [vmem:[#allocation65_spill] sm:$0xff] %v3552_v55  ;;  %1646 = vperm.xlu1 %3068, %v2984_v15   ;;  %1641 = vperm.xlu0 %3067, %v2983_v32   ;;  %v2990_v15 = vld [vmem:[%s3117_s17 + $0x2b9] sm:$0xff]  ;;  %v2989_v32 = vld [vmem:[%s3117_s17 + $0x2b1] sm:$0xff] }
 0x175   : > { %v3556_v8 = vpop.permute.xlu1 %1125  ;;  %v3558_v63 = vpop.permute.xlu0 %1120 }
 0x176   : > { %5146 = vst [vmem:[#allocation66_spill] sm:$0xff] %v3556_v8  ;;  %5147 = vst [vmem:[#allocation67_spill] sm:$0xff] %v3558_v63  ;;  %1656 = vperm.xlu1 %3068, %v2986_v4   ;;  %1651 = vperm.xlu0 %3067, %v2985_v40   ;;  %v2992_v4 = vld [vmem:[%s3117_s17 + $0x2c9] sm:$0xff]  ;;  %v2991_v40 = vld [vmem:[%s3117_s17 + $0x2c1] sm:$0xff] }
 0x179   : > { %v3562_v23 = vpop.permute.xlu1 %1135  ;;  %v3564_v56 = vpop.permute.xlu0 %1130 }
 0x17a   : > { %5148 = vst [vmem:[#allocation68_spill] sm:$0xff] %v3562_v23  ;;  %5149 = vst [vmem:[#allocation69_spill] sm:$0xff] %v3564_v56  ;;  %1666 = vperm.xlu1 %3068, %v2988_v24   ;;  %1661 = vperm.xlu0 %3067, %v2987_v39   ;;  %v2994_v24 = vld [vmem:[%s3117_s17 + $0x2d9] sm:$0xff]  ;;  %v2993_v39 = vld [vmem:[%s3117_s17 + $0x2d1] sm:$0xff] }
 0x17d   : > { %v3568_v55 = vpop.permute.xlu1 %1145  ;;  %v3570_v8 = vpop.permute.xlu0 %1140 }
 0x17e   : > { %5150 = vst [vmem:[#allocation70_spill] sm:$0xff] %v3568_v55  ;;  %5151 = vst [vmem:[#allocation71_spill] sm:$0xff] %v3570_v8  ;;  %1676 = vperm.xlu1 %3068, %v2990_v15   ;;  %1671 = vperm.xlu0 %3067, %v2989_v32   ;;  %v2996_v15 = vld [vmem:[%s3117_s17 + $0x2e9] sm:$0xff]  ;;  %v2995_v32 = vld [vmem:[%s3117_s17 + $0x2e1] sm:$0xff] }
 0x181   : > { %v3574_v63 = vpop.permute.xlu1 %1155  ;;  %v3576_v23 = vpop.permute.xlu0 %1150 }
 0x182   : > { %5152 = vst [vmem:[#allocation72_spill] sm:$0xff] %v3574_v63  ;;  %5153 = vst [vmem:[#allocation73_spill] sm:$0xff] %v3576_v23  ;;  %1686 = vperm.xlu1 %3068, %v2992_v4   ;;  %1681 = vperm.xlu0 %3067, %v2991_v40   ;;  %v2998_v4 = vld [vmem:[%s3117_s17 + $0x2f9] sm:$0xff]  ;;  %v2997_v40 = vld [vmem:[%s3117_s17 + $0x2f1] sm:$0xff] }
 0x185   : > { %v3580_v56 = vpop.permute.xlu1 %1165  ;;  %v3582_v55 = vpop.permute.xlu0 %1160 }
 0x186   : > { %5154 = vst [vmem:[#allocation74_spill] sm:$0xff] %v3580_v56  ;;  %5155 = vst [vmem:[#allocation75_spill] sm:$0xff] %v3582_v55  ;;  %1696 = vperm.xlu1 %3068, %v2994_v24   ;;  %1691 = vperm.xlu0 %3067, %v2993_v39   ;;  %v3000_v24 = vld [vmem:[%s3117_s17 + $0x309] sm:$0xff]  ;;  %v2999_v39 = vld [vmem:[%s3117_s17 + $0x301] sm:$0xff] }
 0x189   : > { %v3586_v8 = vpop.permute.xlu1 %1175  ;;  %v3588_v63 = vpop.permute.xlu0 %1170 }
 0x18a   : > { %5156 = vst [vmem:[#allocation76_spill] sm:$0xff] %v3586_v8  ;;  %5157 = vst [vmem:[#allocation77_spill] sm:$0xff] %v3588_v63  ;;  %1706 = vperm.xlu1 %3068, %v2996_v15   ;;  %1701 = vperm.xlu0 %3067, %v2995_v32   ;;  %v3002_v15 = vld [vmem:[%s3117_s17 + $0x319] sm:$0xff]  ;;  %v3001_v32 = vld [vmem:[%s3117_s17 + $0x311] sm:$0xff] }
 0x18d   : > { %v3592_v23 = vpop.permute.xlu1 %1185  ;;  %v3594_v56 = vpop.permute.xlu0 %1180 }
 0x18e   : > { %5158 = vst [vmem:[#allocation78_spill] sm:$0xff] %v3592_v23  ;;  %5159 = vst [vmem:[#allocation79_spill] sm:$0xff] %v3594_v56  ;;  %1716 = vperm.xlu1 %3068, %v2998_v4   ;;  %1711 = vperm.xlu0 %3067, %v2997_v40   ;;  %v3004_v4 = vld [vmem:[%s3117_s17 + $0x329] sm:$0xff]  ;;  %v3003_v40 = vld [vmem:[%s3117_s17 + $0x321] sm:$0xff] }
 0x191   : > { %v3598_v55 = vpop.permute.xlu1 %1195  ;;  %v3600_v8 = vpop.permute.xlu0 %1190 }
 0x192   : > { %5160 = vst [vmem:[#allocation80_spill] sm:$0xff] %v3598_v55  ;;  %5161 = vst [vmem:[#allocation81_spill] sm:$0xff] %v3600_v8  ;;  %1726 = vperm.xlu1 %3068, %v3000_v24   ;;  %1721 = vperm.xlu0 %3067, %v2999_v39   ;;  %v3613_v55 = vld [vmem:[%s5073_s1 + $0x3] ss:$0 sm:$0xff] }
 0x193   : > { %5164 = vst [vmem:[#allocation84_spill] sm:$0xff] %v3613_v55 }
 0x195   : > { %v3604_v63 = vpop.permute.xlu1 %1205  ;;  %v3606_v23 = vpop.permute.xlu0 %1200 }
 0x196   : > { %5162 = vst [vmem:[#allocation82_spill] sm:$0xff] %v3604_v63  ;;  %5163 = vst [vmem:[#allocation83_spill] sm:$0xff] %v3606_v23  ;;  %1736 = vperm.xlu1 %3068, %v3002_v15   ;;  %1731 = vperm.xlu0 %3067, %v3001_v32   ;;  %v3006_v15 = vld [vmem:[%s3117_s17 + $0x339] sm:$0xff]  ;;  %v3005_v32 = vld [vmem:[%s3117_s17 + $0x331] sm:$0xff] }
 0x199   : > { %v1216_v24 = vpop.permute.xlu1 %1215  ;;  %v1211_v39 = vpop.permute.xlu0 %1210 }
 0x19a   : > { %v1257_v8 = vmul.f32 %v3613_v55, %v1216_v24  ;;  %v1256_v56 = vmul.f32 %v3613_v55, %v1211_v39  ;;  %1746 = vperm.xlu1 %3068, %v3004_v4   ;;  %1741 = vperm.xlu0 %3067, %v3003_v40   ;;  %v3008_v4 = vld [vmem:[%s3117_s17 + $0x349] sm:$0xff]  ;;  %v3007_v24 = vld [vmem:[%s3117_s17 + $0x341] sm:$0xff] }
 0x19c   : > { %v3620_v23 = vadd.f32 %v1257_v8, %v3509_v3  ;;  %v3623_v63 = vadd.f32 %v1256_v56, %v3512_v31  ;;  %v3010_v8 = vld [vmem:[%s3117_s17 + $0x359] sm:$0x7f]  ;;  %v3009_v31 = vld [vmem:[%s3117_s17 + $0x351] sm:$0xff] }
 0x19d   : > { %v3625_v47 = vpop.permute.xlu1 %1336  ;;  %v3627_v48 = vpop.permute.xlu0 %1331 }
 0x19e   : > { %5165 = vst [vmem:[#allocation85_spill] sm:$0xff] %v3625_v47  ;;  %5166 = vst [vmem:[#allocation86_spill] sm:$0xff] %v3627_v48  ;;  %1756 = vperm.xlu1 %3068, %v3006_v15   ;;  %1751 = vperm.xlu0 %3067, %v3005_v32   ;;  %v1854_v15 = vld [vmem:[%s3117_s17 + $0x19] sm:$0xff]  ;;  %v1853_v32 = vld [vmem:[%s3117_s17 + $0x11] sm:$0xff] }
 0x1a1   : > { %v3631_v40 = vpop.permute.xlu1 %1346  ;;  %v3633_v39 = vpop.permute.xlu0 %1341 }
 0x1a2   : > { %5167 = vst [vmem:[#allocation87_spill] sm:$0xff] %v3631_v40  ;;  %5168 = vst [vmem:[#allocation88_spill] sm:$0xff] %v3633_v39  ;;  %1766 = vperm.xlu1 %3068, %v3008_v4   ;;  %1761 = vperm.xlu0 %3067, %v3007_v24   ;;  %v1856_v4 = vld [vmem:[%s3117_s17 + $0x29] sm:$0xff]  ;;  %v1855_v24 = vld [vmem:[%s3117_s17 + $0x21] sm:$0xff] }
 0x1a5   : > { %v3637_v3 = vpop.permute.xlu1 %1356  ;;  %v3639_v56 = vpop.permute.xlu0 %1351 }
 0x1a6   : > { %5169 = vst [vmem:[#allocation89_spill] sm:$0xff] %v3637_v3  ;;  %5170 = vst [vmem:[#allocation90_spill] sm:$0xff] %v3639_v56  ;;  %1776 = vperm.xlu1 %3068, %v3010_v8   ;;  %1771 = vperm.xlu0 %3067, %v3009_v31   ;;  %v1858_v8 = vld [vmem:[%s3117_s17 + $0x39] sm:$0xff]  ;;  %v1857_v31 = vld [vmem:[%s3117_s17 + $0x31] sm:$0xff] }
 0x1a9   : > { %v3643_v48 = vpop.permute.xlu1 %1366  ;;  %v3645_v40 = vpop.permute.xlu0 %1361 }
 0x1aa   : > { %5171 = vst [vmem:[#allocation91_spill] sm:$0xff] %v3643_v48  ;;  %5172 = vst [vmem:[#allocation92_spill] sm:$0xff] %v3645_v40  ;;  %1896 = vperm.xlu1 %3068, %v1854_v15   ;;  %1891 = vperm.xlu0 %3067, %v1853_v32   ;;  %v1860_v15 = vld [vmem:[%s3117_s17 + $0x49] sm:$0xff]  ;;  %v1859_v32 = vld [vmem:[%s3117_s17 + $0x41] sm:$0xff] }
 0x1ad   : > { %v3649_v39 = vpop.permute.xlu1 %1376  ;;  %v3651_v47 = vpop.permute.xlu0 %1371 }
 0x1ae   : > { %5173 = vst [vmem:[#allocation93_spill] sm:$0xff] %v3649_v39  ;;  %5174 = vst [vmem:[#allocation94_spill] sm:$0xff] %v3651_v47  ;;  %1906 = vperm.xlu1 %3068, %v1856_v4   ;;  %1901 = vperm.xlu0 %3067, %v1855_v24   ;;  %v1862_v4 = vld [vmem:[%s3117_s17 + $0x59] sm:$0xff]  ;;  %v1861_v24 = vld [vmem:[%s3117_s17 + $0x51] sm:$0xff] }
 0x1b1   : > { %v3655_v56 = vpop.permute.xlu1 %1386  ;;  %v3657_v48 = vpop.permute.xlu0 %1381 }
 0x1b2   : > { %5175 = vst [vmem:[#allocation95_spill] sm:$0xff] %v3655_v56  ;;  %5176 = vst [vmem:[#allocation96_spill] sm:$0xff] %v3657_v48  ;;  %1916 = vperm.xlu1 %3068, %v1858_v8   ;;  %1911 = vperm.xlu0 %3067, %v1857_v31   ;;  %v1864_v8 = vld [vmem:[%s3117_s17 + $0x69] sm:$0xff]  ;;  %v1863_v31 = vld [vmem:[%s3117_s17 + $0x61] sm:$0xff] }
 0x1b5   : > { %v3661_v40 = vpop.permute.xlu1 %1396  ;;  %v3663_v39 = vpop.permute.xlu0 %1391 }
 0x1b6   : > { %5177 = vst [vmem:[#allocation97_spill] sm:$0xff] %v3661_v40  ;;  %5178 = vst [vmem:[#allocation98_spill] sm:$0xff] %v3663_v39  ;;  %1926 = vperm.xlu1 %3068, %v1860_v15   ;;  %1921 = vperm.xlu0 %3067, %v1859_v32   ;;  %v1866_v15 = vld [vmem:[%s3117_s17 + $0x79] sm:$0xff]  ;;  %v1865_v32 = vld [vmem:[%s3117_s17 + $0x71] sm:$0xff] }
 0x1b9   : > { %v3667_v47 = vpop.permute.xlu1 %1406  ;;  %v3669_v56 = vpop.permute.xlu0 %1401 }
 0x1ba   : > { %5179 = vst [vmem:[#allocation99_spill] sm:$0xff] %v3667_v47  ;;  %5180 = vst [vmem:[#allocation100_spill] sm:$0xff] %v3669_v56  ;;  %1936 = vperm.xlu1 %3068, %v1862_v4   ;;  %1931 = vperm.xlu0 %3067, %v1861_v24   ;;  %v1868_v4 = vld [vmem:[%s3117_s17 + $0x89] sm:$0xff]  ;;  %v1867_v24 = vld [vmem:[%s3117_s17 + $0x81] sm:$0xff] }
 0x1bd   : > { %v3673_v48 = vpop.permute.xlu1 %1416  ;;  %v3675_v40 = vpop.permute.xlu0 %1411 }
 0x1be   : > { %5181 = vst [vmem:[#allocation101_spill] sm:$0xff] %v3673_v48  ;;  %5182 = vst [vmem:[#allocation102_spill] sm:$0xff] %v3675_v40  ;;  %1946 = vperm.xlu1 %3068, %v1864_v8   ;;  %1941 = vperm.xlu0 %3067, %v1863_v31   ;;  %v1870_v8 = vld [vmem:[%s3117_s17 + $0x99] sm:$0xff]  ;;  %v1869_v31 = vld [vmem:[%s3117_s17 + $0x91] sm:$0xff] }
 0x1c1   : > { %v3679_v39 = vpop.permute.xlu1 %1426  ;;  %v3681_v47 = vpop.permute.xlu0 %1421 }
 0x1c2   : > { %5183 = vst [vmem:[#allocation103_spill] sm:$0xff] %v3679_v39  ;;  %5184 = vst [vmem:[#allocation104_spill] sm:$0xff] %v3681_v47  ;;  %1956 = vperm.xlu1 %3068, %v1866_v15   ;;  %1951 = vperm.xlu0 %3067, %v1865_v32   ;;  %v1872_v15 = vld [vmem:[%s3117_s17 + $0xa9] sm:$0xff]  ;;  %v1871_v32 = vld [vmem:[%s3117_s17 + $0xa1] sm:$0xff] }
 0x1c5   : > { %v3685_v56 = vpop.permute.xlu1 %1436  ;;  %v3687_v48 = vpop.permute.xlu0 %1431 }
 0x1c6   : > { %5185 = vst [vmem:[#allocation105_spill] sm:$0xff] %v3685_v56  ;;  %5186 = vst [vmem:[#allocation106_spill] sm:$0xff] %v3687_v48  ;;  %1966 = vperm.xlu1 %3068, %v1868_v4   ;;  %1961 = vperm.xlu0 %3067, %v1867_v24   ;;  %v1874_v4 = vld [vmem:[%s3117_s17 + $0xb9] sm:$0xff]  ;;  %v1873_v24 = vld [vmem:[%s3117_s17 + $0xb1] sm:$0xff] }
 0x1c9   : > { %v3691_v40 = vpop.permute.xlu1 %1446  ;;  %v3693_v39 = vpop.permute.xlu0 %1441 }
 0x1ca   : > { %5187 = vst [vmem:[#allocation107_spill] sm:$0xff] %v3691_v40  ;;  %5188 = vst [vmem:[#allocation108_spill] sm:$0xff] %v3693_v39  ;;  %1976 = vperm.xlu1 %3068, %v1870_v8   ;;  %1971 = vperm.xlu0 %3067, %v1869_v31   ;;  %v1876_v8 = vld [vmem:[%s3117_s17 + $0xc9] sm:$0xff]  ;;  %v1875_v31 = vld [vmem:[%s3117_s17 + $0xc1] sm:$0xff] }
 0x1cd   : > { %v3697_v47 = vpop.permute.xlu1 %1456  ;;  %v3699_v56 = vpop.permute.xlu0 %1451 }
 0x1ce   : > { %5189 = vst [vmem:[#allocation109_spill] sm:$0xff] %v3697_v47  ;;  %5190 = vst [vmem:[#allocation110_spill] sm:$0xff] %v3699_v56  ;;  %1986 = vperm.xlu1 %3068, %v1872_v15   ;;  %1981 = vperm.xlu0 %3067, %v1871_v32   ;;  %v1878_v15 = vld [vmem:[%s3117_s17 + $0xd9] sm:$0xff]  ;;  %v1877_v32 = vld [vmem:[%s3117_s17 + $0xd1] sm:$0xff] }
 0x1d1   : > { %v3703_v48 = vpop.permute.xlu1 %1466  ;;  %v3705_v40 = vpop.permute.xlu0 %1461 }
 0x1d2   : > { %5191 = vst [vmem:[#allocation111_spill] sm:$0xff] %v3703_v48  ;;  %5192 = vst [vmem:[#allocation112_spill] sm:$0xff] %v3705_v40  ;;  %1996 = vperm.xlu1 %3068, %v1874_v4   ;;  %1991 = vperm.xlu0 %3067, %v1873_v24   ;;  %v1880_v4 = vld [vmem:[%s3117_s17 + $0xe9] sm:$0xff]  ;;  %v1879_v24 = vld [vmem:[%s3117_s17 + $0xe1] sm:$0xff] }
 0x1d5   : > { %v3709_v39 = vpop.permute.xlu1 %1476  ;;  %v3711_v47 = vpop.permute.xlu0 %1471 }
 0x1d6   : > { %5193 = vst [vmem:[#allocation113_spill] sm:$0xff] %v3709_v39  ;;  %5194 = vst [vmem:[#allocation114_spill] sm:$0xff] %v3711_v47  ;;  %2006 = vperm.xlu1 %3068, %v1876_v8   ;;  %2001 = vperm.xlu0 %3067, %v1875_v31   ;;  %v3724_v39 = vld [vmem:[%s5073_s1 + $0x4] ss:$0 sm:$0xff] }
 0x1d7   : > { %5197 = vst [vmem:[#allocation117_spill] sm:$0xff] %v3724_v39 }
 0x1d9   : > { %v3715_v56 = vpop.permute.xlu1 %1486  ;;  %v3717_v48 = vpop.permute.xlu0 %1481 }
 0x1da   : > { %5195 = vst [vmem:[#allocation115_spill] sm:$0xff] %v3715_v56  ;;  %5196 = vst [vmem:[#allocation116_spill] sm:$0xff] %v3717_v48  ;;  %2016 = vperm.xlu1 %3068, %v1878_v15   ;;  %2011 = vperm.xlu0 %3067, %v1877_v32   ;;  %v1882_v15 = vld [vmem:[%s3117_s17 + $0xf9] sm:$0xff]  ;;  %v1881_v32 = vld [vmem:[%s3117_s17 + $0xf1] sm:$0xff] }
 0x1dd   : > { %v1497_v8 = vpop.permute.xlu1 %1496  ;;  %v1492_v31 = vpop.permute.xlu0 %1491 }
 0x1de   : > { %v1538_v47 = vmul.f32 %v3724_v39, %v1497_v8  ;;  %v1537_v40 = vmul.f32 %v3724_v39, %v1492_v31  ;;  %2026 = vperm.xlu1 %3068, %v1880_v4   ;;  %2021 = vperm.xlu0 %3067, %v1879_v24   ;;  %v1884_v4 = vld [vmem:[%s3117_s17 + $0x109] sm:$0xff]  ;;  %v1883_v8 = vld [vmem:[%s3117_s17 + $0x101] sm:$0xff] }
 0x1e0   : > { %v3731_v48 = vadd.f32 %v1538_v47, %v3620_v23  ;;  %v3734_v56 = vadd.f32 %v1537_v40, %v3623_v63  ;;  %v1886_v23 = vld [vmem:[%s3117_s17 + $0x119] sm:$0x7f]  ;;  %v1885_v47 = vld [vmem:[%s3117_s17 + $0x111] sm:$0xff] }
 0x1e1   : > { %v3736_v3 = vpop.permute.xlu1 %1616  ;;  %v3738_v55 = vpop.permute.xlu0 %1611 }
 0x1e2   : > { %5198 = vst [vmem:[#allocation118_spill] sm:$0xff] %v3736_v3  ;;  %5199 = vst [vmem:[#allocation119_spill] sm:$0xff] %v3738_v55  ;;  %2036 = vperm.xlu1 %3068, %v1882_v15   ;;  %2031 = vperm.xlu0 %3067, %v1881_v32   ;;  %v3016_v15 = vld [vmem:[%s3117_s17 + $0x141] sm:$0xff]  ;;  %v3015_v32 = vld [vmem:[%s3117_s17 + $0x139] sm:$0xff] }
 0x1e5   : > { %v3742_v24 = vpop.permute.xlu1 %1626  ;;  %v3744_v31 = vpop.permute.xlu0 %1621 }
 0x1e6   : > { %5200 = vst [vmem:[#allocation120_spill] sm:$0xff] %v3742_v24  ;;  %5201 = vst [vmem:[#allocation121_spill] sm:$0xff] %v3744_v31  ;;  %2046 = vperm.xlu1 %3068, %v1884_v4   ;;  %2041 = vperm.xlu0 %3067, %v1883_v8   ;;  %v3018_v4 = vld [vmem:[%s3117_s17 + $0x151] sm:$0xff]  ;;  %v3017_v8 = vld [vmem:[%s3117_s17 + $0x149] sm:$0xff] }
 0x1e9   : > { %v3748_v63 = vpop.permute.xlu1 %1636  ;;  %v3750_v40 = vpop.permute.xlu0 %1631 }
 0x1ea   : > { %5202 = vst [vmem:[#allocation122_spill] sm:$0xff] %v3748_v63  ;;  %5203 = vst [vmem:[#allocation123_spill] sm:$0xff] %v3750_v40  ;;  %2056 = vperm.xlu1 %3068, %v1886_v23   ;;  %2051 = vperm.xlu0 %3067, %v1885_v47   ;;  %v3020_v23 = vld [vmem:[%s3117_s17 + $0x161] sm:$0xff]  ;;  %v3019_v47 = vld [vmem:[%s3117_s17 + $0x159] sm:$0xff] }
 0x1ed   : > { %v3754_v55 = vpop.permute.xlu1 %1646  ;;  %v3756_v24 = vpop.permute.xlu0 %1641 }
 0x1ee   : > { %5204 = vst [vmem:[#allocation124_spill] sm:$0xff] %v3754_v55  ;;  %5205 = vst [vmem:[#allocation125_spill] sm:$0xff] %v3756_v24  ;;  %2176 = vperm.xlu1 %3068, %v3016_v15   ;;  %2171 = vperm.xlu0 %3067, %v3015_v32   ;;  %v3022_v15 = vld [vmem:[%s3117_s17 + $0x171] sm:$0xff]  ;;  %v3021_v32 = vld [vmem:[%s3117_s17 + $0x169] sm:$0xff] }
 0x1f1   : > { %v3760_v31 = vpop.permute.xlu1 %1656  ;;  %v3762_v3 = vpop.permute.xlu0 %1651 }
 0x1f2   : > { %5206 = vst [vmem:[#allocation126_spill] sm:$0xff] %v3760_v31  ;;  %5207 = vst [vmem:[#allocation127_spill] sm:$0xff] %v3762_v3  ;;  %2186 = vperm.xlu1 %3068, %v3018_v4   ;;  %2181 = vperm.xlu0 %3067, %v3017_v8   ;;  %v3024_v4 = vld [vmem:[%s3117_s17 + $0x181] sm:$0xff]  ;;  %v3023_v8 = vld [vmem:[%s3117_s17 + $0x179] sm:$0xff] }
 0x1f5   : > { %v3766_v40 = vpop.permute.xlu1 %1666  ;;  %v3768_v55 = vpop.permute.xlu0 %1661 }
 0x1f6   : > { %5208 = vst [vmem:[#allocation128_spill] sm:$0xff] %v3766_v40  ;;  %5209 = vst [vmem:[#allocation129_spill] sm:$0xff] %v3768_v55  ;;  %2196 = vperm.xlu1 %3068, %v3020_v23   ;;  %2191 = vperm.xlu0 %3067, %v3019_v47   ;;  %v3026_v23 = vld [vmem:[%s3117_s17 + $0x191] sm:$0xff]  ;;  %v3025_v47 = vld [vmem:[%s3117_s17 + $0x189] sm:$0xff] }
 0x1f9   : > { %v3772_v24 = vpop.permute.xlu1 %1676  ;;  %v3774_v31 = vpop.permute.xlu0 %1671 }
 0x1fa   : > { %5210 = vst [vmem:[#allocation130_spill] sm:$0xff] %v3772_v24  ;;  %5211 = vst [vmem:[#allocation131_spill] sm:$0xff] %v3774_v31  ;;  %2206 = vperm.xlu1 %3068, %v3022_v15   ;;  %2201 = vperm.xlu0 %3067, %v3021_v32   ;;  %v3028_v15 = vld [vmem:[%s3117_s17 + $0x1a1] sm:$0xff]  ;;  %v3027_v32 = vld [vmem:[%s3117_s17 + $0x199] sm:$0xff] }
 0x1fd   : > { %v3778_v3 = vpop.permute.xlu1 %1686  ;;  %v3780_v40 = vpop.permute.xlu0 %1681 }
 0x1fe   : > { %5212 = vst [vmem:[#allocation132_spill] sm:$0xff] %v3778_v3  ;;  %5213 = vst [vmem:[#allocation133_spill] sm:$0xff] %v3780_v40  ;;  %2216 = vperm.xlu1 %3068, %v3024_v4   ;;  %2211 = vperm.xlu0 %3067, %v3023_v8   ;;  %v3030_v4 = vld [vmem:[%s3117_s17 + $0x1b1] sm:$0xff]  ;;  %v3029_v8 = vld [vmem:[%s3117_s17 + $0x1a9] sm:$0xff] }
 0x201   : > { %v3784_v55 = vpop.permute.xlu1 %1696  ;;  %v3786_v24 = vpop.permute.xlu0 %1691 }
 0x202   : > { %5214 = vst [vmem:[#allocation134_spill] sm:$0xff] %v3784_v55  ;;  %5215 = vst [vmem:[#allocation135_spill] sm:$0xff] %v3786_v24  ;;  %2226 = vperm.xlu1 %3068, %v3026_v23   ;;  %2221 = vperm.xlu0 %3067, %v3025_v47   ;;  %v3032_v23 = vld [vmem:[%s3117_s17 + $0x1c1] sm:$0xff]  ;;  %v3031_v47 = vld [vmem:[%s3117_s17 + $0x1b9] sm:$0xff] }
 0x205   : > { %v3790_v31 = vpop.permute.xlu1 %1706  ;;  %v3792_v3 = vpop.permute.xlu0 %1701 }
 0x206   : > { %5216 = vst [vmem:[#allocation136_spill] sm:$0xff] %v3790_v31  ;;  %5217 = vst [vmem:[#allocation137_spill] sm:$0xff] %v3792_v3  ;;  %2236 = vperm.xlu1 %3068, %v3028_v15   ;;  %2231 = vperm.xlu0 %3067, %v3027_v32   ;;  %v3034_v15 = vld [vmem:[%s3117_s17 + $0x1d1] sm:$0xff]  ;;  %v3033_v32 = vld [vmem:[%s3117_s17 + $0x1c9] sm:$0xff] }
 0x209   : > { %v3796_v40 = vpop.permute.xlu1 %1716  ;;  %v3798_v55 = vpop.permute.xlu0 %1711 }
 0x20a   : > { %5218 = vst [vmem:[#allocation138_spill] sm:$0xff] %v3796_v40  ;;  %5219 = vst [vmem:[#allocation139_spill] sm:$0xff] %v3798_v55  ;;  %2246 = vperm.xlu1 %3068, %v3030_v4   ;;  %2241 = vperm.xlu0 %3067, %v3029_v8   ;;  %v3036_v4 = vld [vmem:[%s3117_s17 + $0x1e1] sm:$0xff]  ;;  %v3035_v8 = vld [vmem:[%s3117_s17 + $0x1d9] sm:$0xff] }
 0x20d   : > { %v3802_v24 = vpop.permute.xlu1 %1726  ;;  %v3804_v31 = vpop.permute.xlu0 %1721 }
 0x20e   : > { %5220 = vst [vmem:[#allocation140_spill] sm:$0xff] %v3802_v24  ;;  %5221 = vst [vmem:[#allocation141_spill] sm:$0xff] %v3804_v31  ;;  %2256 = vperm.xlu1 %3068, %v3032_v23   ;;  %2251 = vperm.xlu0 %3067, %v3031_v47   ;;  %v3038_v23 = vld [vmem:[%s3117_s17 + $0x1f1] sm:$0xff]  ;;  %v3037_v47 = vld [vmem:[%s3117_s17 + $0x1e9] sm:$0xff] }
 0x211   : > { %v3808_v3 = vpop.permute.xlu1 %1736  ;;  %v3810_v40 = vpop.permute.xlu0 %1731 }
 0x212   : > { %5222 = vst [vmem:[#allocation142_spill] sm:$0xff] %v3808_v3  ;;  %5223 = vst [vmem:[#allocation143_spill] sm:$0xff] %v3810_v40  ;;  %2266 = vperm.xlu1 %3068, %v3034_v15   ;;  %2261 = vperm.xlu0 %3067, %v3033_v32   ;;  %v3040_v15 = vld [vmem:[%s3117_s17 + $0x201] sm:$0xff]  ;;  %v3039_v32 = vld [vmem:[%s3117_s17 + $0x1f9] sm:$0xff] }
 0x215   : > { %v3814_v55 = vpop.permute.xlu1 %1746  ;;  %v3816_v24 = vpop.permute.xlu0 %1741 }
 0x216   : > { %5224 = vst [vmem:[#allocation144_spill] sm:$0xff] %v3814_v55  ;;  %5225 = vst [vmem:[#allocation145_spill] sm:$0xff] %v3816_v24  ;;  %2276 = vperm.xlu1 %3068, %v3036_v4   ;;  %2271 = vperm.xlu0 %3067, %v3035_v8   ;;  %v3042_v4 = vld [vmem:[%s3117_s17 + $0x211] sm:$0xff]  ;;  %v3041_v8 = vld [vmem:[%s3117_s17 + $0x209] sm:$0xff] }
 0x219   : > { %v3820_v31 = vpop.permute.xlu1 %1756  ;;  %v3822_v3 = vpop.permute.xlu0 %1751 }
 0x21a   : > { %5226 = vst [vmem:[#allocation146_spill] sm:$0xff] %v3820_v31  ;;  %5227 = vst [vmem:[#allocation147_spill] sm:$0xff] %v3822_v3  ;;  %2286 = vperm.xlu1 %3068, %v3038_v23   ;;  %2281 = vperm.xlu0 %3067, %v3037_v47   ;;  %v3835_v31 = vld [vmem:[%s5073_s1 + $0x5] ss:$0 sm:$0xff] }
 0x21d   : > { %v3826_v40 = vpop.permute.xlu1 %1766  ;;  %v3828_v55 = vpop.permute.xlu0 %1761 }
 0x21e   : > { %5228 = vst [vmem:[#allocation148_spill] sm:$0xff] %v3826_v40  ;;  %5229 = vst [vmem:[#allocation149_spill] sm:$0xff] %v3828_v55  ;;  %2296 = vperm.xlu1 %3068, %v3040_v15   ;;  %2291 = vperm.xlu0 %3067, %v3039_v32   ;;  %v3044_v15 = vld [vmem:[%s3117_s17 + $0x221] sm:$0xff]  ;;  %v3043_v32 = vld [vmem:[%s3117_s17 + $0x219] sm:$0xff] }
 0x221   : > { %v1777_v23 = vpop.permute.xlu1 %1776  ;;  %v1772_v47 = vpop.permute.xlu0 %1771 }
 0x222   : > { %v1818_v3 = vmul.f32 %v3835_v31, %v1777_v23  ;;  %v1817_v24 = vmul.f32 %v3835_v31, %v1772_v47  ;;  %2306 = vperm.xlu1 %3068, %v3042_v4   ;;  %2301 = vperm.xlu0 %3067, %v3041_v8   ;;  %v3046_v4 = vld [vmem:[%s3117_s17 + $0x231] sm:$0xff]  ;;  %v3045_v23 = vld [vmem:[%s3117_s17 + $0x229] sm:$0xff] }
 0x224   : > { %v3842_v55 = vadd.f32 %v1818_v3, %v3731_v48  ;;  %v3845_v40 = vadd.f32 %v1817_v24, %v3734_v56  ;;  %v3048_v48 = vld [vmem:[%s3117_s17 + $0x241] sm:$0x7f]  ;;  %v3047_v3 = vld [vmem:[%s3117_s17 + $0x239] sm:$0xff] }
 0x225   : > { %v3847_v63 = vpop.permute.xlu1 %1896  ;;  %v3849_v39 = vpop.permute.xlu0 %1891 }
 0x226   : > { %5230 = vst [vmem:[#allocation150_spill] sm:$0xff] %v3847_v63  ;;  %5231 = vst [vmem:[#allocation151_spill] sm:$0xff] %v3849_v39  ;;  %2316 = vperm.xlu1 %3068, %v3044_v15   ;;  %2311 = vperm.xlu0 %3067, %v3043_v32   ;;  %v2414_v39 = vld [vmem:[%s3117_s17 + $0x1a] sm:$0xff]  ;;  %v2413_v15 = vld [vmem:[%s3117_s17 + $0x12] sm:$0xff]  ;;  %v384_v32 = vmul.f32 %v3384_v16, %v3183_v1  ;;  %v3883_v1 = vmul.f32 %v3384_v16, %v3197_v10 }
 0x227   : > { %v2416_v10 = vld [vmem:[%s3117_s17 + $0x2a] sm:$0xff]  ;;  %v2415_v63 = vld [vmem:[%s3117_s17 + $0x22] sm:$0xff] }
 0x229   : > { %v3853_v8 = vpop.permute.xlu1 %1906  ;;  %v3855_v47 = vpop.permute.xlu0 %1901 }
 0x22a   : > { %5232 = vst [vmem:[#allocation152_spill] sm:$0xff] %v3853_v8  ;;  %5233 = vst [vmem:[#allocation153_spill] sm:$0xff] %v3855_v47  ;;  %2326 = vperm.xlu1 %3068, %v3046_v4   ;;  %2321 = vperm.xlu0 %3067, %v3045_v23   ;;  %v382_v47 = vmul.f32 %v3384_v16, %v3185_v2  ;;  %v385_v4 = vmul.f32 %v3384_v16, %v3189_v5 }
 0x22b   : > { %v3887_v2 = vmul.f32 %v3384_v16, %v3201_v13  ;;  %v3891_v5 = vmul.f32 %v3384_v16, %v3203_v14  ;;  %v3909_v13 = vmul.f32 %v3384_v16, %v3215_v22  ;;  %v3913_v14 = vmul.f32 %v3384_v16, %v3219_v25 }
 0x22c   : > { %v3929_v22 = vmul.f32 %v3384_v16, %v3231_v33  ;;  %v3933_v25 = vmul.f32 %v3384_v16, %v3233_v34  ;;  %v3949_v33 = vmul.f32 %v3384_v16, %v3243_v41  ;;  %v3953_v34 = vmul.f32 %v3384_v16, %v3245_v42 }
 0x22d   : > { %v3859_v56 = vpop.permute.xlu1 %1916  ;;  %v3861_v24 = vpop.permute.xlu0 %1911  ;;  %v3965_v41 = vmul.f32 %v3384_v16, %v3249_v45  ;;  %v3973_v42 = vmul.f32 %v3384_v16, %v3255_v49  ;;  %v3983_v45 = vmul.f32 %v3384_v16, %v3261_v53  ;;  %v3991_v49 = vmul.f32 %v3384_v16, %v3267_v57 }
 0x22e   : > { %2336 = vperm.xlu1 %3068, %v3048_v48   ;;  %2331 = vperm.xlu0 %3067, %v3047_v3   ;;  %v383_v48 = vmul.f32 %v3384_v16, %v3191_v6  ;;  %v3879_v3 = vmul.f32 %v3384_v16, %v3195_v9  ;;  %v3895_v6 = vmul.f32 %v3384_v16, %v3207_v17 }
 0x22f   : > { %v3899_v9 = vmul.f32 %v3384_v16, %v3209_v18  ;;  %v3917_v17 = vmul.f32 %v3384_v16, %v3221_v26  ;;  %v3921_v18 = vmul.f32 %v3384_v16, %v3225_v29  ;;  %v3941_v29 = vmul.f32 %v3384_v16, %v3237_v37 }
 0x230   : > { %v663_v37 = vmul.f32 %v3391_v0, %v3287_v12  ;;  %v3979_v12 = vmul.f32 %v3384_v16, %v3257_v50  ;;  %v3999_v50 = vmul.f32 %v3384_v16, %v3269_v58  ;;  %v4003_v53 = vmul.f32 %v3384_v16, %v3273_v61  ;;  %v4018_v58 = vld [vmem:[%s5073_s1 + $0x1] ss:$0 sm:$0xff] }
 0x231   : > { %v3871_v23 = vpop.permute.xlu1 %1926  ;;  %v3873_v8 = vpop.permute.xlu0 %1921  ;;  %v668_v61 = vmul.f32 %v4018_v58, %v3297_v27  ;;  %v671_v27 = vmul.f32 %v4018_v58, %v3311_v44 }
 0x232   : > { %5234 = vst [vmem:[#allocation154_spill] sm:$0xff] %v3873_v8  ;;  %2456 = vperm.xlu1 %3068, %v2414_v39   ;;  %2451 = vperm.xlu0 %3067, %v2413_v15   ;;  %v3905_v39 = vmul.f32 %v3384_v16, %v3213_v21  ;;  %v3925_v21 = vmul.f32 %v3384_v16, %v3227_v30  ;;  %v2417_v8 = vld [vmem:[%s3117_s17 + $0x32] sm:$0xff] }
 0x233   : > { %v3945_v30 = vmul.f32 %v3384_v16, %v3239_v38  ;;  %v666_v38 = vmul.f32 %v3391_v0, %v3291_v19  ;;  %v4051_v44 = vadd.f32 %v668_v61, %v3879_v3 }
 0x235   : > { %v3935_v26 = vpop.permute.xlu1 %1936  ;;  %v3937_v15 = vpop.permute.xlu0 %1931 }
 0x236   : > { %5235 = vst [vmem:[#allocation155_spill] sm:$0xff] %v3935_v26  ;;  %5236 = vst [vmem:[#allocation156_spill] sm:$0xff] %v3937_v15  ;;  %2466 = vperm.xlu1 %3068, %v2416_v10   ;;  %2461 = vperm.xlu0 %3067, %v2415_v63   ;;  %v664_v15 = vmul.f32 %v3391_v0, %v3285_v11  ;;  %v2418_v26 = vld [vmem:[%s3117_s17 + $0x3a] sm:$0xff]  ;;  %v3969_v63 = vmul.f32 %v3384_v16, %v3251_v46 }
 0x237   : > { %v665_v11 = vmul.f32 %v3391_v0, %v3293_v20  ;;  %v3987_v46 = vmul.f32 %v3384_v16, %v3263_v54  ;;  %v4007_v54 = vmul.f32 %v3384_v16, %v3275_v62  ;;  %v4011_v0 = vadd.f32 %v663_v37, %v382_v47 }
 0x238   : > { %v4009_v57 = vadd.f32 %v664_v15, %v383_v48  ;;  %v4013_v10 = vadd.f32 %v666_v38, %v385_v4  ;;  %v667_v16 = vmul.f32 %v4018_v58, %v3299_v28  ;;  %v669_v47 = vmul.f32 %v4018_v58, %v3305_v36  ;;  %v5242_v15 = vld [vmem:[#allocation3_spill] sm:$0xff]  ;;  %v5243_v38 = vld [vmem:[#allocation4_spill] sm:$0xff] }
 0x239   : > { %v3993_v19 = vpop.permute.xlu1 %1946  ;;  %v3995_v20 = vpop.permute.xlu0 %1941  ;;  %v4024_v62 = vadd.f32 %v665_v11, %v384_v32  ;;  %v672_v4 = vmul.f32 %v4018_v58, %v3309_v43  ;;  %v674_v32 = vmul.f32 %v4018_v58, %v3315_v51  ;;  %v673_v28 = vmul.f32 %v4018_v58, %v3317_v52  ;;  %v5241_v51 = vld [vmem:[#allocation2_spill] sm:$0xff] }
 0x23a   : > { %5237 = vst [vmem:[#allocation157_spill] sm:$0xff] %v3993_v19  ;;  %5238 = vst [vmem:[#allocation158_spill] sm:$0xff] %v3995_v20  ;;  %2476 = vperm.xlu1 %3068, %v2418_v26   ;;  %2471 = vperm.xlu0 %3067, %v2417_v8   ;;  %v2420_v20 = vld [vmem:[%s3117_s17 + $0x4a] sm:$0xff]  ;;  %v2419_v19 = vld [vmem:[%s3117_s17 + $0x42] sm:$0xff]  ;;  %v670_v8 = vmul.f32 %v4018_v58, %v3303_v35  ;;  %v676_v36 = vmul.f32 %v4018_v58, %v3321_v59 }
 0x23b   : > { %v675_v43 = vmul.f32 %v4018_v58, %v3323_v60  ;;  %v678_v26 = vmul.f32 %v4018_v58, %v3327_v7  ;;  %v677_v52 = vmul.f32 %v4018_v58, %v5241_v51  ;;  %v680_v37 = vmul.f32 %v4018_v58, %v5242_v15  ;;  %v2422_v11 = vld [vmem:[%s3117_s17 + $0x5a] sm:$0xff]  ;;  %v5253_v15 = vld [vmem:[#allocation12_spill] sm:$0xff] }
 0x23c   : > { %v679_v59 = vmul.f32 %v4018_v58, %v5243_v38  ;;  %v4062_v60 = vadd.f32 %v667_v16, %v3883_v1  ;;  %v4065_v7 = vadd.f32 %v670_v8, %v3887_v2  ;;  %v4068_v3 = vadd.f32 %v669_v47, %v3891_v5 }
 0x23d   : > { %v4040_v48 = vpop.permute.xlu1 %1956  ;;  %v4042_v35 = vpop.permute.xlu0 %1951  ;;  %v4073_v61 = vadd.f32 %v672_v4, %v3895_v6  ;;  %v4076_v51 = vadd.f32 %v671_v27, %v3899_v9  ;;  %v4079_v1 = vadd.f32 %v674_v32, %v3905_v39  ;;  %v4082_v2 = vadd.f32 %v673_v28, %v3909_v13  ;;  %v5247_v4 = vld [vmem:[#allocation6_spill] sm:$0xff]  ;;  %v2424_v27 = vld [vmem:[%s3117_s17 + $0x6a] sm:$0xff] }
 0x23e   : > { %5239 = vst [vmem:[#allocation159_spill] sm:$0xff] %v4040_v48  ;;  %5240 = vst [vmem:[#allocation160_spill] sm:$0xff] %v4042_v35  ;;  %2486 = vperm.xlu1 %3068, %v2420_v20   ;;  %2481 = vperm.xlu0 %3067, %v2419_v19   ;;  %v2421_v35 = vld [vmem:[%s3117_s17 + $0x52] sm:$0xff]  ;;  %v4089_v8 = vadd.f32 %v676_v36, %v3913_v14  ;;  %v4092_v6 = vadd.f32 %v675_v43, %v3917_v17  ;;  %v2423_v17 = vld [vmem:[%s3117_s17 + $0x62] sm:$0xff] }
 0x23f   : > { %v5244_v19 = vld [vmem:[#allocation5_spill] sm:$0xff]  ;;  %v4095_v47 = vadd.f32 %v678_v26, %v3921_v18  ;;  %v4098_v9 = vadd.f32 %v677_v52, %v3925_v21  ;;  %v4101_v39 = vadd.f32 %v680_v37, %v3929_v22  ;;  %v4104_v13 = vadd.f32 %v679_v59, %v3933_v25  ;;  %v5248_v18 = vld [vmem:[#allocation7_spill] sm:$0xff]  ;;  %v5251_v43 = vld [vmem:[#allocation10_spill] sm:$0xff] }
 0x240   : > { %v682_v20 = vmul.f32 %v4018_v58, %v5244_v19  ;;  %v681_v14 = vmul.f32 %v4018_v58, %v5247_v4  ;;  %v684_v28 = vmul.f32 %v4018_v58, %v5248_v18  ;;  %v5250_v36 = vld [vmem:[#allocation9_spill] sm:$0xff]  ;;  %v685_v25 = vmul.f32 %v4018_v58, %v5251_v43  ;;  %v5252_v26 = vld [vmem:[#allocation11_spill] sm:$0xff]  ;;  %v5257_v19 = vld [vmem:[#allocation14_spill] sm:$0xff] }
 0x241   : > { %v4084_v16 = vpop.permute.xlu1 %1966  ;;  %v4086_v5 = vpop.permute.xlu0 %1961  ;;  %v686_v22 = vmul.f32 %v4018_v58, %v5250_v36  ;;  %v688_v52 = vmul.f32 %v4018_v58, %v5252_v26  ;;  %v5254_v37 = vld [vmem:[#allocation13_spill] sm:$0xff]  ;;  %v5258_v4 = vld [vmem:[#allocation15_spill] sm:$0xff] }
 0x242   : > { %5245 = vst [vmem:[#allocation2_spill] sm:$0xff] %v4084_v16  ;;  %5246 = vst [vmem:[#allocation3_spill] sm:$0xff] %v4086_v5  ;;  %2496 = vperm.xlu1 %3068, %v2422_v11   ;;  %2491 = vperm.xlu0 %3067, %v2421_v35   ;;  %v4111_v32 = vadd.f32 %v682_v20, %v3941_v29  ;;  %v5249_v35 = vld [vmem:[#allocation8_spill] sm:$0xff]  ;;  %v687_v29 = vmul.f32 %v4018_v58, %v5253_v15  ;;  %v5260_v26 = vld [vmem:[#allocation17_spill] sm:$0xff] }
 0x243   : > { %v683_v21 = vmul.f32 %v4018_v58, %v5249_v35  ;;  %v690_v38 = vmul.f32 %v4018_v58, %v5254_v37  ;;  %v689_v20 = vmul.f32 %v4018_v58, %v5257_v19  ;;  %v692_v18 = vmul.f32 %v4018_v58, %v5258_v4  ;;  %v5259_v35 = vld [vmem:[#allocation16_spill] sm:$0xff]  ;;  %v5261_v37 = vld [vmem:[#allocation18_spill] sm:$0xff]  ;;  %v5263_v5 = vld [vmem:[#allocation51_spill] sm:$0xff] }
 0x244   : > { %v691_v36 = vmul.f32 %v4018_v58, %v5259_v35  ;;  %v4138_v43 = vadd.f32 %v681_v14, %v3945_v30  ;;  %v694_v15 = vmul.f32 %v4018_v58, %v5260_v26  ;;  %v2426_v16 = vld [vmem:[%s3117_s17 + $0x7a] sm:$0xff]  ;;  %v2425_v48 = vld [vmem:[%s3117_s17 + $0x72] sm:$0xff]  ;;  %v4149_v4 = vadd.f32 %v684_v28, %v3949_v33  ;;  %v5273_v35 = vld [vmem:[#allocation27_spill] sm:$0xff] }
 0x245   : > { %v4127_v59 = vpop.permute.xlu1 %1976  ;;  %v4129_v11 = vpop.permute.xlu0 %1971  ;;  %v4155_v30 = vadd.f32 %v686_v22, %v3965_v41  ;;  %v5264_v14 = vld [vmem:[#allocation20_spill] sm:$0xff]  ;;  %v4166_v33 = vadd.f32 %v687_v29, %v3979_v12 }
 0x246   : > { %5255 = vst [vmem:[#allocation4_spill] sm:$0xff] %v4127_v59  ;;  %5256 = vst [vmem:[#allocation5_spill] sm:$0xff] %v4129_v11  ;;  %2506 = vperm.xlu1 %3068, %v2424_v27   ;;  %2501 = vperm.xlu0 %3067, %v2423_v17   ;;  %v693_v11 = vmul.f32 %v4018_v58, %v5261_v37  ;;  %v5262_v59 = vld [vmem:[#allocation19_spill] sm:$0xff]  ;;  %v4152_v27 = vadd.f32 %v683_v21, %v3953_v34 }
 0x247   : > { %v944_v19 = vmul.f32 %v5263_v5, %v5262_v59  ;;  %v943_v17 = vmul.f32 %v5263_v5, %v5264_v14  ;;  %v4160_v58 = vadd.f32 %v685_v25, %v3969_v63  ;;  %v4163_v59 = vadd.f32 %v688_v52, %v3973_v42  ;;  %v5266_v25 = vld [vmem:[#allocation21_spill] sm:$0xff]  ;;  %v2428_v52 = vld [vmem:[%s3117_s17 + $0x8a] sm:$0xff] }
 0x248   : > { %v4169_v34 = vadd.f32 %v690_v38, %v3983_v45  ;;  %v4176_v21 = vadd.f32 %v689_v20, %v3987_v46  ;;  %v4179_v63 = vadd.f32 %v692_v18, %v3991_v49  ;;  %v4182_v22 = vadd.f32 %v691_v36, %v3999_v50  ;;  %v2427_v49 = vld [vmem:[%s3117_s17 + $0x82] sm:$0xff]  ;;  %v5270_v38 = vld [vmem:[#allocation24_spill] sm:$0xff] }
 0x249   : > { %v4171_v28 = vpop.permute.xlu1 %1986  ;;  %v4173_v41 = vpop.permute.xlu0 %1981  ;;  %v4185_v42 = vadd.f32 %v694_v15, %v4003_v53  ;;  %v4188_v12 = vadd.f32 %v693_v11, %v4007_v54  ;;  %v4191_v45 = vadd.f32 %v944_v19, %v4009_v57  ;;  %v946_v46 = vmul.f32 %v5263_v5, %v5266_v25  ;;  %v5268_v50 = vld [vmem:[#allocation22_spill] sm:$0xff]  ;;  %v5271_v11 = vld [vmem:[#allocation25_spill] sm:$0xff]  ;;  %v5274_v36 = vld [vmem:[#allocation28_spill] sm:$0xff] }
 0x24a   : > { %2516 = vperm.xlu1 %3068, %v2426_v16   ;;  %2511 = vperm.xlu0 %3067, %v2425_v48   ;;  %v4198_v29 = vadd.f32 %v943_v17, %v4011_v0  ;;  %v945_v48 = vmul.f32 %v5263_v5, %v5268_v50  ;;  %v5269_v16 = vld [vmem:[#allocation23_spill] sm:$0xff]  ;;  %v947_v54 = vmul.f32 %v5263_v5, %v5270_v38  ;;  %v5272_v20 = vld [vmem:[#allocation26_spill] sm:$0xff]  ;;  %v5276_v19 = vld [vmem:[#allocation29_spill] sm:$0xff] }
 0x24b   : > { %5265 = vst [vmem:[#allocation6_spill] sm:$0xff] %v4191_v45  ;;  %v948_v53 = vmul.f32 %v5263_v5, %v5269_v16  ;;  %v950_v57 = vmul.f32 %v5263_v5, %v5271_v11  ;;  %v949_v18 = vmul.f32 %v5263_v5, %v5272_v20  ;;  %v952_v0 = vmul.f32 %v5263_v5, %v5273_v35  ;;  %v5277_v17 = vld [vmem:[#allocation30_spill] sm:$0xff]  ;;  %v5278_v50 = vld [vmem:[#allocation31_spill] sm:$0xff]  ;;  %v5280_v11 = vld [vmem:[#allocation32_spill] sm:$0xff] }
 0x24c   : > { %5267 = vst [vmem:[#allocation7_spill] sm:$0xff] %v4198_v29  ;;  %v951_v26 = vmul.f32 %v5263_v5, %v5274_v36  ;;  %v954_v14 = vmul.f32 %v5263_v5, %v5276_v19  ;;  %v953_v25 = vmul.f32 %v5263_v5, %v5277_v17  ;;  %v956_v16 = vmul.f32 %v5263_v5, %v5278_v50  ;;  %v5281_v35 = vld [vmem:[#allocation33_spill] sm:$0xff]  ;;  %v5282_v29 = vld [vmem:[#allocation34_spill] sm:$0xff] }
 0x24d   : > { %v4214_v15 = vpop.permute.xlu1 %1996  ;;  %v4216_v37 = vpop.permute.xlu0 %1991  ;;  %v4225_v38 = vadd.f32 %v946_v46, %v4013_v10  ;;  %v955_v20 = vmul.f32 %v5263_v5, %v5280_v11  ;;  %v958_v36 = vmul.f32 %v5263_v5, %v5281_v35  ;;  %v957_v19 = vmul.f32 %v5263_v5, %v5282_v29  ;;  %v2430_v45 = vld [vmem:[%s3117_s17 + $0x9a] sm:$0xff]  ;;  %v3070_v46 = vld [vmem:[%s5073_s1 + $0x2] ss:$0 sm:$0xff]  ;;  %v5294_v35 = vld [vmem:[#allocation43_spill] sm:$0xff] }
 0x24e   : > { %5275 = vst [vmem:[#allocation8_spill] sm:$0xff] %v4216_v37  ;;  %2526 = vperm.xlu1 %3068, %v2428_v52   ;;  %2521 = vperm.xlu0 %3067, %v2427_v49   ;;  %v2429_v37 = vld [vmem:[%s3117_s17 + $0x92] sm:$0xff]  ;;  %v4236_v17 = vadd.f32 %v945_v48, %v4024_v62  ;;  %v4239_v52 = vadd.f32 %v948_v53, %v4051_v44  ;;  %v5284_v49 = vld [vmem:[#allocation35_spill] sm:$0xff]  ;;  %v5293_v11 = vld [vmem:[#allocation42_spill] sm:$0xff] }
 0x24f   : > { %5279 = vst [vmem:[#allocation9_spill] sm:$0xff] %v4225_v38  ;;  %v4242_v10 = vadd.f32 %v947_v54, %v4062_v60  ;;  %v960_v50 = vmul.f32 %v3070_v46, %v5284_v49  ;;  %v4249_v5 = vadd.f32 %v950_v57, %v4065_v7  ;;  %v4252_v62 = vadd.f32 %v949_v18, %v4068_v3  ;;  %v5287_v57 = vld [vmem:[#allocation36_spill] sm:$0xff] }
 0x250   : > { %5283 = vst [vmem:[#allocation10_spill] sm:$0xff] %v4236_v17  ;;  %v4255_v44 = vadd.f32 %v952_v0, %v4073_v61  ;;  %v4258_v60 = vadd.f32 %v951_v26, %v4076_v51  ;;  %v4265_v53 = vadd.f32 %v954_v14, %v4079_v1  ;;  %v4268_v7 = vadd.f32 %v953_v25, %v4082_v2  ;;  %v2432_v18 = vld [vmem:[%s3117_s17 + $0xaa] sm:$0xff]  ;;  %v2431_v0 = vld [vmem:[%s3117_s17 + $0xa2] sm:$0xff] }
 0x251   : > { %v4260_v29 = vpop.permute.xlu1 %2006  ;;  %v4262_v48 = vpop.permute.xlu0 %2001  ;;  %v4271_v54 = vadd.f32 %v956_v16, %v4089_v8  ;;  %v4274_v3 = vadd.f32 %v955_v20, %v4092_v6  ;;  %v4277_v61 = vadd.f32 %v958_v36, %v4095_v47  ;;  %v4280_v51 = vadd.f32 %v957_v19, %v4098_v9  ;;  %v5288_v8 = vld [vmem:[#allocation37_spill] sm:$0xff]  ;;  %v5290_v14 = vld [vmem:[#allocation39_spill] sm:$0xff]  ;;  %v5291_v25 = vld [vmem:[#allocation40_spill] sm:$0xff] }
 0x252   : > { %5285 = vst [vmem:[#allocation11_spill] sm:$0xff] %v4260_v29  ;;  %5286 = vst [vmem:[#allocation12_spill] sm:$0xff] %v4262_v48  ;;  %2536 = vperm.xlu1 %3068, %v2430_v45   ;;  %2531 = vperm.xlu0 %3067, %v2429_v37   ;;  %v959_v1 = vmul.f32 %v3070_v46, %v5287_v57  ;;  %v4286_v2 = vadd.f32 %v960_v50, %v4101_v39  ;;  %v5289_v45 = vld [vmem:[#allocation38_spill] sm:$0xff]  ;;  %v5292_v16 = vld [vmem:[#allocation41_spill] sm:$0xff] }
 0x253   : > { %v962_v26 = vmul.f32 %v3070_v46, %v5288_v8  ;;  %v961_v37 = vmul.f32 %v3070_v46, %v5289_v45  ;;  %v964_v6 = vmul.f32 %v3070_v46, %v5290_v14  ;;  %v963_v47 = vmul.f32 %v3070_v46, %v5291_v25  ;;  %v5297_v49 = vld [vmem:[#allocation44_spill] sm:$0xff]  ;;  %v5298_v57 = vld [vmem:[#allocation45_spill] sm:$0xff]  ;;  %v5299_v45 = vld [vmem:[#allocation46_spill] sm:$0xff] }
 0x254   : > { %v966_v9 = vmul.f32 %v3070_v46, %v5292_v16  ;;  %v965_v20 = vmul.f32 %v3070_v46, %v5293_v11  ;;  %v968_v36 = vmul.f32 %v3070_v46, %v5294_v35  ;;  %v967_v50 = vmul.f32 %v3070_v46, %v5297_v49  ;;  %v5300_v16 = vld [vmem:[#allocation47_spill] sm:$0xff]  ;;  %v5301_v11 = vld [vmem:[#allocation48_spill] sm:$0xff]  ;;  %v5302_v35 = vld [vmem:[#allocation49_spill] sm:$0xff] }
 0x255   : > { %v4295_v19 = vpop.permute.xlu1 %2016  ;;  %v4297_v39 = vpop.permute.xlu0 %2011  ;;  %v970_v8 = vmul.f32 %v3070_v46, %v5298_v57  ;;  %v969_v14 = vmul.f32 %v3070_v46, %v5299_v45  ;;  %v4303_v25 = vadd.f32 %v959_v1, %v4104_v13  ;;  %v972_v17 = vmul.f32 %v3070_v46, %v5300_v16  ;;  %v2433_v29 = vld [vmem:[%s3117_s17 + $0xb2] sm:$0xff] }
 0x256   : > { %5295 = vst [vmem:[#allocation13_spill] sm:$0xff] %v4295_v19  ;;  %5296 = vst [vmem:[#allocation14_spill] sm:$0xff] %v4297_v39  ;;  %2546 = vperm.xlu1 %3068, %v2432_v18   ;;  %2541 = vperm.xlu0 %3067, %v2431_v0   ;;  %v971_v38 = vmul.f32 %v3070_v46, %v5301_v11  ;;  %v974_v48 = vmul.f32 %v3070_v46, %v5302_v35  ;;  %v2434_v19 = vld [vmem:[%s3117_s17 + $0xba] sm:$0xff]  ;;  %v5320_v11 = vld [vmem:[#allocation60_spill] sm:$0xff] }
 0x257   : > { %v4311_v39 = vadd.f32 %v962_v26, %v4111_v32  ;;  %v4314_v49 = vadd.f32 %v961_v37, %v4138_v43  ;;  %v4317_v18 = vadd.f32 %v964_v6, %v4149_v4  ;;  %v5303_v0 = vld [vmem:[#allocation50_spill] sm:$0xff]  ;;  %v4321_v1 = vadd.f32 %v963_v47, %v4152_v27  ;;  %v5305_v37 = vld [vmem:[#allocation56_spill] sm:$0xff] }
 0x258   : > { %v973_v13 = vmul.f32 %v3070_v46, %v5303_v0  ;;  %v4324_v57 = vadd.f32 %v966_v9, %v4155_v30  ;;  %v4327_v45 = vadd.f32 %v965_v20, %v4160_v58  ;;  %v4330_v32 = vadd.f32 %v968_v36, %v4163_v59  ;;  %v2436_v47 = vld [vmem:[%s3117_s17 + $0xca] sm:$0xff]  ;;  %v5316_v20 = vld [vmem:[#allocation57_spill] sm:$0xff]  ;;  %v5317_v36 = vld [vmem:[#allocation58_spill] sm:$0xff] }
 0x259   : > { %v4332_v43 = vpop.permute.xlu1 %2026  ;;  %v4334_v4 = vpop.permute.xlu0 %2021  ;;  %v4337_v46 = vadd.f32 %v967_v50, %v4166_v33  ;;  %v4340_v27 = vadd.f32 %v970_v8, %v4169_v34  ;;  %v4343_v26 = vadd.f32 %v969_v14, %v4176_v21  ;;  %v4346_v30 = vadd.f32 %v972_v17, %v4179_v63  ;;  %v5306_v33 = vld [vmem:[#allocation84_spill] sm:$0xff]  ;;  %v2435_v34 = vld [vmem:[%s3117_s17 + $0xc2] sm:$0xff]  ;;  %v5310_v63 = vld [vmem:[#allocation53_spill] sm:$0xff] }
 0x25a   : > { %2556 = vperm.xlu1 %3068, %v2434_v19   ;;  %2551 = vperm.xlu0 %3067, %v2433_v29   ;;  %v4349_v58 = vadd.f32 %v971_v38, %v4182_v22  ;;  %v4352_v59 = vadd.f32 %v974_v48, %v4185_v42  ;;  %v1229_v6 = vmul.f32 %v5306_v33, %v5305_v37  ;;  %v5308_v21 = vld [vmem:[#allocation52_spill] sm:$0xff]  ;;  %v5312_v22 = vld [vmem:[#allocation54_spill] sm:$0xff]  ;;  %v5314_v38 = vld [vmem:[#allocation55_spill] sm:$0xff] }
 0x25b   : > { %v4359_v9 = vadd.f32 %v973_v13, %v4188_v12  ;;  %v4363_v29 = vmul.f32 %v5306_v33, %v5308_v21  ;;  %v4367_v17 = vmul.f32 %v5306_v33, %v5310_v63  ;;  %v4371_v42 = vmul.f32 %v5306_v33, %v5312_v22  ;;  %v5318_v50 = vld [vmem:[#allocation59_spill] sm:$0xff]  ;;  %v5321_v0 = vld [vmem:[#allocation61_spill] sm:$0xff]  ;;  %v5322_v37 = vld [vmem:[#allocation62_spill] sm:$0xff] }
 0x25c   : > { %5304 = vst [vmem:[#allocation15_spill] sm:$0xff] %v4352_v59  ;;  %v4375_v48 = vmul.f32 %v5306_v33, %v5314_v38  ;;  %v1228_v12 = vmul.f32 %v5306_v33, %v5316_v20  ;;  %v1231_v19 = vmul.f32 %v5306_v33, %v5317_v36  ;;  %v1230_v8 = vmul.f32 %v5306_v33, %v5318_v50  ;;  %v5323_v22 = vld [vmem:[#allocation63_spill] sm:$0xff]  ;;  %v5324_v20 = vld [vmem:[#allocation64_spill] sm:$0xff]  ;;  %v5325_v50 = vld [vmem:[#allocation65_spill] sm:$0xff] }
 0x25d   : > { %5307 = vst [vmem:[#allocation16_spill] sm:$0xff] %v4359_v9  ;;  %5309 = vst [vmem:[#allocation17_spill] sm:$0xff] %v4363_v29  ;;  %v4383_v14 = vpop.permute.xlu1 %2036  ;;  %v4385_v16 = vpop.permute.xlu0 %2031  ;;  %v1233_v35 = vmul.f32 %v5306_v33, %v5320_v11  ;;  %v1232_v13 = vmul.f32 %v5306_v33, %v5321_v0  ;;  %v1235_v21 = vmul.f32 %v5306_v33, %v5322_v37  ;;  %v5326_v0 = vld [vmem:[#allocation66_spill] sm:$0xff]  ;;  %v5327_v37 = vld [vmem:[#allocation67_spill] sm:$0xff] }
 0x25e   : > { %5311 = vst [vmem:[#allocation18_spill] sm:$0xff] %v4367_v17  ;;  %5313 = vst [vmem:[#allocation19_spill] sm:$0xff] %v4371_v42  ;;  %2566 = vperm.xlu1 %3068, %v2436_v47   ;;  %2561 = vperm.xlu0 %3067, %v2435_v34   ;;  %v4394_v63 = vadd.f32 %v1229_v6, %v4239_v52  ;;  %v1234_v38 = vmul.f32 %v5306_v33, %v5323_v22  ;;  %v2437_v42 = vld [vmem:[%s3117_s17 + $0xd2] sm:$0xff] }
 0x25f   : > { %5315 = vst [vmem:[#allocation51_spill] sm:$0xff] %v4375_v48  ;;  %5319 = vst [vmem:[#allocation20_spill] sm:$0xff] %v4385_v16  ;;  %v1237_v36 = vmul.f32 %v5306_v33, %v5324_v20  ;;  %v1236_v11 = vmul.f32 %v5306_v33, %v5325_v50  ;;  %v2438_v48 = vld [vmem:[%s3117_s17 + $0xda] sm:$0xff]  ;;  %v1239_v17 = vmul.f32 %v5306_v33, %v5326_v0  ;;  %v5328_v34 = vld [vmem:[#allocation68_spill] sm:$0xff] }
 0x260   : > { %v1238_v47 = vmul.f32 %v5306_v33, %v5327_v37  ;;  %v1241_v52 = vmul.f32 %v5306_v33, %v5328_v34  ;;  %v5329_v6 = vld [vmem:[#allocation69_spill] sm:$0xff]  ;;  %v4413_v20 = vadd.f32 %v1228_v12, %v4242_v10  ;;  %v4416_v50 = vadd.f32 %v1231_v19, %v4249_v5  ;;  %v5330_v0 = vld [vmem:[#allocation70_spill] sm:$0xff] }
 0x261   : > { %v1240_v22 = vmul.f32 %v5306_v33, %v5329_v6  ;;  %v4419_v29 = vadd.f32 %v1230_v8, %v4252_v62  ;;  %v1243_v37 = vmul.f32 %v5306_v33, %v5330_v0  ;;  %v4423_v9 = vpop.permute.xlu1 %2046  ;;  %v4425_v34 = vpop.permute.xlu0 %2041  ;;  %v4428_v6 = vadd.f32 %v1233_v35, %v4255_v44  ;;  %v5333_v8 = vld [vmem:[#allocation71_spill] sm:$0xff]  ;;  %v5343_v16 = vld [vmem:[#allocation117_spill] sm:$0xff] }
 0x262   : > { %5331 = vst [vmem:[#allocation21_spill] sm:$0xff] %v4423_v9  ;;  %5332 = vst [vmem:[#allocation22_spill] sm:$0xff] %v4425_v34  ;;  %v4431_v10 = vadd.f32 %v1232_v13, %v4258_v60  ;;  %v4434_v12 = vadd.f32 %v1235_v21, %v4265_v53  ;;  %2576 = vperm.xlu1 %3068, %v2438_v48   ;;  %2571 = vperm.xlu0 %3067, %v2437_v42   ;;  %v2440_v35 = vld [vmem:[%s3117_s17 + $0xea] sm:$0xff]  ;;  %v2439_v60 = vld [vmem:[%s3117_s17 + $0xe2] sm:$0xff] }
 0x263   : > { %v4437_v5 = vadd.f32 %v1234_v38, %v4268_v7  ;;  %v4440_v62 = vadd.f32 %v1237_v36, %v4271_v54  ;;  %v4443_v19 = vadd.f32 %v1236_v11, %v4274_v3  ;;  %v1242_v44 = vmul.f32 %v5306_v33, %v5333_v8  ;;  %v3071_v33 = vld [vmem:[%s5073_s1 + $0x3] ss:$0 sm:$0xff]  ;;  %v5334_v42 = vld [vmem:[#allocation72_spill] sm:$0xff]  ;;  %v5337_v38 = vld [vmem:[#allocation75_spill] sm:$0xff] }
 0x264   : > { %v4450_v13 = vadd.f32 %v1239_v17, %v4277_v61  ;;  %v4453_v53 = vadd.f32 %v1238_v47, %v4280_v51  ;;  %v4456_v7 = vadd.f32 %v1241_v52, %v4286_v2  ;;  %v4459_v54 = vadd.f32 %v1240_v22, %v4303_v25  ;;  %v5335_v17 = vld [vmem:[#allocation73_spill] sm:$0xff]  ;;  %v5336_v48 = vld [vmem:[#allocation74_spill] sm:$0xff]  ;;  %v5338_v22 = vld [vmem:[#allocation76_spill] sm:$0xff] }
 0x265   : > { %v4462_v3 = vadd.f32 %v1243_v37, %v4311_v39  ;;  %v1245_v61 = vmul.f32 %v3071_v33, %v5334_v42  ;;  %v1244_v51 = vmul.f32 %v3071_v33, %v5335_v17  ;;  %v1247_v21 = vmul.f32 %v3071_v33, %v5336_v48  ;;  %v4473_v2 = vld [vmem:[%s5073_s1 + $0x6] ss:$0 sm:$0xff]  ;;  %v2057_v25 = vpop.permute.xlu1 %2056  ;;  %v2052_v39 = vpop.permute.xlu0 %2051  ;;  %v5339_v37 = vld [vmem:[#allocation77_spill] sm:$0xff]  ;;  %v5341_v9 = vld [vmem:[#allocation79_spill] sm:$0xff] }
 0x266   : > { %v1246_v36 = vmul.f32 %v3071_v33, %v5337_v38  ;;  %v2098_v11 = vmul.f32 %v4473_v2, %v2057_v25  ;;  %v2097_v47 = vmul.f32 %v4473_v2, %v2052_v39  ;;  %2586 = vperm.xlu1 %3068, %v2440_v35   ;;  %2581 = vperm.xlu0 %3067, %v2439_v60   ;;  %v5340_v42 = vld [vmem:[#allocation78_spill] sm:$0xff]  ;;  %v2441_v34 = vld [vmem:[%s3117_s17 + $0xf2] sm:$0xff] }
 0x267   : > { %v4479_v52 = vadd.f32 %v1242_v44, %v4314_v49  ;;  %v1249_v0 = vmul.f32 %v3071_v33, %v5338_v22  ;;  %v1248_v8 = vmul.f32 %v3071_v33, %v5339_v37  ;;  %v1251_v17 = vmul.f32 %v3071_v33, %v5340_v42  ;;  %v2442_v48 = vld [vmem:[%s3117_s17 + $0xfa] sm:$0xff]  ;;  %v5349_v42 = vld [vmem:[#allocation123_spill] sm:$0xff] }
 0x268   : > { %v1250_v59 = vmul.f32 %v3071_v33, %v5341_v9  ;;  %v5342_v38 = vld [vmem:[#allocation89_spill] sm:$0xff]  ;;  %v4490_v39 = vadd.f32 %v2098_v11, %v3842_v55  ;;  %v4493_v35 = vadd.f32 %v2097_v47, %v3845_v40  ;;  %v4496_v49 = vadd.f32 %v1245_v61, %v4317_v18  ;;  %v5345_v9 = vld [vmem:[#allocation90_spill] sm:$0xff]  ;;  %v5346_v11 = vld [vmem:[#allocation80_spill] sm:$0xff] }
 0x269   : > { %v1510_v25 = vmul.f32 %v5343_v16, %v5342_v38  ;;  %v4499_v44 = vadd.f32 %v1244_v51, %v4321_v1  ;;  %v4502_v60 = vadd.f32 %v1247_v21, %v4324_v57  ;;  %v1509_v22 = vmul.f32 %v5343_v16, %v5345_v9  ;;  %v4506_v37 = vpop.permute.xlu1 %2176  ;;  %v4508_v55 = vpop.permute.xlu0 %2171  ;;  %v5347_v61 = vld [vmem:[#allocation81_spill] sm:$0xff]  ;;  %v5348_v51 = vld [vmem:[#allocation122_spill] sm:$0xff] }
 0x26a   : > { %5344 = vst [vmem:[#allocation23_spill] sm:$0xff] %v4493_v35  ;;  %v4511_v40 = vadd.f32 %v1246_v36, %v4327_v45  ;;  %v1253_v18 = vmul.f32 %v3071_v33, %v5346_v11  ;;  %v1252_v47 = vmul.f32 %v3071_v33, %v5347_v61  ;;  %2596 = vperm.xlu1 %3068, %v2442_v48   ;;  %v2444_v45 = vld [vmem:[%s3117_s17 + $0x10a] sm:$0xff]  ;;  %v2443_v36 = vld [vmem:[%s3117_s17 + $0x102] sm:$0xff] }
 0x26b   : > { %2591 = vperm.xlu0 %3067, %v2441_v34   ;;  %v4516_v1 = vadd.f32 %v1249_v0, %v4330_v32  ;;  %v4519_v57 = vadd.f32 %v1248_v8, %v4337_v46  ;;  %v1790_v21 = vmul.f32 %v3835_v31, %v5348_v51  ;;  %v1789_v38 = vmul.f32 %v3835_v31, %v5349_v42  ;;  %v5350_v34 = vld [vmem:[#allocation91_spill] sm:$0xff]  ;;  %v5351_v8 = vld [vmem:[#allocation92_spill] sm:$0xff]  ;;  %v5356_v51 = vld [vmem:[#allocation94_spill] sm:$0xff] }
 0x26c   : > { %v4528_v9 = vadd.f32 %v1251_v17, %v4340_v27  ;;  %v4531_v48 = vadd.f32 %v1250_v59, %v4343_v26  ;;  %v1544_v32 = vadd.f32 %v1510_v25, %v4394_v63  ;;  %v1512_v46 = vmul.f32 %v5343_v16, %v5350_v34 }
 0x26d   : > { %v1543_v0 = vadd.f32 %v1509_v22, %v4413_v20  ;;  %v1511_v11 = vmul.f32 %v5343_v16, %v5351_v8  ;;  %v2070_v61 = vmul.f32 %v4473_v2, %v3859_v56  ;;  %v2069_v27 = vmul.f32 %v4473_v2, %v3861_v24  ;;  %v4543_v26 = vpop.permute.xlu1 %2186  ;;  %v4545_v59 = vpop.permute.xlu0 %2181  ;;  %v5354_v20 = vld [vmem:[#allocation82_spill] sm:$0xff]  ;;  %v5355_v22 = vld [vmem:[#allocation93_spill] sm:$0xff] }
 0x26e   : > { %5352 = vst [vmem:[#allocation24_spill] sm:$0xff] %v4543_v26  ;;  %5353 = vst [vmem:[#allocation25_spill] sm:$0xff] %v4545_v59  ;;  %v4548_v63 = vadd.f32 %v1253_v18, %v4346_v30  ;;  %v4551_v17 = vadd.f32 %v1252_v47, %v4349_v58  ;;  %v4554_v25 = vmul.f32 %v3071_v33, %v5354_v20  ;;  %2606 = vperm.xlu1 %3068, %v2444_v45   ;;  %v2446_v8 = vld [vmem:[%s3117_s17 + $0x11a] sm:$0x7f]  ;;  %v2445_v59 = vld [vmem:[%s3117_s17 + $0x112] sm:$0xff] }
 0x26f   : > { %2601 = vperm.xlu0 %3067, %v2443_v36   ;;  %v1514_v56 = vmul.f32 %v5343_v16, %v5355_v22  ;;  %v1513_v24 = vmul.f32 %v5343_v16, %v5356_v51  ;;  %v1824_v42 = vadd.f32 %v1790_v21, %v1544_v32  ;;  %v1823_v34 = vadd.f32 %v1789_v38, %v1543_v0  ;;  %v5357_v30 = vld [vmem:[#allocation83_spill] sm:$0xff]  ;;  %v5358_v47 = vld [vmem:[#allocation124_spill] sm:$0xff]  ;;  %v5359_v45 = vld [vmem:[#allocation125_spill] sm:$0xff] }
 0x270   : > { %v4563_v18 = vmul.f32 %v3071_v33, %v5357_v30  ;;  %v1546_v58 = vadd.f32 %v1512_v46, %v4416_v50  ;;  %v1792_v20 = vmul.f32 %v3835_v31, %v5358_v47  ;;  %v1791_v36 = vmul.f32 %v3835_v31, %v5359_v45  ;;  %v4576_v33 = vld [vmem:[%s5073_s1 + $0x7] ss:$0 sm:$0xff] }
 0x271   : > { %v1545_v22 = vadd.f32 %v1511_v11, %v4419_v29  ;;  %v2104_v26 = vadd.f32 %v2070_v61, %v1824_v42  ;;  %v2103_v35 = vadd.f32 %v2069_v27, %v1823_v34  ;;  %v2072_v21 = vmul.f32 %v4473_v2, %v3871_v23  ;;  %v2197_v38 = vpop.permute.xlu1 %2196  ;;  %v2192_v50 = vpop.permute.xlu0 %2191  ;;  %v5360_v32 = vld [vmem:[#allocation154_spill] sm:$0xff]  ;;  %v5362_v27 = vld [vmem:[#allocation127_spill] sm:$0xff] }
 0x272   : > { %v2071_v46 = vmul.f32 %v4473_v2, %v5360_v32  ;;  %v2350_v0 = vmul.f32 %v4576_v33, %v2197_v38  ;;  %v2349_v51 = vmul.f32 %v4576_v33, %v2192_v50  ;;  %2616 = vperm.xlu1 %3068, %v2446_v8   ;;  %v1548_v29 = vadd.f32 %v1514_v56, %v4428_v6  ;;  %v5361_v11 = vld [vmem:[#allocation126_spill] sm:$0xff]  ;;  %v5364_v38 = vld [vmem:[#allocation95_spill] sm:$0xff] }
 0x273   : > { %2611 = vperm.xlu0 %3067, %v2445_v59   ;;  %v1547_v23 = vadd.f32 %v1513_v24, %v4431_v10  ;;  %v1794_v61 = vmul.f32 %v3835_v31, %v5361_v11  ;;  %v1793_v42 = vmul.f32 %v3835_v31, %v5362_v27  ;;  %v1826_v34 = vadd.f32 %v1792_v20, %v1546_v58  ;;  %v5365_v59 = vld [vmem:[#allocation96_spill] sm:$0xff]  ;;  %v5366_v56 = vld [vmem:[#allocation155_spill] sm:$0xff] }
 0x274   : > { %v1825_v30 = vadd.f32 %v1791_v36, %v1545_v22  ;;  %v4588_v47 = vadd.f32 %v2350_v0, %v2104_v26  ;;  %v4590_v45 = vadd.f32 %v2349_v51, %v2103_v35  ;;  %v1516_v8 = vmul.f32 %v5343_v16, %v5364_v38  ;;  %v5367_v24 = vld [vmem:[#allocation156_spill] sm:$0xff]  ;;  %v5368_v36 = vld [vmem:[#allocation97_spill] sm:$0xff]  ;;  %v5369_v0 = vld [vmem:[#allocation98_spill] sm:$0xff] }
 0x275   : > { %v1515_v6 = vmul.f32 %v5343_v16, %v5365_v59  ;;  %v2074_v10 = vmul.f32 %v4473_v2, %v5366_v56  ;;  %v2073_v50 = vmul.f32 %v4473_v2, %v5367_v24  ;;  %v2207_v32 = vpop.permute.xlu1 %2206  ;;  %v2202_v11 = vpop.permute.xlu0 %2201  ;;  %v2106_v58 = vadd.f32 %v2072_v21, %v1826_v34  ;;  %v5370_v59 = vld [vmem:[#allocation128_spill] sm:$0xff]  ;;  %v5371_v24 = vld [vmem:[#allocation129_spill] sm:$0xff] }
 0x276   : > { %5363 = vst [vmem:[#allocation26_spill] sm:$0xff] %v4590_v45  ;;  %v2105_v20 = vadd.f32 %v2071_v46, %v1825_v30  ;;  %v2352_v26 = vmul.f32 %v4576_v33, %v2207_v32  ;;  %v2351_v35 = vmul.f32 %v4576_v33, %v2202_v11  ;;  %v1518_v22 = vmul.f32 %v5343_v16, %v5368_v36 }
 0x277   : > { %v1517_v51 = vmul.f32 %v5343_v16, %v5369_v0  ;;  %v1828_v27 = vadd.f32 %v1794_v61, %v1548_v29  ;;  %v1827_v38 = vadd.f32 %v1793_v42, %v1547_v23  ;;  %v1796_v56 = vmul.f32 %v3835_v31, %v5370_v59  ;;  %v5372_v29 = vld [vmem:[#allocation157_spill] sm:$0xff]  ;;  %v5373_v61 = vld [vmem:[#allocation158_spill] sm:$0xff]  ;;  %v5378_v59 = vld [vmem:[#allocation159_spill] sm:$0xff] }
 0x278   : > { %v1795_v45 = vmul.f32 %v3835_v31, %v5371_v24  ;;  %v4610_v21 = vadd.f32 %v2352_v26, %v2106_v58  ;;  %v4612_v46 = vadd.f32 %v2351_v35, %v2105_v20  ;;  %v1550_v34 = vadd.f32 %v1516_v8, %v4434_v12  ;;  %v5374_v8 = vld [vmem:[#allocation130_spill] sm:$0xff] }
 0x279   : > { %v1549_v30 = vadd.f32 %v1515_v6, %v4437_v5  ;;  %v2108_v32 = vadd.f32 %v2074_v10, %v1828_v27  ;;  %v2107_v11 = vadd.f32 %v2073_v50, %v1827_v38  ;;  %v2217_v36 = vpop.permute.xlu1 %2216  ;;  %v2212_v16 = vpop.permute.xlu0 %2211  ;;  %v2076_v23 = vmul.f32 %v4473_v2, %v5372_v29  ;;  %v5375_v6 = vld [vmem:[#allocation131_spill] sm:$0xff]  ;;  %v4635_v38 = vld [vmem:[%s5073_s1 + $0x4] ss:$0 sm:$0xff]  ;;  %v5380_v29 = vld [vmem:[#allocation101_spill] sm:$0xff] }
 0x27a   : > { %v2075_v42 = vmul.f32 %v4473_v2, %v5373_v61  ;;  %v2354_v0 = vmul.f32 %v4576_v33, %v2217_v36  ;;  %v2353_v58 = vmul.f32 %v4576_v33, %v2212_v16  ;;  %v1552_v20 = vadd.f32 %v1518_v22, %v4440_v62  ;;  %v5376_v62 = vld [vmem:[#allocation99_spill] sm:$0xff]  ;;  %v5377_v22 = vld [vmem:[#allocation100_spill] sm:$0xff] }
 0x27b   : > { %v1551_v12 = vadd.f32 %v1517_v51, %v4443_v19  ;;  %v1798_v5 = vmul.f32 %v3835_v31, %v5374_v8  ;;  %v1797_v10 = vmul.f32 %v3835_v31, %v5375_v6  ;;  %v1830_v50 = vadd.f32 %v1796_v56, %v1550_v34  ;;  %v5379_v56 = vld [vmem:[#allocation160_spill] sm:$0xff] }
 0x27c   : > { %v1829_v26 = vadd.f32 %v1795_v45, %v1549_v30  ;;  %v4628_v35 = vadd.f32 %v2354_v0, %v2108_v32  ;;  %v4630_v27 = vadd.f32 %v2353_v58, %v2107_v11  ;;  %v1520_v19 = vmul.f32 %v4635_v38, %v5376_v62  ;;  %v5381_v0 = vld [vmem:[#allocation102_spill] sm:$0xff]  ;;  %v5382_v62 = vld [vmem:[#allocation132_spill] sm:$0xff] }
 0x27d   : > { %v1519_v51 = vmul.f32 %v4635_v38, %v5377_v22  ;;  %v2078_v24 = vmul.f32 %v4473_v2, %v5378_v59  ;;  %v2077_v45 = vmul.f32 %v4473_v2, %v5379_v56  ;;  %v2227_v34 = vpop.permute.xlu1 %2226  ;;  %v2222_v30 = vpop.permute.xlu0 %2221  ;;  %v2110_v32 = vadd.f32 %v2076_v23, %v1830_v50  ;;  %v5383_v59 = vld [vmem:[#allocation133_spill] sm:$0xff] }
 0x27e   : > { %v2109_v11 = vadd.f32 %v2075_v42, %v1829_v26  ;;  %v2356_v36 = vmul.f32 %v4576_v33, %v2227_v34  ;;  %v2355_v16 = vmul.f32 %v4576_v33, %v2222_v30  ;;  %v1522_v61 = vmul.f32 %v4635_v38, %v5380_v29 }
 0x27f   : > { %v1521_v58 = vmul.f32 %v4635_v38, %v5381_v0  ;;  %v1832_v8 = vadd.f32 %v1798_v5, %v1552_v20  ;;  %v1831_v6 = vadd.f32 %v1797_v10, %v1551_v12  ;;  %v1800_v22 = vmul.f32 %v3835_v31, %v5382_v62  ;;  %v5384_v20 = vld [vmem:[#allocation2_spill] sm:$0xff]  ;;  %v5385_v5 = vld [vmem:[#allocation3_spill] sm:$0xff] }
 0x280   : > { %v1799_v56 = vmul.f32 %v3835_v31, %v5383_v59  ;;  %v4655_v23 = vadd.f32 %v2356_v36, %v2110_v32  ;;  %v4657_v42 = vadd.f32 %v2355_v16, %v2109_v11  ;;  %v1554_v50 = vadd.f32 %v1520_v19, %v4450_v13  ;;  %v5386_v19 = vld [vmem:[#allocation134_spill] sm:$0xff] }
 0x281   : > { %v1553_v26 = vadd.f32 %v1519_v51, %v4453_v53  ;;  %v2112_v34 = vadd.f32 %v2078_v24, %v1832_v8  ;;  %v2111_v30 = vadd.f32 %v2077_v45, %v1831_v6  ;;  %v2237_v29 = vpop.permute.xlu1 %2236  ;;  %v2232_v0 = vpop.permute.xlu0 %2231  ;;  %v2080_v12 = vmul.f32 %v4473_v2, %v5384_v20  ;;  %v5387_v51 = vld [vmem:[#allocation135_spill] sm:$0xff] }
 0x282   : > { %v2079_v10 = vmul.f32 %v4473_v2, %v5385_v5  ;;  %v2358_v62 = vmul.f32 %v4576_v33, %v2237_v29  ;;  %v2357_v32 = vmul.f32 %v4576_v33, %v2232_v0  ;;  %v1556_v11 = vadd.f32 %v1522_v61, %v4456_v7  ;;  %v5388_v6 = vld [vmem:[#allocation103_spill] sm:$0xff]  ;;  %v5389_v29 = vld [vmem:[#allocation104_spill] sm:$0xff] }
 0x283   : > { %v1555_v13 = vadd.f32 %v1521_v58, %v4459_v54  ;;  %v1802_v53 = vmul.f32 %v3835_v31, %v5386_v19  ;;  %v1801_v24 = vmul.f32 %v3835_v31, %v5387_v51  ;;  %v1834_v45 = vadd.f32 %v1800_v22, %v1554_v50  ;;  %v5390_v61 = vld [vmem:[#allocation4_spill] sm:$0xff]  ;;  %v5391_v58 = vld [vmem:[#allocation5_spill] sm:$0xff] }
 0x284   : > { %v1833_v36 = vadd.f32 %v1799_v56, %v1553_v26  ;;  %v4673_v16 = vadd.f32 %v2358_v62, %v2112_v34  ;;  %v4675_v8 = vadd.f32 %v2357_v32, %v2111_v30  ;;  %v1524_v59 = vmul.f32 %v4635_v38, %v5388_v6  ;;  %v5392_v34 = vld [vmem:[#allocation105_spill] sm:$0xff]  ;;  %v5393_v62 = vld [vmem:[#allocation106_spill] sm:$0xff]  ;;  %v5394_v6 = vld [vmem:[#allocation136_spill] sm:$0xff] }
 0x285   : > { %v1523_v7 = vmul.f32 %v4635_v38, %v5389_v29  ;;  %v2082_v54 = vmul.f32 %v4473_v2, %v5390_v61  ;;  %v2081_v0 = vmul.f32 %v4473_v2, %v5391_v58  ;;  %v2247_v20 = vpop.permute.xlu1 %2246  ;;  %v2242_v5 = vpop.permute.xlu0 %2241  ;;  %v2114_v22 = vadd.f32 %v2080_v12, %v1834_v45  ;;  %v5395_v61 = vld [vmem:[#allocation137_spill] sm:$0xff] }
 0x286   : > { %v2113_v56 = vadd.f32 %v2079_v10, %v1833_v36  ;;  %v2360_v50 = vmul.f32 %v4576_v33, %v2247_v20  ;;  %v2359_v26 = vmul.f32 %v4576_v33, %v2242_v5  ;;  %v1526_v30 = vmul.f32 %v4635_v38, %v5392_v34 }
 0x287   : > { %v1525_v32 = vmul.f32 %v4635_v38, %v5393_v62  ;;  %v1836_v19 = vadd.f32 %v1802_v53, %v1556_v11  ;;  %v1835_v51 = vadd.f32 %v1801_v24, %v1555_v13  ;;  %v1804_v29 = vmul.f32 %v3835_v31, %v5394_v6 }
 0x288   : > { %v1803_v58 = vmul.f32 %v3835_v31, %v5395_v61  ;;  %v4695_v12 = vadd.f32 %v2360_v50, %v2114_v22  ;;  %v4697_v10 = vadd.f32 %v2359_v26, %v2113_v56  ;;  %v1558_v45 = vadd.f32 %v1524_v59, %v4462_v3  ;;  %v5396_v59 = vld [vmem:[#allocation138_spill] sm:$0xff] }
 0x289   : > { %v1557_v36 = vadd.f32 %v1523_v7, %v4479_v52  ;;  %v2116_v20 = vadd.f32 %v2082_v54, %v1836_v19  ;;  %v2115_v5 = vadd.f32 %v2081_v0, %v1835_v51  ;;  %v2257_v34 = vpop.permute.xlu1 %2256  ;;  %v2252_v62 = vpop.permute.xlu0 %2251  ;;  %v2084_v11 = vmul.f32 %v4473_v2, %v4171_v28  ;;  %v5397_v7 = vld [vmem:[#allocation139_spill] sm:$0xff]  ;;  %v5399_v19 = vld [vmem:[#allocation108_spill] sm:$0xff] }
 0x28a   : > { %v2083_v13 = vmul.f32 %v4473_v2, %v4173_v41  ;;  %v2362_v53 = vmul.f32 %v4576_v33, %v2257_v34  ;;  %v2361_v24 = vmul.f32 %v4576_v33, %v2252_v62  ;;  %v1560_v22 = vadd.f32 %v1526_v30, %v4496_v49  ;;  %v5398_v41 = vld [vmem:[#allocation107_spill] sm:$0xff]  ;;  %v5400_v30 = vld [vmem:[#allocation8_spill] sm:$0xff] }
 0x28b   : > { %v1559_v3 = vadd.f32 %v1525_v32, %v4499_v44  ;;  %v1806_v52 = vmul.f32 %v3835_v31, %v5396_v59  ;;  %v1805_v54 = vmul.f32 %v3835_v31, %v5397_v7  ;;  %v1838_v0 = vadd.f32 %v1804_v29, %v1558_v45  ;;  %v5404_v59 = vld [vmem:[#allocation141_spill] sm:$0xff] }
 0x28c   : > { %v1837_v56 = vadd.f32 %v1803_v58, %v1557_v36  ;;  %v4713_v28 = vadd.f32 %v2362_v53, %v2116_v20  ;;  %v4715_v50 = vadd.f32 %v2361_v24, %v2115_v5  ;;  %v1528_v26 = vmul.f32 %v4635_v38, %v5398_v41  ;;  %v5401_v36 = vld [vmem:[#allocation109_spill] sm:$0xff]  ;;  %v5402_v5 = vld [vmem:[#allocation110_spill] sm:$0xff] }
 0x28d   : > { %v1527_v49 = vmul.f32 %v4635_v38, %v5399_v19  ;;  %v2086_v44 = vmul.f32 %v4473_v2, %v4214_v15  ;;  %v2085_v32 = vmul.f32 %v4473_v2, %v5400_v30  ;;  %v2267_v51 = vpop.permute.xlu1 %2266  ;;  %v2262_v6 = vpop.permute.xlu0 %2261  ;;  %v2118_v29 = vadd.f32 %v2084_v11, %v1838_v0  ;;  %v5403_v15 = vld [vmem:[#allocation140_spill] sm:$0xff] }
 0x28e   : > { %v2117_v61 = vadd.f32 %v2083_v13, %v1837_v56  ;;  %v2364_v58 = vmul.f32 %v4576_v33, %v2267_v51  ;;  %v2363_v45 = vmul.f32 %v4576_v33, %v2262_v6  ;;  %v1530_v20 = vmul.f32 %v4635_v38, %v5401_v36 }
 0x28f   : > { %v1529_v34 = vmul.f32 %v4635_v38, %v5402_v5  ;;  %v1840_v62 = vadd.f32 %v1806_v52, %v1560_v22  ;;  %v1839_v53 = vadd.f32 %v1805_v54, %v1559_v3  ;;  %v1808_v24 = vmul.f32 %v3835_v31, %v5403_v15  ;;  %v5405_v22 = vld [vmem:[#allocation11_spill] sm:$0xff]  ;;  %v5406_v52 = vld [vmem:[#allocation12_spill] sm:$0xff] }
 0x290   : > { %v1807_v7 = vmul.f32 %v3835_v31, %v5404_v59  ;;  %v4735_v11 = vadd.f32 %v2364_v58, %v2118_v29  ;;  %v4737_v13 = vadd.f32 %v2363_v45, %v2117_v61  ;;  %v1562_v0 = vadd.f32 %v1528_v26, %v4502_v60  ;;  %v5407_v26 = vld [vmem:[#allocation142_spill] sm:$0xff] }
 0x291   : > { %v1561_v56 = vadd.f32 %v1527_v49, %v4511_v40  ;;  %v2120_v41 = vadd.f32 %v2086_v44, %v1840_v62  ;;  %v2119_v19 = vadd.f32 %v2085_v32, %v1839_v53  ;;  %v2277_v30 = vpop.permute.xlu1 %2276  ;;  %v2272_v51 = vpop.permute.xlu0 %2271  ;;  %v2088_v3 = vmul.f32 %v4473_v2, %v5405_v22  ;;  %v4752_v40 = vld [vmem:[%s5073_s1 + $0x5] ss:$0 sm:$0xff]  ;;  %v5408_v44 = vld [vmem:[#allocation143_spill] sm:$0xff] }
 0x292   : > { %v2087_v54 = vmul.f32 %v4473_v2, %v5406_v52  ;;  %v2366_v31 = vmul.f32 %v4576_v33, %v2277_v30  ;;  %v2365_v6 = vmul.f32 %v4576_v33, %v2272_v51  ;;  %v1564_v29 = vadd.f32 %v1530_v20, %v4516_v1  ;;  %v5409_v1 = vld [vmem:[#allocation111_spill] sm:$0xff]  ;;  %v5410_v20 = vld [vmem:[#allocation112_spill] sm:$0xff]  ;;  %v5412_v53 = vld [vmem:[#allocation14_spill] sm:$0xff] }
 0x293   : > { %v1563_v60 = vadd.f32 %v1529_v34, %v4519_v57  ;;  %v1810_v49 = vmul.f32 %v4752_v40, %v5407_v26  ;;  %v1809_v32 = vmul.f32 %v4752_v40, %v5408_v44  ;;  %v1842_v61 = vadd.f32 %v1808_v24, %v1562_v0  ;;  %v5411_v34 = vld [vmem:[#allocation13_spill] sm:$0xff]  ;;  %v5414_v51 = vld [vmem:[#allocation114_spill] sm:$0xff] }
 0x294   : > { %v1841_v58 = vadd.f32 %v1807_v7, %v1561_v56  ;;  %v4758_v45 = vadd.f32 %v2366_v31, %v2120_v41  ;;  %v4760_v36 = vadd.f32 %v2365_v6, %v2119_v19  ;;  %v1532_v57 = vmul.f32 %v4635_v38, %v5409_v1  ;;  %v5413_v41 = vld [vmem:[#allocation113_spill] sm:$0xff]  ;;  %v5415_v6 = vld [vmem:[#allocation144_spill] sm:$0xff] }
 0x295   : > { %v1531_v5 = vmul.f32 %v4635_v38, %v5410_v20  ;;  %v2090_v62 = vmul.f32 %v4473_v2, %v5411_v34  ;;  %v2089_v15 = vmul.f32 %v4473_v2, %v5412_v53  ;;  %v2287_v59 = vpop.permute.xlu1 %2286  ;;  %v2282_v30 = vpop.permute.xlu0 %2281  ;;  %v2122_v24 = vadd.f32 %v2088_v3, %v1842_v61  ;;  %v5416_v44 = vld [vmem:[#allocation145_spill] sm:$0xff] }
 0x296   : > { %v2121_v7 = vadd.f32 %v2087_v54, %v1841_v58  ;;  %v2368_v0 = vmul.f32 %v4576_v33, %v2287_v59  ;;  %v2367_v56 = vmul.f32 %v4576_v33, %v2282_v30  ;;  %v1534_v19 = vmul.f32 %v4635_v38, %v5413_v41  ;;  %v5421_v41 = vld [vmem:[#allocation20_spill] sm:$0xff] }
 0x297   : > { %v1533_v22 = vmul.f32 %v4635_v38, %v5414_v51  ;;  %v1844_v52 = vadd.f32 %v1810_v49, %v1564_v29  ;;  %v1843_v31 = vadd.f32 %v1809_v32, %v1563_v60  ;;  %v1812_v26 = vmul.f32 %v4752_v40, %v5415_v6 }
 0x298   : > { %v1811_v1 = vmul.f32 %v4752_v40, %v5416_v44  ;;  %v4780_v3 = vadd.f32 %v2368_v0, %v2122_v24  ;;  %v4782_v54 = vadd.f32 %v2367_v56, %v2121_v7  ;;  %v1566_v61 = vadd.f32 %v1532_v57, %v4528_v9  ;;  %v5417_v57 = vld [vmem:[#allocation146_spill] sm:$0xff]  ;;  %v5420_v56 = vld [vmem:[#allocation116_spill] sm:$0xff]  ;;  %v5422_v44 = vld [vmem:[#allocation15_spill] sm:$0xff] }
 0x299   : > { %v1565_v58 = vadd.f32 %v1531_v5, %v4531_v48  ;;  %v2124_v20 = vadd.f32 %v2090_v62, %v1844_v52  ;;  %v2123_v34 = vadd.f32 %v2089_v15, %v1843_v31  ;;  %v2297_v53 = vpop.permute.xlu1 %2296  ;;  %v2292_v59 = vpop.permute.xlu0 %2291  ;;  %v2092_v29 = vmul.f32 %v4473_v2, %v4332_v43  ;;  %v5418_v5 = vld [vmem:[#allocation147_spill] sm:$0xff] }
 0x29a   : > { %v2091_v60 = vmul.f32 %v4473_v2, %v4334_v4  ;;  %v2370_v49 = vmul.f32 %v4576_v33, %v2297_v53  ;;  %v2369_v32 = vmul.f32 %v4576_v33, %v2292_v59  ;;  %v1568_v30 = vadd.f32 %v1534_v19, %v4548_v63  ;;  %v5419_v4 = vld [vmem:[#allocation115_spill] sm:$0xff]  ;;  %v5425_v59 = vld [vmem:[#allocation149_spill] sm:$0xff] }
 0x29b   : > { %v1567_v9 = vadd.f32 %v1533_v22, %v4551_v17  ;;  %v1814_v48 = vmul.f32 %v4752_v40, %v5417_v57  ;;  %v1813_v62 = vmul.f32 %v4752_v40, %v5418_v5  ;;  %v1846_v15 = vadd.f32 %v1812_v26, %v1566_v61  ;;  %v5423_v61 = vld [vmem:[#allocation16_spill] sm:$0xff] }
 0x29c   : > { %v1845_v24 = vadd.f32 %v1811_v1, %v1565_v58  ;;  %v4798_v43 = vadd.f32 %v2370_v49, %v2124_v20  ;;  %v4800_v7 = vadd.f32 %v2369_v32, %v2123_v34  ;;  %v1536_v0 = vmul.f32 %v4635_v38, %v5419_v4  ;;  %v5426_v4 = vld [vmem:[#allocation21_spill] sm:$0xff] }
 0x29d   : > { %v1535_v63 = vmul.f32 %v4635_v38, %v5420_v56  ;;  %v2094_v17 = vmul.f32 %v4473_v2, %v4383_v14  ;;  %v2093_v19 = vmul.f32 %v4473_v2, %v5421_v41  ;;  %v2307_v51 = vpop.permute.xlu1 %2306  ;;  %v2302_v22 = vpop.permute.xlu0 %2301  ;;  %v2126_v52 = vadd.f32 %v2092_v29, %v1846_v15  ;;  %v5424_v14 = vld [vmem:[#allocation148_spill] sm:$0xff]  ;;  %v5428_v56 = vld [vmem:[#allocation6_spill] sm:$0xff]  ;;  %v5429_v41 = vld [vmem:[#allocation17_spill] sm:$0xff] }
 0x29e   : > { %v2125_v31 = vadd.f32 %v2091_v60, %v1845_v24  ;;  %v2372_v6 = vmul.f32 %v4576_v33, %v2307_v51  ;;  %v2371_v26 = vmul.f32 %v4576_v33, %v2302_v22  ;;  %v1289_v1 = vadd.f32 %v4554_v25, %v5422_v44  ;;  %v5430_v22 = vld [vmem:[#allocation7_spill] sm:$0xff] }
 0x29f   : > { %v1288_v58 = vadd.f32 %v4563_v18, %v5423_v61  ;;  %v1848_v20 = vadd.f32 %v1814_v48, %v1568_v30  ;;  %v1847_v34 = vadd.f32 %v1813_v62, %v1567_v9  ;;  %v1816_v53 = vmul.f32 %v4752_v40, %v5424_v14  ;;  %v5427_v30 = vld [vmem:[#allocation22_spill] sm:$0xff]  ;;  %v5434_v61 = vld [vmem:[#allocation9_spill] sm:$0xff]  ;;  %v5437_v14 = vld [vmem:[#allocation51_spill] sm:$0xff] }
 0x2a0   : > { %v1815_v49 = vmul.f32 %v4752_v40, %v5425_v59  ;;  %v4820_v29 = vadd.f32 %v2372_v6, %v2126_v52  ;;  %v4822_v60 = vadd.f32 %v2371_v26, %v2125_v31  ;;  %v1570_v32 = vadd.f32 %v1536_v0, %v1289_v1  ;;  %v5431_v0 = vld [vmem:[#allocation18_spill] sm:$0xff] }
 0x2a1   : > { %v1569_v57 = vadd.f32 %v1535_v63, %v1288_v58  ;;  %v2128_v5 = vadd.f32 %v2094_v17, %v1848_v20  ;;  %v2127_v15 = vadd.f32 %v2093_v19, %v1847_v34  ;;  %v2317_v25 = vpop.permute.xlu1 %2316  ;;  %v2312_v24 = vpop.permute.xlu0 %2311  ;;  %v2096_v18 = vmul.f32 %v4473_v2, %v5426_v4  ;;  %v5432_v17 = vld [vmem:[#allocation85_spill] sm:$0xff]  ;;  %v5433_v52 = vld [vmem:[#allocation86_spill] sm:$0xff]  ;;  %v5435_v58 = vld [vmem:[#allocation19_spill] sm:$0xff] }
 0x2a2   : > { %v2095_v9 = vmul.f32 %v4473_v2, %v5427_v30  ;;  %v2374_v48 = vmul.f32 %v4576_v33, %v2317_v25  ;;  %v2373_v62 = vmul.f32 %v4576_v33, %v2312_v24  ;;  %v1259_v51 = vadd.f32 %v5429_v41, %v5428_v56  ;;  %v5436_v34 = vld [vmem:[#allocation10_spill] sm:$0xff]  ;;  %v5439_v4 = vld [vmem:[#allocation119_spill] sm:$0xff] }
 0x2a3   : > { %v1258_v63 = vadd.f32 %v5431_v0, %v5430_v22  ;;  %v1506_v19 = vmul.f32 %v4635_v38, %v5432_v17  ;;  %v1505_v31 = vmul.f32 %v4635_v38, %v5433_v52  ;;  %v1850_v6 = vadd.f32 %v1816_v53, %v1570_v32  ;;  %v5438_v25 = vld [vmem:[#allocation118_spill] sm:$0xff]  ;;  %v5441_v22 = vld [vmem:[#allocation88_spill] sm:$0xff] }
 0x2a4   : > { %v1849_v26 = vadd.f32 %v1815_v49, %v1569_v57  ;;  %v4838_v44 = vadd.f32 %v2374_v48, %v2128_v5  ;;  %v4840_v1 = vadd.f32 %v2373_v62, %v2127_v15  ;;  %v1261_v20 = vadd.f32 %v5435_v58, %v5434_v61  ;;  %v5440_v48 = vld [vmem:[#allocation87_spill] sm:$0xff]  ;;  %v5442_v17 = vld [vmem:[#allocation150_spill] sm:$0xff] }
 0x2a5   : > { %v1260_v59 = vadd.f32 %v5437_v14, %v5436_v34  ;;  %v1786_v24 = vmul.f32 %v4752_v40, %v5438_v25  ;;  %v1785_v30 = vmul.f32 %v4752_v40, %v5439_v4  ;;  %v2327_v56 = vpop.permute.xlu1 %2326  ;;  %v2322_v41 = vpop.permute.xlu0 %2321  ;;  %v2130_v53 = vadd.f32 %v2096_v18, %v1850_v6  ;;  %v5443_v61 = vld [vmem:[#allocation151_spill] sm:$0xff] }
 0x2a6   : > { %v2129_v49 = vadd.f32 %v2095_v9, %v1849_v26  ;;  %v2376_v32 = vmul.f32 %v4576_v33, %v2327_v56  ;;  %v2375_v57 = vmul.f32 %v4576_v33, %v2322_v41  ;;  %v1540_v5 = vadd.f32 %v1506_v19, %v1259_v51  ;;  %v5444_v51 = vld [vmem:[#allocation120_spill] sm:$0xff]  ;;  %v5445_v19 = vld [vmem:[#allocation121_spill] sm:$0xff] }
 0x2a7   : > { %v1539_v15 = vadd.f32 %v1505_v31, %v1258_v63  ;;  %v1508_v62 = vmul.f32 %v4635_v38, %v5440_v48  ;;  %v1507_v0 = vmul.f32 %v4635_v38, %v5441_v22  ;;  %v2066_v52 = vmul.f32 %v4473_v2, %v5442_v17  ;;  %v5446_v41 = vld [vmem:[#allocation152_spill] sm:$0xff] }
 0x2a8   : > { %v2065_v58 = vmul.f32 %v4473_v2, %v5443_v61  ;;  %v4860_v18 = vadd.f32 %v2376_v32, %v2130_v53  ;;  %v4862_v9 = vadd.f32 %v2375_v57, %v2129_v49  ;;  %v1820_v6 = vadd.f32 %v1786_v24, %v1540_v5  ;;  %v5447_v49 = vld [vmem:[#allocation153_spill] sm:$0xff]  ;;  %v4881_v32 = vld [vmem:[%s5073_s1 + $0x8] ss:$0 sm:$0xff]  ;;  %v5449_v48 = vld [vmem:[#allocation24_spill] sm:$0xff] }
 0x2a9   : > { %v1819_v26 = vadd.f32 %v1785_v30, %v1539_v15  ;;  %v1788_v63 = vmul.f32 %v4752_v40, %v5444_v51  ;;  %v1787_v31 = vmul.f32 %v4752_v40, %v5445_v19  ;;  %v2337_v34 = vpop.permute.xlu1 %2336  ;;  %v2332_v38 = vpop.permute.xlu0 %2331  ;;  %v2346_v14 = vmul.f32 %v4576_v33, %v4506_v37  ;;  %v5448_v5 = vld [vmem:[#allocation23_spill] sm:$0xff]  ;;  %v4899_v51 = vld [vmem:[%s5074_s2] ss:$0 sm:$0xff] }
 0x2aa   : > { %v2345_v25 = vmul.f32 %v4576_v33, %v4508_v55  ;;  %v2378_v4 = vmul.f32 %v4576_v33, %v2337_v34  ;;  %v2377_v56 = vmul.f32 %v4576_v33, %v2332_v38  ;;  %v1542_v24 = vadd.f32 %v1508_v62, %v1261_v20 }
 0x2ab   : > { %v1541_v30 = vadd.f32 %v1507_v0, %v1260_v59  ;;  %v2068_v53 = vmul.f32 %v4473_v2, %v5446_v41  ;;  %v2067_v40 = vmul.f32 %v4473_v2, %v5447_v49  ;;  %v2100_v37 = vadd.f32 %v2066_v52, %v1820_v6  ;;  %v5450_v2 = vld [vmem:[#allocation25_spill] sm:$0xff] }
 0x2ac   : > { %v2099_v55 = vadd.f32 %v2065_v58, %v1819_v26  ;;  %v4884_v57 = vadd.f32 %v2378_v4, %v4490_v39  ;;  %v4887_v20 = vadd.f32 %v2377_v56, %v5448_v5  ;;  %v1822_v59 = vadd.f32 %v1788_v63, %v1542_v24 }
 0x2ad   : > { %v1821_v15 = vadd.f32 %v1787_v31, %v1541_v30  ;;  %v2348_v62 = vmul.f32 %v4576_v33, %v5449_v48  ;;  %v2347_v22 = vmul.f32 %v4576_v33, %v5450_v2  ;;  %v2457_v0 = vpop.permute.xlu1 %2456  ;;  %v2452_v17 = vpop.permute.xlu0 %2451  ;;  %v2380_v61 = vadd.f32 %v2346_v14, %v2100_v37  ;;  %v5451_v2 = vld [vmem:[#allocation26_spill] sm:$0xff] }
 0x2ae   : > { %v2379_v52 = vadd.f32 %v2345_v25, %v2099_v55  ;;  %v2626_v58 = vmul.f32 %v4881_v32, %v2457_v0  ;;  %v2625_v39 = vmul.f32 %v4881_v32, %v2452_v17  ;;  %v2102_v6 = vadd.f32 %v2068_v53, %v1822_v59 }
 0x2af   : > { %v2101_v26 = vadd.f32 %v2067_v40, %v1821_v15 }
 0x2b0   : > { %v2660_v63 = vadd.f32 %v2626_v58, %v2380_v61  ;;  %v2659_v19 = vadd.f32 %v2625_v39, %v2379_v52  ;;  %v2382_v31 = vadd.f32 %v2348_v62, %v2102_v6 }
 0x2b1   : > { %v2381_v33 = vadd.f32 %v2347_v22, %v2101_v26  ;;  %v2467_v34 = vpop.permute.xlu1 %2466  ;;  %v2462_v38 = vpop.permute.xlu0 %2461 }
 0x2b2   : > { %v2701_v14 = vadd.f32 %v4899_v51, %v2660_v63  ;;  %v2700_v25 = vadd.f32 %v4899_v51, %v2659_v19  ;;  %v2628_v4 = vmul.f32 %v4881_v32, %v2467_v34  ;;  %v2627_v56 = vmul.f32 %v4881_v32, %v2462_v38 }
 0x2b4   : > { %v2735_v24 = vmax.f32 %v2701_v14, 0.0  ;;  %v2734_v30 = vmax.f32 %v2700_v25, 0.0  ;;  %v2662_v41 = vadd.f32 %v2628_v4, %v2382_v31  ;;  %v2661_v53 = vadd.f32 %v2627_v56, %v2381_v33 }
 0x2b5   : > { %v2477_v49 = vpop.permute.xlu1 %2476  ;;  %v2472_v40 = vpop.permute.xlu0 %2471 }
 0x2b6   : > { %2770 = vst.msk [vmem:[%s4908_s25 + $0x8] sm:$0xff] %vm2768_vm0, %v2735_v24  ;;  %2769 = vst.msk [vmem:[%s4908_s25] sm:$0xff] %vm2768_vm0, %v2734_v30  ;;  %v2703_v37 = vadd.f32 %v4899_v51, %v2662_v41  ;;  %v2702_v55 = vadd.f32 %v4899_v51, %v2661_v53  ;;  %v2630_v5 = vmul.f32 %v4881_v32, %v2477_v49 }
 0x2b7   : > { %v2629_v59 = vmul.f32 %v4881_v32, %v2472_v40 }
 0x2b8   : > { %v2737_v15 = vmax.f32 %v2703_v37, 0.0  ;;  %v2736_v48 = vmax.f32 %v2702_v55, 0.0  ;;  %v2664_v62 = vadd.f32 %v2630_v5, %v4588_v47 }
 0x2b9   : > { %v2663_v22 = vadd.f32 %v2629_v59, %v5451_v2  ;;  %v2487_v0 = vpop.permute.xlu1 %2486  ;;  %v2482_v17 = vpop.permute.xlu0 %2481 }
 0x2ba   : > { %2772 = vst.msk [vmem:[%s4908_s25 + $0x18] sm:$0xff] %vm2768_vm0, %v2737_v15  ;;  %2771 = vst.msk [vmem:[%s4908_s25 + $0x10] sm:$0xff] %vm2768_vm0, %v2736_v48  ;;  %v2705_v61 = vadd.f32 %v4899_v51, %v2664_v62  ;;  %v2632_v58 = vmul.f32 %v4881_v32, %v2487_v0  ;;  %v2631_v39 = vmul.f32 %v4881_v32, %v2482_v17 }
 0x2bb   : > { %v2704_v52 = vadd.f32 %v4899_v51, %v2663_v22 }
 0x2bc   : > { %v2739_v6 = vmax.f32 %v2705_v61, 0.0  ;;  %v2666_v26 = vadd.f32 %v2632_v58, %v4610_v21  ;;  %v2665_v63 = vadd.f32 %v2631_v39, %v4612_v46 }
 0x2bd   : > { %v2738_v47 = vmax.f32 %v2704_v52, 0.0  ;;  %v2497_v19 = vpop.permute.xlu1 %2496  ;;  %v2492_v31 = vpop.permute.xlu0 %2491 }
 0x2be   : > { %2774 = vst.msk [vmem:[%s4908_s25 + $0x28] sm:$0xff] %vm2768_vm0, %v2739_v6  ;;  %v2707_v33 = vadd.f32 %v4899_v51, %v2666_v26  ;;  %v2706_v34 = vadd.f32 %v4899_v51, %v2665_v63  ;;  %v2634_v38 = vmul.f32 %v4881_v32, %v2497_v19  ;;  %v2633_v14 = vmul.f32 %v4881_v32, %v2492_v31 }
 0x2bf   : > { %2773 = vst.msk [vmem:[%s4908_s25 + $0x20] sm:$0xff] %vm2768_vm0, %v2738_v47 }
 0x2c0   : > { %v2741_v25 = vmax.f32 %v2707_v33, 0.0  ;;  %v2740_v21 = vmax.f32 %v2706_v34, 0.0  ;;  %v2668_v4 = vadd.f32 %v2634_v38, %v4628_v35  ;;  %v2667_v46 = vadd.f32 %v2633_v14, %v4630_v27 }
 0x2c1   : > { %v2507_v56 = vpop.permute.xlu1 %2506  ;;  %v2502_v24 = vpop.permute.xlu0 %2501 }
 0x2c2   : > { %2776 = vst.msk [vmem:[%s4908_s25 + $0x38] sm:$0xff] %vm2768_vm0, %v2741_v25  ;;  %2775 = vst.msk [vmem:[%s4908_s25 + $0x30] sm:$0xff] %vm2768_vm0, %v2740_v21  ;;  %v2709_v30 = vadd.f32 %v4899_v51, %v2668_v4  ;;  %v2708_v41 = vadd.f32 %v4899_v51, %v2667_v46  ;;  %v2636_v53 = vmul.f32 %v4881_v32, %v2507_v56 }
 0x2c3   : > { %v2635_v49 = vmul.f32 %v4881_v32, %v2502_v24 }
 0x2c4   : > { %v2743_v40 = vmax.f32 %v2709_v30, 0.0  ;;  %v2742_v35 = vmax.f32 %v2708_v41, 0.0  ;;  %v2670_v37 = vadd.f32 %v2636_v53, %v4655_v23 }
 0x2c5   : > { %v2669_v27 = vadd.f32 %v2635_v49, %v4657_v42  ;;  %v2517_v55 = vpop.permute.xlu1 %2516  ;;  %v2512_v5 = vpop.permute.xlu0 %2511 }
 0x2c6   : > { %2778 = vst.msk [vmem:[%s4908_s25 + $0x48] sm:$0xff] %vm2768_vm0, %v2743_v40  ;;  %2777 = vst.msk [vmem:[%s4908_s25 + $0x40] sm:$0xff] %vm2768_vm0, %v2742_v35  ;;  %v2711_v59 = vadd.f32 %v4899_v51, %v2670_v37  ;;  %v2638_v48 = vmul.f32 %v4881_v32, %v2517_v55  ;;  %v2637_v62 = vmul.f32 %v4881_v32, %v2512_v5 }
 0x2c7   : > { %v2710_v15 = vadd.f32 %v4899_v51, %v2669_v27 }
 0x2c8   : > { %v2745_v2 = vmax.f32 %v2711_v59, 0.0  ;;  %v2672_v22 = vadd.f32 %v2638_v48, %v4673_v16  ;;  %v2671_v42 = vadd.f32 %v2637_v62, %v4675_v8 }
 0x2c9   : > { %v2744_v23 = vmax.f32 %v2710_v15, 0.0  ;;  %v2527_v0 = vpop.permute.xlu1 %2526  ;;  %v2522_v17 = vpop.permute.xlu0 %2521 }
 0x2ca   : > { %2780 = vst.msk [vmem:[%s4908_s25 + $0x58] sm:$0xff] %vm2768_vm0, %v2745_v2  ;;  %v2713_v61 = vadd.f32 %v4899_v51, %v2672_v22  ;;  %v2712_v52 = vadd.f32 %v4899_v51, %v2671_v42  ;;  %v2640_v58 = vmul.f32 %v4881_v32, %v2527_v0  ;;  %v2639_v39 = vmul.f32 %v4881_v32, %v2522_v17 }
 0x2cb   : > { %2779 = vst.msk [vmem:[%s4908_s25 + $0x50] sm:$0xff] %vm2768_vm0, %v2744_v23 }
 0x2cc   : > { %v2747_v6 = vmax.f32 %v2713_v61, 0.0  ;;  %v2746_v16 = vmax.f32 %v2712_v52, 0.0  ;;  %v2674_v47 = vadd.f32 %v2640_v58, %v4695_v12  ;;  %v2673_v8 = vadd.f32 %v2639_v39, %v4697_v10 }
 0x2cd   : > { %v2537_v26 = vpop.permute.xlu1 %2536  ;;  %v2532_v63 = vpop.permute.xlu0 %2531 }
 0x2ce   : > { %2782 = vst.msk [vmem:[%s4908_s25 + $0x68] sm:$0xff] %vm2768_vm0, %v2747_v6  ;;  %2781 = vst.msk [vmem:[%s4908_s25 + $0x60] sm:$0xff] %vm2768_vm0, %v2746_v16  ;;  %v2715_v19 = vadd.f32 %v4899_v51, %v2674_v47  ;;  %v2714_v31 = vadd.f32 %v4899_v51, %v2673_v8  ;;  %v2642_v33 = vmul.f32 %v4881_v32, %v2537_v26 }
 0x2cf   : > { %v2641_v34 = vmul.f32 %v4881_v32, %v2532_v63 }
 0x2d0   : > { %v2749_v38 = vmax.f32 %v2715_v19, 0.0  ;;  %v2748_v12 = vmax.f32 %v2714_v31, 0.0  ;;  %v2676_v14 = vadd.f32 %v2642_v33, %v4713_v28 }
 0x2d1   : > { %v2675_v10 = vadd.f32 %v2641_v34, %v4715_v50  ;;  %v2547_v25 = vpop.permute.xlu1 %2546  ;;  %v2542_v21 = vpop.permute.xlu0 %2541 }
 0x2d2   : > { %2784 = vst.msk [vmem:[%s4908_s25 + $0x78] sm:$0xff] %vm2768_vm0, %v2749_v38  ;;  %2783 = vst.msk [vmem:[%s4908_s25 + $0x70] sm:$0xff] %vm2768_vm0, %v2748_v12  ;;  %v2717_v4 = vadd.f32 %v4899_v51, %v2676_v14  ;;  %v2644_v56 = vmul.f32 %v4881_v32, %v2547_v25  ;;  %v2643_v24 = vmul.f32 %v4881_v32, %v2542_v21 }
 0x2d3   : > { %v2716_v46 = vadd.f32 %v4899_v51, %v2675_v10 }
 0x2d4   : > { %v2751_v30 = vmax.f32 %v2717_v4, 0.0  ;;  %v2678_v41 = vadd.f32 %v2644_v56, %v4735_v11  ;;  %v2677_v50 = vadd.f32 %v2643_v24, %v4737_v13 }
 0x2d5   : > { %v2750_v28 = vmax.f32 %v2716_v46, 0.0  ;;  %v2557_v53 = vpop.permute.xlu1 %2556  ;;  %v2552_v49 = vpop.permute.xlu0 %2551 }
 0x2d6   : > { %2786 = vst.msk [vmem:[%s4908_s25 + $0x88] sm:$0xff] %vm2768_vm0, %v2751_v30  ;;  %v2719_v40 = vadd.f32 %v4899_v51, %v2678_v41  ;;  %v2718_v35 = vadd.f32 %v4899_v51, %v2677_v50  ;;  %v2646_v37 = vmul.f32 %v4881_v32, %v2557_v53  ;;  %v2645_v27 = vmul.f32 %v4881_v32, %v2552_v49 }
 0x2d7   : > { %2785 = vst.msk [vmem:[%s4908_s25 + $0x80] sm:$0xff] %vm2768_vm0, %v2750_v28 }
 0x2d8   : > { %v2753_v55 = vmax.f32 %v2719_v40, 0.0  ;;  %v2752_v11 = vmax.f32 %v2718_v35, 0.0  ;;  %v2680_v5 = vadd.f32 %v2646_v37, %v4758_v45  ;;  %v2679_v13 = vadd.f32 %v2645_v27, %v4760_v36 }
 0x2d9   : > { %v2567_v59 = vpop.permute.xlu1 %2566  ;;  %v2562_v15 = vpop.permute.xlu0 %2561 }
 0x2da   : > { %2788 = vst.msk [vmem:[%s4908_s25 + $0x98] sm:$0xff] %vm2768_vm0, %v2753_v55  ;;  %2787 = vst.msk [vmem:[%s4908_s25 + $0x90] sm:$0xff] %vm2768_vm0, %v2752_v11  ;;  %v2721_v48 = vadd.f32 %v4899_v51, %v2680_v5  ;;  %v2720_v62 = vadd.f32 %v4899_v51, %v2679_v13  ;;  %v2648_v2 = vmul.f32 %v4881_v32, %v2567_v59 }
 0x2db   : > { %v2647_v23 = vmul.f32 %v4881_v32, %v2562_v15 }
 0x2dc   : > { %v2755_v22 = vmax.f32 %v2721_v48, 0.0  ;;  %v2754_v45 = vmax.f32 %v2720_v62, 0.0  ;;  %v2682_v42 = vadd.f32 %v2648_v2, %v4780_v3 }
 0x2dd   : > { %v2681_v36 = vadd.f32 %v2647_v23, %v4782_v54  ;;  %v2577_v0 = vpop.permute.xlu1 %2576  ;;  %v2572_v17 = vpop.permute.xlu0 %2571 }
 0x2de   : > { %2790 = vst.msk [vmem:[%s4908_s25 + $0xa8] sm:$0xff] %vm2768_vm0, %v2755_v22  ;;  %2789 = vst.msk [vmem:[%s4908_s25 + $0xa0] sm:$0xff] %vm2768_vm0, %v2754_v45  ;;  %v2723_v61 = vadd.f32 %v4899_v51, %v2682_v42  ;;  %v2650_v58 = vmul.f32 %v4881_v32, %v2577_v0  ;;  %v2649_v39 = vmul.f32 %v4881_v32, %v2572_v17 }
 0x2df   : > { %v2722_v52 = vadd.f32 %v4899_v51, %v2681_v36 }
 0x2e0   : > { %v2757_v6 = vmax.f32 %v2723_v61, 0.0  ;;  %v2684_v16 = vadd.f32 %v2650_v58, %v4798_v43  ;;  %v2683_v54 = vadd.f32 %v2649_v39, %v4800_v7 }
 0x2e1   : > { %v2756_v3 = vmax.f32 %v2722_v52, 0.0  ;;  %v2587_v47 = vpop.permute.xlu1 %2586  ;;  %v2582_v8 = vpop.permute.xlu0 %2581 }
 0x2e2   : > { %2792 = vst.msk [vmem:[%s4908_s25 + $0xb8] sm:$0xff] %vm2768_vm0, %v2757_v6  ;;  %v2725_v26 = vadd.f32 %v4899_v51, %v2684_v16  ;;  %v2724_v63 = vadd.f32 %v4899_v51, %v2683_v54  ;;  %v2652_v19 = vmul.f32 %v4881_v32, %v2587_v47  ;;  %v2651_v31 = vmul.f32 %v4881_v32, %v2582_v8 }
 0x2e3   : > { %2791 = vst.msk [vmem:[%s4908_s25 + $0xb0] sm:$0xff] %vm2768_vm0, %v2756_v3 }
 0x2e4   : > { %v2759_v33 = vmax.f32 %v2725_v26, 0.0  ;;  %v2758_v43 = vmax.f32 %v2724_v63, 0.0  ;;  %v2686_v34 = vadd.f32 %v2652_v19, %v4820_v29  ;;  %v2685_v7 = vadd.f32 %v2651_v31, %v4822_v60 }
 0x2e5   : > { %v2597_v38 = vpop.permute.xlu1 %2596 }
 0x2e6   : > { %v2592_v12 = vpop.permute.xlu0 %2591  ;;  %2794 = vst.msk [vmem:[%s4908_s25 + $0xc8] sm:$0xff] %vm2768_vm0, %v2759_v33  ;;  %2793 = vst.msk [vmem:[%s4908_s25 + $0xc0] sm:$0xff] %vm2768_vm0, %v2758_v43  ;;  %v2727_v14 = vadd.f32 %v4899_v51, %v2686_v34  ;;  %v2726_v10 = vadd.f32 %v4899_v51, %v2685_v7  ;;  %v2654_v25 = vmul.f32 %v4881_v32, %v2597_v38 }
 0x2e7   : > { %v2653_v21 = vmul.f32 %v4881_v32, %v2592_v12 }
 0x2e8   : > { %v2761_v4 = vmax.f32 %v2727_v14, 0.0  ;;  %v2760_v29 = vmax.f32 %v2726_v10, 0.0  ;;  %v2688_v46 = vadd.f32 %v2654_v25, %v4838_v44 }
 0x2e9   : > { %v2687_v60 = vadd.f32 %v2653_v21, %v4840_v1  ;;  %v2607_v56 = vpop.permute.xlu1 %2606 }
 0x2ea   : > { %v2602_v24 = vpop.permute.xlu0 %2601  ;;  %2796 = vst.msk [vmem:[%s4908_s25 + $0xd8] sm:$0xff] %vm2768_vm0, %v2761_v4  ;;  %2795 = vst.msk [vmem:[%s4908_s25 + $0xd0] sm:$0xff] %vm2768_vm0, %v2760_v29  ;;  %v2729_v30 = vadd.f32 %v4899_v51, %v2688_v46  ;;  %v2656_v41 = vmul.f32 %v4881_v32, %v2607_v56 }
 0x2eb   : > { %v2728_v28 = vadd.f32 %v4899_v51, %v2687_v60  ;;  %v2655_v50 = vmul.f32 %v4881_v32, %v2602_v24 }
 0x2ec   : > { %v2763_v53 = vmax.f32 %v2729_v30, 0.0  ;;  %v2690_v1 = vadd.f32 %v2656_v41, %v4860_v18 }
 0x2ed   : > { %v2762_v44 = vmax.f32 %v2728_v28, 0.0  ;;  %v2689_v49 = vadd.f32 %v2655_v50, %v4862_v9  ;;  %v2617_v40 = vpop.permute.xlu1 %2616 }
 0x2ee   : > { %v2612_v35 = vpop.permute.xlu0 %2611  ;;  %2798 = vst.msk [vmem:[%s4908_s25 + $0xe8] sm:$0xff] %vm2768_vm0, %v2763_v53  ;;  %v2731_v37 = vadd.f32 %v4899_v51, %v2690_v1  ;;  %v2658_v55 = vmul.f32 %v4881_v32, %v2617_v40 }
 0x2ef   : > { %2797 = vst.msk [vmem:[%s4908_s25 + $0xe0] sm:$0xff] %vm2768_vm0, %v2762_v44  ;;  %v2730_v27 = vadd.f32 %v4899_v51, %v2689_v49  ;;  %v2657_v11 = vmul.f32 %v4881_v32, %v2612_v35 }
 0x2f0   : > { %v2765_v5 = vmax.f32 %v2731_v37, 0.0  ;;  %v2692_v9 = vadd.f32 %v2658_v55, %v4884_v57 }
 0x2f1   : > { %v2764_v18 = vmax.f32 %v2730_v27, 0.0  ;;  %v2691_v13 = vadd.f32 %v2657_v11, %v4887_v20 }
 0x2f2   : > { %2800 = vst.msk [vmem:[%s4908_s25 + $0xf8] sm:$0xff] %vm2768_vm0, %v2765_v5  ;;  %v2733_v59 = vadd.f32 %v4899_v51, %v2692_v9 }
 0x2f3   : > { %2799 = vst.msk [vmem:[%s4908_s25 + $0xf0] sm:$0xff] %vm2768_vm0, %v2764_v18  ;;  %v2732_v15 = vadd.f32 %v4899_v51, %v2691_v13 }
 0x2f4   : > { %v2767_v48 = vmax.f32 %v2733_v59, 0.0 }
 0x2f5   : > { %v2766_v62 = vmax.f32 %v2732_v15, 0.0 }
 0x2f6   : > { %2803 = vst.msk [vmem:[%s4908_s25 + $0x108] sm:$0x7f] %vm2802_vm1, %v2767_v48 }
 0x2f7   : > { %2801 = vst.msk [vmem:[%s4908_s25 + $0x100] sm:$0xff] %vm2768_vm0, %v2766_v62 }
 0x2f8 PF: > { %s13_s12 = sadd.s32 1, %s3080_s12  }
 0x2f9   : > { %p10_p4 = scmp.ge.s32.totalorder %s13_s12, 4  }
 0x2fb   :  { %12 = sbr.rel (!%p10_p4) target bundleno = 1 (0x1), region = 73 }

</bundles_post_ra>
